<compile_context>
chip_gen: v5e
topology: v5e:2x2
jax: 0.10.0
libtpu: 0.0.40
codegen_flags: <defaults>
</compile_context>

<pallas_src>
import jax
import jax.numpy as jnp
from jax.experimental import pallas as pl
from jax.experimental.pallas import tpu as pltpu

_OUT_PAD = 128  # lane-dense width for the final (N=1) layer


def _leaky_relu(h, slope=0.1):
    # max(h, slope*h) == LeakyReLU(slope) for 0 < slope < 1.
    return jnp.maximum(h, slope * h)


def qnet_kernel(x_ref,
                w1_ref, b1_ref,
                w2_ref, b2_ref,
                w3_ref, b3_ref,
                w4_ref, b4_ref,
                o_ref):
    # Layer 1: single K=48 contraction (one-hot/concat fused on the host side).
    h = jnp.dot(x_ref[...], w1_ref[...],
                preferred_element_type=jnp.float32) + b1_ref[...]
    h = _leaky_relu(h)

    h = jnp.dot(h.astype(jnp.bfloat16), w2_ref[...],
                preferred_element_type=jnp.float32) + b2_ref[...]
    h = _leaky_relu(h)

    h = jnp.dot(h.astype(jnp.bfloat16), w3_ref[...],
                preferred_element_type=jnp.float32) + b3_ref[...]
    h = _leaky_relu(h)

    # Lane-dense final layer (W4 zero-padded to 128 output columns).
    o_ref[...] = jnp.dot(h.astype(jnp.bfloat16), w4_ref[...],
                         preferred_element_type=jnp.float32) + b4_ref[...]


def qnetwork_forward(actions, current_bans, current_coeffs, kernel_params):
    """Replicates QNetwork.forward.

    actions:        int32 [B]
    current_bans:   [B, num_bans]
    current_coeffs: [B, num_actions]
    kernel_params:  output of prepare_kernel_params (bf16 [in,out] weights,
                    f32 [1,out] biases, final layer padded to 128 columns)
    returns:        float32 [B, 1]
    """
    B = actions.shape[0]
    na = current_coeffs.shape[1]
    (w1, b1), (w2, b2), (w3, b3), (w4, b4) = kernel_params

    # F.one_hot + torch.cat fused host-side into one [B, 48] bf16 operand
    # (negligible bytes; gives a single K=48 MXU contraction in the kernel).
    x = jnp.concatenate(
        [jax.nn.one_hot(actions, na, dtype=jnp.bfloat16),
         current_bans.astype(jnp.bfloat16),
         current_coeffs.astype(jnp.bfloat16)],
        axis=-1)
    k_in = x.shape[1]
    n_out = w4.shape[1]

    # Batch tile: single tile for small B (avoids duplicating the resident
    # weight stream across v7x cores); 256 for large B to match the 256x256 MXU.
    tb = B if B <= 256 else 256
    grid = (pl.cdiv(B, tb),)  # ragged last tile handled by Pallas; no jnp.pad.

    def stream_spec(cols):
        # Streams one batch tile per grid step (default double-buffered).
        return pl.BlockSpec((tb, cols), lambda i: (i, 0))

    def resident_spec(shape):
        # Constant index_map -> fetched once, stays VMEM-resident.  Buffered(1)
        # drops the useless second buffer copy (~3.25 MiB VMEM saved total).
        return pl.BlockSpec(shape, lambda i: (0, 0),
                            pipeline_mode=pl.Buffered(1))

    out = pl.pallas_call(
        qnet_kernel,
        out_shape=jax.ShapeDtypeStruct((B, n_out), jnp.float32),
        grid_spec=pltpu.PrefetchScalarGridSpec(
            num_scalar_prefetch=0,
            grid=grid,
            in_specs=[
                stream_spec(k_in),
                resident_spec(w1.shape), resident_spec(b1.shape),
                resident_spec(w2.shape), resident_spec(b2.shape),
                resident_spec(w3.shape), resident_spec(b3.shape),
                resident_spec(w4.shape), resident_spec(b4.shape),
            ],
            out_specs=stream_spec(n_out),
        ),
        compiler_params=pltpu.CompilerParams(
            dimension_semantics=("parallel",),
            vmem_limit_bytes=32 * 1024 * 1024),
    )(x, w1, b1, w2, b2, w3, b3, w4, b4)

    return out[:, :1]


def init_params(key, in_features):
    """Deterministic f32 init of the 4 Linear layers (LazyLinear shapes resolved).

    Weights stored [in, out] (transposed vs. PyTorch's [out, in]); true shapes.
    """
    sizes = [(in_features, 1024), (1024, 1024), (1024, 512), (512, 1)]
    params = []
    for fan_in, fan_out in sizes:
        key, kw, kb = jax.random.split(key, 3)
        bound = float(fan_in) ** -0.5
        w = jax.random.uniform(kw, (fan_in, fan_out), jnp.float32, -bound, bound)
        b = jax.random.uniform(kb, (1, fan_out), jnp.float32, -bound, bound)
        params.append((w, b))
    return params


def prepare_kernel_params(params_f32):
    """Convert f32 [in,out] params to the kernel's inference layout:
    bf16 weights, f32 biases, final layer zero-padded to 128 output columns
    (lane-dense last matmul + unmasked output store)."""
    (w1, b1), (w2, b2), (w3, b3), (w4, b4) = params_f32
    w4p = jnp.pad(w4, ((0, 0), (0, _OUT_PAD - w4.shape[1])))
    b4p = jnp.pad(b4, ((0, 0), (0, _OUT_PAD - b4.shape[1])))
    return (
        (w1.astype(jnp.bfloat16), b1),
        (w2.astype(jnp.bfloat16), b2),
        (w3.astype(jnp.bfloat16), b3),
        (w4p.astype(jnp.bfloat16), b4p),
    )


if __name__ == "__main__":
    key = jax.random.PRNGKey(0)

    B = 2             # batch
    num_actions = 16  # one-hot width and coeff width
    num_bans = 16

    k_act, k_bans, k_coeffs, k_params = jax.random.split(key, 4)
    actions = jax.random.randint(k_act, (B,), 0, num_actions, dtype=jnp.int32)
    current_bans = jax.random.normal(k_bans, (B, num_bans), jnp.float32)
    current_coeffs = jax.random.normal(k_coeffs, (B, num_actions), jnp.float32)

    in_features = num_actions + num_bans + num_actions  # 48
    params_f32 = init_params(k_params, in_features)
    kernel_params = prepare_kernel_params(params_f32)

    fwd = jax.jit(qnetwork_forward)
    out = fwd(actions, current_bans, current_coeffs, kernel_params)
    jax.block_until_ready(out)

    # Pure-JAX reference with the same bf16-weight / f32-accumulate numerics.
    x_ref = jnp.concatenate(
        [jax.nn.one_hot(actions, num_actions, dtype=jnp.bfloat16),
         current_bans.astype(jnp.bfloat16),
         current_coeffs.astype(jnp.bfloat16)],
        axis=-1)
    h = x_ref
    for i, (w, b) in enumerate(params_f32):
        h = jnp.dot(h.astype(jnp.bfloat16), w.astype(jnp.bfloat16),
                    preferred_element_type=jnp.float32) + b
        if i < 3:
            h = jnp.maximum(h, 0.1 * h)   # LeakyReLU(0.1), matching the module

    assert out.shape == (B, 1)
    assert jnp.allclose(out, h, atol=2e-2, rtol=2e-2)

    print("KERNEL_OK")
</pallas_src>

<mosaic_0001>
module attributes {stable_mosaic.version = 11 : i64} {
  func.func @qnet_kernel(%arg0: i32, %arg1: memref<2x48xbf16, #tpu.memory_space<vmem>>, %arg2: memref<48x1024xbf16, #tpu.memory_space<vmem>>, %arg3: memref<1x1024xf32, #tpu.memory_space<vmem>>, %arg4: memref<1024x1024xbf16, #tpu.memory_space<vmem>>, %arg5: memref<1x1024xf32, #tpu.memory_space<vmem>>, %arg6: memref<1024x512xbf16, #tpu.memory_space<vmem>>, %arg7: memref<1x512xf32, #tpu.memory_space<vmem>>, %arg8: memref<512x128xbf16, #tpu.memory_space<vmem>>, %arg9: memref<1x128xf32, #tpu.memory_space<vmem>>, %arg10: memref<2x128xf32, #tpu.memory_space<vmem>>) attributes {dimension_semantics = [#tpu.dimension_semantics<parallel>], iteration_bounds = array<i64: 1>, scalar_prefetch = 0 : i64, scratch_operands = 0 : i64, tpu.core_type = #tpu.core_type<tc>, window_params = [{transform_indices = @transform_0, window_bounds = array<i64: 2, 48>}, {pipeline_mode = #tpu.pipeline_mode<synchronous>, transform_indices = @transform_1, window_bounds = array<i64: 48, 1024>}, {pipeline_mode = #tpu.pipeline_mode<synchronous>, transform_indices = @transform_2, window_bounds = array<i64: 1, 1024>}, {pipeline_mode = #tpu.pipeline_mode<synchronous>, transform_indices = @transform_3, window_bounds = array<i64: 1024, 1024>}, {pipeline_mode = #tpu.pipeline_mode<synchronous>, transform_indices = @transform_4, window_bounds = array<i64: 1, 1024>}, {pipeline_mode = #tpu.pipeline_mode<synchronous>, transform_indices = @transform_5, window_bounds = array<i64: 1024, 512>}, {pipeline_mode = #tpu.pipeline_mode<synchronous>, transform_indices = @transform_6, window_bounds = array<i64: 1, 512>}, {pipeline_mode = #tpu.pipeline_mode<synchronous>, transform_indices = @transform_7, window_bounds = array<i64: 512, 128>}, {pipeline_mode = #tpu.pipeline_mode<synchronous>, transform_indices = @transform_8, window_bounds = array<i64: 1, 128>}, {transform_indices = @transform_9, window_bounds = array<i64: 2, 128>}]} {
    %c0 = arith.constant 0 : index
    %c0_0 = arith.constant 0 : index
    %0 = vector.load %arg1[%c0, %c0_0] : memref<2x48xbf16, #tpu.memory_space<vmem>>, vector<2x48xbf16>
    %c0_1 = arith.constant 0 : index
    %c0_2 = arith.constant 0 : index
    %1 = vector.load %arg2[%c0_1, %c0_2] : memref<48x1024xbf16, #tpu.memory_space<vmem>>, vector<48x1024xbf16>
    %cst = arith.constant dense<0.000000e+00> : vector<2x1024xf32>
    %2 = tpu.matmul %0, %1, %cst {dimension_numbers = #tpu.dot_dimension_numbers<[1], [0], [0], [1], [0, 0, 1, 1], [], []>} : vector<2x48xbf16>, vector<48x1024xbf16>, vector<2x1024xf32> -> vector<2x1024xf32>
    %c0_3 = arith.constant 0 : index
    %c0_4 = arith.constant 0 : index
    %3 = vector.load %arg3[%c0_3, %c0_4] : memref<1x1024xf32, #tpu.memory_space<vmem>>, vector<1x1024xf32>
    %4 = vector.broadcast %3 : vector<1x1024xf32> to vector<2x1024xf32>
    %5 = arith.addf %2, %4 : vector<2x1024xf32>
    %cst_5 = arith.constant 1.000000e-01 : f32
    %6 = vector.broadcast %cst_5 : f32 to vector<2x1024xf32>
    %7 = arith.mulf %6, %5 : vector<2x1024xf32>
    %8 = arith.maximumf %5, %7 : vector<2x1024xf32>
    %9 = arith.truncf %8 : vector<2x1024xf32> to vector<2x1024xbf16>
    %c0_6 = arith.constant 0 : index
    %c0_7 = arith.constant 0 : index
    %10 = vector.load %arg4[%c0_6, %c0_7] : memref<1024x1024xbf16, #tpu.memory_space<vmem>>, vector<1024x1024xbf16>
    %cst_8 = arith.constant dense<0.000000e+00> : vector<2x1024xf32>
    %11 = tpu.matmul %9, %10, %cst_8 {dimension_numbers = #tpu.dot_dimension_numbers<[1], [0], [0], [1], [0, 0, 1, 1], [], []>} : vector<2x1024xbf16>, vector<1024x1024xbf16>, vector<2x1024xf32> -> vector<2x1024xf32>
    %c0_9 = arith.constant 0 : index
    %c0_10 = arith.constant 0 : index
    %12 = vector.load %arg5[%c0_9, %c0_10] : memref<1x1024xf32, #tpu.memory_space<vmem>>, vector<1x1024xf32>
    %13 = vector.broadcast %12 : vector<1x1024xf32> to vector<2x1024xf32>
    %14 = arith.addf %11, %13 : vector<2x1024xf32>
    %cst_11 = arith.constant 1.000000e-01 : f32
    %15 = vector.broadcast %cst_11 : f32 to vector<2x1024xf32>
    %16 = arith.mulf %15, %14 : vector<2x1024xf32>
    %17 = arith.maximumf %14, %16 : vector<2x1024xf32>
    %18 = arith.truncf %17 : vector<2x1024xf32> to vector<2x1024xbf16>
    %c0_12 = arith.constant 0 : index
    %c0_13 = arith.constant 0 : index
    %19 = vector.load %arg6[%c0_12, %c0_13] : memref<1024x512xbf16, #tpu.memory_space<vmem>>, vector<1024x512xbf16>
    %cst_14 = arith.constant dense<0.000000e+00> : vector<2x512xf32>
    %20 = tpu.matmul %18, %19, %cst_14 {dimension_numbers = #tpu.dot_dimension_numbers<[1], [0], [0], [1], [0, 0, 1, 1], [], []>} : vector<2x1024xbf16>, vector<1024x512xbf16>, vector<2x512xf32> -> vector<2x512xf32>
    %c0_15 = arith.constant 0 : index
    %c0_16 = arith.constant 0 : index
    %21 = vector.load %arg7[%c0_15, %c0_16] : memref<1x512xf32, #tpu.memory_space<vmem>>, vector<1x512xf32>
    %22 = vector.broadcast %21 : vector<1x512xf32> to vector<2x512xf32>
    %23 = arith.addf %20, %22 : vector<2x512xf32>
    %cst_17 = arith.constant 1.000000e-01 : f32
    %24 = vector.broadcast %cst_17 : f32 to vector<2x512xf32>
    %25 = arith.mulf %24, %23 : vector<2x512xf32>
    %26 = arith.maximumf %23, %25 : vector<2x512xf32>
    %27 = arith.truncf %26 : vector<2x512xf32> to vector<2x512xbf16>
    %c0_18 = arith.constant 0 : index
    %c0_19 = arith.constant 0 : index
    %28 = vector.load %arg8[%c0_18, %c0_19] : memref<512x128xbf16, #tpu.memory_space<vmem>>, vector<512x128xbf16>
    %cst_20 = arith.constant dense<0.000000e+00> : vector<2x128xf32>
    %29 = tpu.matmul %27, %28, %cst_20 {dimension_numbers = #tpu.dot_dimension_numbers<[1], [0], [0], [1], [0, 0, 1, 1], [], []>} : vector<2x512xbf16>, vector<512x128xbf16>, vector<2x128xf32> -> vector<2x128xf32>
    %c0_21 = arith.constant 0 : index
    %c0_22 = arith.constant 0 : index
    %30 = vector.load %arg9[%c0_21, %c0_22] : memref<1x128xf32, #tpu.memory_space<vmem>>, vector<1x128xf32>
    %31 = vector.broadcast %30 : vector<1x128xf32> to vector<2x128xf32>
    %32 = arith.addf %29, %31 : vector<2x128xf32>
    %c0_23 = arith.constant 0 : index
    %c0_24 = arith.constant 0 : index
    %33 = vector.load %arg10[%c0_23, %c0_24] : memref<2x128xf32, #tpu.memory_space<vmem>>, vector<2x128xf32>
    tpu.vector_store %arg10[%c0_23, %c0_24], %32 {strides = array<i32>} : memref<2x128xf32, #tpu.memory_space<vmem>>, vector<2x128xf32>,
    return
  }
  func.func @transform_0(%arg0: i32) -> (i32, i32) {
    %c0_i32 = arith.constant 0 : i32
    %c0_i32_0 = arith.constant 0 : i32
    return %arg0, %c0_i32 : i32, i32
  }
  func.func @transform_1(%arg0: i32) -> (i32, i32) {
    %c0_i32 = arith.constant 0 : i32
    %c0_i32_0 = arith.constant 0 : i32
    %c0_i32_1 = arith.constant 0 : i32
    return %c0_i32, %c0_i32_0 : i32, i32
  }
  func.func @transform_2(%arg0: i32) -> (i32, i32) {
    %c0_i32 = arith.constant 0 : i32
    %c0_i32_0 = arith.constant 0 : i32
    %c0_i32_1 = arith.constant 0 : i32
    return %c0_i32, %c0_i32_0 : i32, i32
  }
  func.func @transform_3(%arg0: i32) -> (i32, i32) {
    %c0_i32 = arith.constant 0 : i32
    %c0_i32_0 = arith.constant 0 : i32
    %c0_i32_1 = arith.constant 0 : i32
    return %c0_i32, %c0_i32_0 : i32, i32
  }
  func.func @transform_4(%arg0: i32) -> (i32, i32) {
    %c0_i32 = arith.constant 0 : i32
    %c0_i32_0 = arith.constant 0 : i32
    %c0_i32_1 = arith.constant 0 : i32
    return %c0_i32, %c0_i32_0 : i32, i32
  }
  func.func @transform_5(%arg0: i32) -> (i32, i32) {
    %c0_i32 = arith.constant 0 : i32
    %c0_i32_0 = arith.constant 0 : i32
    %c0_i32_1 = arith.constant 0 : i32
    return %c0_i32, %c0_i32_0 : i32, i32
  }
  func.func @transform_6(%arg0: i32) -> (i32, i32) {
    %c0_i32 = arith.constant 0 : i32
    %c0_i32_0 = arith.constant 0 : i32
    %c0_i32_1 = arith.constant 0 : i32
    return %c0_i32, %c0_i32_0 : i32, i32
  }
  func.func @transform_7(%arg0: i32) -> (i32, i32) {
    %c0_i32 = arith.constant 0 : i32
    %c0_i32_0 = arith.constant 0 : i32
    %c0_i32_1 = arith.constant 0 : i32
    return %c0_i32, %c0_i32_0 : i32, i32
  }
  func.func @transform_8(%arg0: i32) -> (i32, i32) {
    %c0_i32 = arith.constant 0 : i32
    %c0_i32_0 = arith.constant 0 : i32
    %c0_i32_1 = arith.constant 0 : i32
    return %c0_i32, %c0_i32_0 : i32, i32
  }
  func.func @transform_9(%arg0: i32) -> (i32, i32) {
    %c0_i32 = arith.constant 0 : i32
    %c0_i32_0 = arith.constant 0 : i32
    return %arg0, %c0_i32 : i32, i32
  }
}

</mosaic_0001>

<bundles_post_ra>
// kernel: qnetwork_forward.1
= control target key start
LH: loop header
LB: loop body
LE: loop exit
PB: predicated region body
PF: predicated region fallthrough
CT: control target
= control target key end

     0   :  { %14 = vsyncpa [#allocation3], 0  ;;  %s11408_s0 = inlined_call_operand.vmem [shape: bf16[2,48], index: 0, kind: input, shape index: {}]   ;;  %s11409_s1 = inlined_call_operand.hbm [shape: bf16[48,1024], index: 1, kind: input, shape index: {}]   ;;  %s11410_s2 = inlined_call_operand.hbm [shape: f32[1,1024], index: 2, kind: input, shape index: {}]   ;;  %s11411_s3 = inlined_call_operand.hbm [shape: bf16[1024,1024], index: 3, kind: input, shape index: {}]   ;;  %s11412_s4 = inlined_call_operand.hbm [shape: f32[1,1024], index: 4, kind: input, shape index: {}]   ;;  %s11413_s5 = inlined_call_operand.hbm [shape: bf16[1024,512], index: 5, kind: input, shape index: {}]   ;;  %s11414_s6 = inlined_call_operand.hbm [shape: f32[1,512], index: 6, kind: input, shape index: {}]   ;;  %s11415_s7 = inlined_call_operand.hbm [shape: bf16[512,128], index: 7, kind: input, shape index: {}]   ;;  %s11416_s8 = inlined_call_operand.hbm [shape: f32[1,128], index: 8, kind: input, shape index: {}]   ;;  %s11417_s9 = inlined_call_operand.vmem [shape: f32[2,128], index: 9, kind: output, shape index: {}]  }
   0x1   :  { %15 = vsyncpa [#allocation5], 0 }
   0x2   :  { %16 = vsyncpa [#allocation8], 0 }
   0x3   :  { %17 = vsyncpa [#allocation11], 0  ;;  %s39_s11 = sshll.u32 %s11410_s2, 4  ;;  %s40_s11 = int_to_ptr.hbm [resolvable:$true] %s39_s11 }
   0x4   :  { %18 = vsyncpa [#allocation14], 0  ;;  %s11035_s12 = smov [#allocation4]   ;;  %s63_s16 = sshll.u32 %s11412_s4, 4  ;;  %s64_s16 = int_to_ptr.hbm [resolvable:$true] %s63_s16 }
   0x5   :  { %s41_s13 = sshll.u32 %s11035_s12, 4  ;;  %s11036_s17 = smov [#allocation7]   ;;  %s42_s13 = int_to_ptr.vmem [resolvable:$true] %s41_s13 }
   0x6   :  { %44 = dma.hbm_to_vmem [thread:$0]  %s40_s11, 128, %s42_s13, [#allocation5]  }
   0x7   :  { %s65_s18 = sshll.u32 %s11036_s17, 4  ;;  %s87_s21 = sshll.u32 %s11414_s6, 4  ;;  %s66_s18 = int_to_ptr.vmem [resolvable:$true] %s65_s18  ;;  %s88_s21 = int_to_ptr.hbm [resolvable:$true] %s87_s21 }
   0x8   :  { %68 = dma.hbm_to_vmem [thread:$0]  %s64_s16, 128, %s66_s18, [#allocation8]  }
   0x9   :  { %s25_s23 = sshll.u32 %s11409_s1, 4  ;;  %s11037_s24 = smov [#allocation10]   ;;  %s26_s23 = int_to_ptr.hbm [resolvable:$true] %s25_s23 }
   0xa   :  { %s89_s25 = sshll.u32 %s11037_s24, 4  ;;  %s11038_s4 = smov [#allocation2]   ;;  %s90_s25 = int_to_ptr.vmem [resolvable:$true] %s89_s25 }
   0xb   :  { %92 = dma.hbm_to_vmem [thread:$0]  %s88_s21, 64, %s90_s25, [#allocation11]  }
   0xc   :  { %s27_s26 = sshll.u32 %s11038_s4, 4  ;;  %s11039_s27 = smov 512   ;;  %s28_s26 = int_to_ptr.vmem [resolvable:$true] %s27_s26 }
   0xd   :  { %s11040_s28 = smov 32   ;;  %s49_s30 = sshll.u32 %s11411_s3, 4  ;;  %s50_s30 = int_to_ptr.hbm [resolvable:$true] %s49_s30 }
   0xe   :  { %33 = dma.hbm_to_vmem [thread:$0]  %s26_s23, 3072, %s28_s26, [#allocation3], %s11039_s27, %s11039_s27, %s11040_s28  }
   0xf   :  { %s11041_s10 = smov [#allocation6]   ;;  %s73_s13 = sshll.u32 %s11413_s5, 4  ;;  %s74_s13 = int_to_ptr.hbm [resolvable:$true] %s73_s13 }
  0x10   :  { %s51_s11 = sshll.u32 %s11041_s10, 4  ;;  %s11042_s14 = smov [#allocation9]   ;;  %s52_s11 = int_to_ptr.vmem [resolvable:$true] %s51_s11 }
  0x11   :  { %57 = dma.hbm_to_vmem [thread:$0]  %s50_s30, 65536, %s52_s11, [#allocation5], %s11039_s27, %s11039_s27, %s11040_s28  }
  0x12   :  { %s75_s15 = sshll.u32 %s11042_s14, 4  ;;  %s11043_s16 = smov 256   ;;  %s76_s15 = int_to_ptr.vmem [resolvable:$true] %s75_s15 }
  0x13   :  { %s11044_s17 = smov 16   ;;  %s97_s3 = sshll.u32 %s11415_s7, 4  ;;  %s98_s3 = int_to_ptr.hbm [resolvable:$true] %s97_s3 }
  0x14   :  { %81 = dma.hbm_to_vmem [thread:$0]  %s74_s13, 32768, %s76_s15, [#allocation8], %s11043_s16, %s11043_s16, %s11044_s17  }
  0x15   :  { %s11045_s20 = smov [#allocation12]   ;;  %s111_s5 = sshll.u32 %s11416_s8, 4  ;;  %s112_s5 = int_to_ptr.hbm [resolvable:$true] %s111_s5 }
  0x16   :  { %s99_s21 = sshll.u32 %s11045_s20, 4  ;;  %s11046_s23 = smov 64   ;;  %s100_s21 = int_to_ptr.vmem [resolvable:$true] %s99_s21 }
  0x17   :  { %s11047_s24 = smov 4   ;;  %s11048_s25 = smov [#allocation13]  }
  0x18   :  { %105 = dma.hbm_to_vmem [thread:$0]  %s98_s3, 4096, %s100_s21, [#allocation11], %s11046_s23, %s11046_s23, %s11047_s24  }
  0x19   :  { %s113_s4 = sshll.u32 %s11048_s25, 4  ;;  %s114_s4 = int_to_ptr.vmem [resolvable:$true] %s113_s4 }
  0x1a   :  { %116 = dma.hbm_to_vmem [thread:$0]  %s112_s5, 16, %s114_s4, [#allocation14]  }
  0x1b   :  { %11025 = dma.done.wait [#allocation3], 3072  }
  0x1c   :  { %11026 = vsyncadd [#allocation3], 4294964224 }
  0x1d   :  { %11027 = dma.done.wait [#allocation5], 65664  }
  0x1e   :  { %11028 = vsyncadd [#allocation5], 4294901632 }
  0x1f   :  { %11029 = dma.done.wait [#allocation8], 32896  }
  0x20   :  { %11030 = vsyncadd [#allocation8], 4294934400 }
  0x21   :  { %11031 = dma.done.wait [#allocation11], 4160  }
  0x22   :  { %11032 = vsyncadd [#allocation11], 4294963136 }
  0x23   :  { %11033 = dma.done.wait [#allocation14], 16  }
  0x24   :  { %11034 = vsyncadd [#allocation14], 4294967280  ;;  %v6753_v0 = vld [vmem:[#allocation2 + $0x80] sm:$0xf]  ;;  %v10007_v2 = vld [vmem:[#allocation2 + $0x84] sm:$0xf] }
  0x25   :  { %v10011_v1 = vld [vmem:[#allocation2 + $0x9c] sm:$0xf0]  ;;  %v6755_v4 = vld [vmem:[#allocation2 + $0xa0] sm:$0xf0]  ;;  %v6761_v5 = vld [vmem:[#allocation2 + $0x88] sm:$0xf] }
  0x26   :  { %v6754_v3 = vor.u32 %v10011_v1, %v6753_v0  ;;  %v10012_v6 = vld [vmem:[#allocation2 + $0xa4] sm:$0xf0]  ;;  %v6758_v7 = vor.u32 %v10007_v2, %v6755_v4  ;;  %v10008_v9 = vld [vmem:[#allocation2 + $0x8c] sm:$0xf]  ;;  %v6721_v11 = vld [vmem:[#allocation2 + $0x40] sm:$0xf] }
  0x27   :  { %v6762_v8 = vor.u32 %v10012_v6, %v6761_v5  ;;  %v6763_v10 = vld [vmem:[#allocation2 + $0xa8] sm:$0xf0]  ;;  %v10003_v13 = vld [vmem:[#allocation2 + $0x5c] sm:$0xf0]  ;;  %v9999_v14 = vld [vmem:[#allocation2 + $0x44] sm:$0xf] }
  0x28   :  { %322 = vmatpush.bf16.msra.mxu0 %v6754_v3  ;;  %v6766_v12 = vor.u32 %v10008_v9, %v6763_v10  ;;  %v6723_v15 = vld [vmem:[#allocation2 + $0x60] sm:$0xf0]  ;;  %335 = vmatpush.bf16.msra.mxu1 %v6758_v7  ;;  %v6722_v16 = vor.u32 %v10003_v13, %v6721_v11  ;;  %v6729_v18 = vld [vmem:[#allocation2 + $0x48] sm:$0xf]  ;;  %v10000_v20 = vld [vmem:[#allocation2 + $0x4c] sm:$0xf] }
  0x29   :  { %348 = vmatpush.bf16.msra.mxu2 %v6762_v8  ;;  %v6726_v17 = vor.u32 %v9999_v14, %v6723_v15  ;;  %v10004_v19 = vld [vmem:[#allocation2 + $0x64] sm:$0xf0]  ;;  %v6731_v22 = vld [vmem:[#allocation2 + $0x68] sm:$0xf0]  ;;  %v6689_v23 = vld [vmem:[#allocation2] sm:$0xf] }
  0x2a   :  { %361 = vmatpush.bf16.msra.mxu3 %v6766_v12  ;;  %v6730_v21 = vor.u32 %v10004_v19, %v6729_v18  ;;  %v9995_v24 = vld [vmem:[#allocation2 + $0x1c] sm:$0xf0]  ;;  %v6734_v25 = vor.u32 %v10000_v20, %v6731_v22  ;;  %v9991_v26 = vld [vmem:[#allocation2 + $0x4] sm:$0xf]  ;;  %v6697_v28 = vld [vmem:[#allocation2 + $0x8] sm:$0xf] }
  0x2b   :  { %v6691_v27 = vld [vmem:[#allocation2 + $0x20] sm:$0xf0]  ;;  %v6690_v29 = vor.u32 %v9995_v24, %v6689_v23  ;;  %v9996_v30 = vld [vmem:[#allocation2 + $0x24] sm:$0xf0]  ;;  %v9992_v31 = vld [vmem:[#allocation2 + $0xc] sm:$0xf] }
  0x2c   :  { %323 = vmatpush.bf16.msra.mxu0 %v6722_v16  ;;  %v6699_v32 = vld [vmem:[#allocation2 + $0x28] sm:$0xf0]  ;;  %336 = vmatpush.bf16.msra.mxu1 %v6726_v17  ;;  %v6694_v33 = vor.u32 %v9991_v26, %v6691_v27  ;;  %v6698_v34 = vor.u32 %v9996_v30, %v6697_v28  ;;  %vm313_vm0 = vcmask 392192   ;;  %v6769_v35 = vld [vmem:[#allocation2 + $0x90] sm:$0xf] }
  0x2d   :  { %349 = vmatpush.bf16.msra.mxu2 %v6730_v21  ;;  %v10013_v36 = vld [vmem:[#allocation2 + $0xac] sm:$0xf0]  ;;  %v6702_v37 = vor.u32 %v9992_v31, %v6699_v32  ;;  %v11126_v38 = vld [vmem:[%s11408_s0] sm:$0x1]  ;;  %v10009_v40 = vld [vmem:[#allocation2 + $0x94] sm:$0xf] }
  0x2e   :  { %362 = vmatpush.bf16.msra.mxu3 %v6734_v25  ;;  %v6770_v39 = vor.u32 %v10013_v36, %v6769_v35  ;;  %v6771_v41 = vld [vmem:[#allocation2 + $0xb0] sm:$0xf0]  ;;  %v6777_v42 = vld [vmem:[#allocation2 + $0x98] sm:$0xf]  ;;  %v10010_v45 = vld [vmem:[#allocation2 + $0x9c] sm:$0xf] }
  0x2f   :  { %v6774_v43 = vor.u32 %v10009_v40, %v6771_v41  ;;  %v10014_v44 = vld [vmem:[#allocation2 + $0xb4] sm:$0xf0]  ;;  %v6779_v46 = vld [vmem:[#allocation2 + $0xb8] sm:$0xf0]  ;;  %v6737_v47 = vld [vmem:[#allocation2 + $0x50] sm:$0xf] }
  0x30   :  { %324 = vmatpush.bf16.msra.mxu0 %v6690_v29  ;;  %v10005_v48 = vld [vmem:[#allocation2 + $0x6c] sm:$0xf0]  ;;  %v10001_v49 = vld [vmem:[#allocation2 + $0x54] sm:$0xf]  ;;  %337 = vmatpush.bf16.msra.mxu1 %v6694_v33  ;;  %v6778_v50 = vor.u32 %v10014_v44, %v6777_v42  ;;  %v6782_v52 = vor.u32 %v10010_v45, %v6779_v46  ;;  %v6745_v54 = vld [vmem:[#allocation2 + $0x58] sm:$0xf] }
  0x31   :  { %350 = vmatpush.bf16.msra.mxu2 %v6698_v34  ;;  %v6739_v51 = vld [vmem:[#allocation2 + $0x70] sm:$0xf0]  ;;  %v6738_v53 = vor.u32 %v10005_v48, %v6737_v47  ;;  %v10006_v55 = vld [vmem:[#allocation2 + $0x74] sm:$0xf0]  ;;  %v10002_v56 = vld [vmem:[#allocation2 + $0x5c] sm:$0xf] }
  0x32   :  { %363 = vmatpush.bf16.msra.mxu3 %v6702_v37  ;;  %v6742_v57 = vor.u32 %v10001_v49, %v6739_v51  ;;  %v6747_v58 = vld [vmem:[#allocation2 + $0x78] sm:$0xf0]  ;;  %v6705_v59 = vld [vmem:[#allocation2 + $0x10] sm:$0xf]  ;;  %v9993_v61 = vld [vmem:[#allocation2 + $0x14] sm:$0xf]  ;;  %v6746_v0 = vor.u32 %v10006_v55, %v6745_v54 }
  0x33   :  { %6783 = vmatmul.msk.bf16.vlgmr.msra.gmra.mxu0 %vm313_vm0, %v11126_v38  ;;  %v9997_v60 = vld [vmem:[#allocation2 + $0x2c] sm:$0xf0]  ;;  %6784 = vmatmul.msk.bf16.vlgmr.msra.gmra.mxu1 %vm313_vm0, %v11126_v38  ;;  %v6707_v62 = vld [vmem:[#allocation2 + $0x30] sm:$0xf0]  ;;  %v6713_v63 = vld [vmem:[#allocation2 + $0x18] sm:$0xf]  ;;  %v6750_v4 = vor.u32 %v10002_v56, %v6747_v58 }
  0x34   :  { %374 = vmatpush.bf16.msrb.mxu0 %v6770_v39  ;;  %387 = vmatpush.bf16.msrb.mxu1 %v6774_v43  ;;  %v9998_v1 = vld [vmem:[#allocation2 + $0x34] sm:$0xf0]  ;;  %v7017_v2 = vld [vmem:[#allocation6 + $0x1c0] sm:$0xf]  ;;  %v6706_v5 = vor.u32 %v9997_v60, %v6705_v59  ;;  %v9994_v6 = vld [vmem:[#allocation2 + $0x1c] sm:$0xf]  ;;  %v6710_v9 = vor.u32 %v9993_v61, %v6707_v62 }
  0x35   :  { %6785 = vmatmul.msk.bf16.vlgmr.msra.gmra.mxu2 %vm313_vm0, %v11126_v38  ;;  %6786 = vmatmul.msk.bf16.vlgmr.msra.gmra.mxu3 %vm313_vm0, %v11126_v38  ;;  %v10075_v3 = vld [vmem:[#allocation6 + $0x1dc] sm:$0xf0]  ;;  %v6715_v10 = vld [vmem:[#allocation2 + $0x38] sm:$0xf0]  ;;  %v6714_v18 = vor.u32 %v9998_v1, %v6713_v63 }
  0x36   :  { %400 = vmatpush.bf16.msrb.mxu2 %v6778_v50  ;;  %413 = vmatpush.bf16.msrb.mxu3 %v6782_v52  ;;  %v7273_v7 = vld [vmem:[#allocation6 + $0x3c0] sm:$0xf]  ;;  %v7018_v11 = vor.u32 %v10075_v3, %v7017_v2  ;;  %v6718_v22 = vor.u32 %v9994_v6, %v6715_v10 }
  0x37   :  { %v10139_v8 = vld [vmem:[#allocation6 + $0x3dc] sm:$0xf0] }
  0x38   :  { %375 = vmatpush.bf16.msrb.mxu0 %v6738_v53  ;;  %388 = vmatpush.bf16.msrb.mxu1 %v6742_v57  ;;  %v6985_v12 = vld [vmem:[#allocation6 + $0x180] sm:$0xf]  ;;  %v7274_v14 = vor.u32 %v10139_v8, %v7273_v7 }
  0x39   :  { %v10067_v13 = vld [vmem:[#allocation6 + $0x19c] sm:$0xf0] }
  0x3a   :  { %v7529_v15 = vld [vmem:[#allocation6 + $0x5c0] sm:$0xf]  ;;  %401 = vmatpush.bf16.msrb.mxu2 %v6746_v0  ;;  %414 = vmatpush.bf16.msrb.mxu3 %v6750_v4  ;;  %v6986_v24 = vor.u32 %v10067_v13, %v6985_v12 }
  0x3b   :  { %v10203_v16 = vld [vmem:[#allocation6 + $0x5dc] sm:$0xf0] }
  0x3c   :  { %v7785_v17 = vld [vmem:[#allocation6 + $0x7c0] sm:$0xf]  ;;  %376 = vmatpush.bf16.msrb.mxu0 %v6706_v5  ;;  %v7530_v23 = vor.u32 %v10203_v16, %v7529_v15  ;;  %389 = vmatpush.bf16.msrb.mxu1 %v6710_v9 }
  0x3d   :  { %v7241_v19 = vld [vmem:[#allocation6 + $0x380] sm:$0xf] }
  0x3e   :  { %v10131_v20 = vld [vmem:[#allocation6 + $0x39c] sm:$0xf0]  ;;  %402 = vmatpush.bf16.msrb.mxu2 %v6714_v18  ;;  %415 = vmatpush.bf16.msrb.mxu3 %v6718_v22 }
  0x3f   :  { %v10267_v21 = vld [vmem:[#allocation6 + $0x7dc] sm:$0xf0]  ;;  %v7242_v28 = vor.u32 %v10131_v20, %v7241_v19 }
  0x40   :  { %3535 = vmatpush.bf16.msra.mxu0 %v7018_v11  ;;  %v7786_v25 = vor.u32 %v10267_v21, %v7785_v17  ;;  %v7497_v26 = vld [vmem:[#allocation6 + $0x580] sm:$0xf]  ;;  %3548 = vmatpush.bf16.msra.mxu1 %v7274_v14 }
  0x41   :  { %v10195_v27 = vld [vmem:[#allocation6 + $0x59c] sm:$0xf0] }
  0x42   :  { %v7753_v29 = vld [vmem:[#allocation6 + $0x780] sm:$0xf]  ;;  %3561 = vmatpush.bf16.msra.mxu2 %v7530_v23  ;;  %v7498_v34 = vor.u32 %v10195_v27, %v7497_v26  ;;  %3574 = vmatpush.bf16.msra.mxu3 %v7786_v25 }
  0x43   :  { %v10259_v30 = vld [vmem:[#allocation6 + $0x79c] sm:$0xf0]  ;;  %6787 = vmatmul.msk.bf16.vlgmr.msrb.gmra.mxu0 %vm313_vm0, %v11126_v38  ;;  %6788 = vmatmul.msk.bf16.vlgmr.msrb.gmra.mxu1 %vm313_vm0, %v11126_v38 }
  0x44   :  { %v6953_v31 = vld [vmem:[#allocation6 + $0x140] sm:$0xf]  ;;  %3536 = vmatpush.bf16.msra.mxu0 %v6986_v24  ;;  %v7754_v36 = vor.u32 %v10259_v30, %v7753_v29  ;;  %3549 = vmatpush.bf16.msra.mxu1 %v7242_v28 }
  0x45   :  { %v10059_v32 = vld [vmem:[#allocation6 + $0x15c] sm:$0xf0]  ;;  %6789 = vmatmul.msk.bf16.vlgmr.msrb.gmra.mxu2 %vm313_vm0, %v11126_v38  ;;  %6790 = vmatmul.msk.bf16.vlgmr.msrb.gmra.mxu3 %vm313_vm0, %v11126_v38 }
  0x46   :  { %v7209_v33 = vld [vmem:[#allocation6 + $0x340] sm:$0xf]  ;;  %v6954_v42 = vor.u32 %v10059_v32, %v6953_v31  ;;  %3562 = vmatpush.bf16.msra.mxu2 %v7498_v34  ;;  %3575 = vmatpush.bf16.msra.mxu3 %v7754_v36 }
  0x47   :  { %v10123_v35 = vld [vmem:[#allocation6 + $0x35c] sm:$0xf0] }
  0x48   :  { %v7465_v37 = vld [vmem:[#allocation6 + $0x540] sm:$0xf]  ;;  %v7210_v43 = vor.u32 %v10123_v35, %v7209_v33  ;;  %3537 = vmatpush.bf16.msra.mxu0 %v6954_v42 }
  0x49   :  { %v10187_v39 = vld [vmem:[#allocation6 + $0x55c] sm:$0xf0] }
  0x4a   :  { %v7721_v40 = vld [vmem:[#allocation6 + $0x740] sm:$0xf]  ;;  %v7466_v47 = vor.u32 %v10187_v39, %v7465_v37  ;;  %3550 = vmatpush.bf16.msra.mxu1 %v7210_v43 }
  0x4b   :  { %v10251_v41 = vld [vmem:[#allocation6 + $0x75c] sm:$0xf0] }
  0x4c   :  { %v6921_v44 = vld [vmem:[#allocation6 + $0x100] sm:$0xf]  ;;  %v7722_v49 = vor.u32 %v10251_v41, %v7721_v40  ;;  %3563 = vmatpush.bf16.msra.mxu2 %v7466_v47 }
  0x4d   :  { %v10051_v45 = vld [vmem:[#allocation6 + $0x11c] sm:$0xf0] }
  0x4e   :  { %v7177_v46 = vld [vmem:[#allocation6 + $0x300] sm:$0xf]  ;;  %v6922_v54 = vor.u32 %v10051_v45, %v6921_v44  ;;  %3576 = vmatpush.bf16.msra.mxu3 %v7722_v49 }
  0x4f   :  { %v10115_v48 = vld [vmem:[#allocation6 + $0x31c] sm:$0xf0] }
  0x50   :  { %v7433_v50 = vld [vmem:[#allocation6 + $0x500] sm:$0xf]  ;;  %v7178_v55 = vor.u32 %v10115_v48, %v7177_v46  ;;  %3538 = vmatpush.bf16.msra.mxu0 %v6922_v54 }
  0x51   :  { %v10179_v51 = vld [vmem:[#allocation6 + $0x51c] sm:$0xf0] }
  0x52   :  { %v7689_v52 = vld [vmem:[#allocation6 + $0x700] sm:$0xf]  ;;  %v7434_v59 = vor.u32 %v10179_v51, %v7433_v50  ;;  %3551 = vmatpush.bf16.msra.mxu1 %v7178_v55 }
  0x53   :  { %v10243_v53 = vld [vmem:[#allocation6 + $0x71c] sm:$0xf0] }
  0x54   :  { %v6889_v56 = vld [vmem:[#allocation6 + $0xc0] sm:$0xf]  ;;  %v7690_v61 = vor.u32 %v10243_v53, %v7689_v52  ;;  %3564 = vmatpush.bf16.msra.mxu2 %v7434_v59 }
  0x55   :  { %v10043_v57 = vld [vmem:[#allocation6 + $0xdc] sm:$0xf0] }
  0x56   :  { %v7145_v58 = vld [vmem:[#allocation6 + $0x2c0] sm:$0xf]  ;;  %v6890_v2 = vor.u32 %v10043_v57, %v6889_v56  ;;  %3577 = vmatpush.bf16.msra.mxu3 %v7690_v61 }
  0x57   :  { %v10107_v60 = vld [vmem:[#allocation6 + $0x2dc] sm:$0xf0] }
  0x58   :  { %v7401_v62 = vld [vmem:[#allocation6 + $0x4c0] sm:$0xf]  ;;  %v7146_v38 = vor.u32 %v10107_v60, %v7145_v58  ;;  %3539 = vmatpush.bf16.msra.mxu0 %v6890_v2 }
  0x59   :  { %v10171_v63 = vld [vmem:[#allocation6 + $0x4dc] sm:$0xf0] }
  0x5a   :  { %v7657_v0 = vld [vmem:[#allocation6 + $0x6c0] sm:$0xf]  ;;  %v7402_v6 = vor.u32 %v10171_v63, %v7401_v62  ;;  %3552 = vmatpush.bf16.msra.mxu1 %v7146_v38 }
  0x5b   :  { %v10235_v1 = vld [vmem:[#allocation6 + $0x6dc] sm:$0xf0] }
  0x5c   :  { %v6857_v3 = vld [vmem:[#allocation6 + $0x80] sm:$0xf]  ;;  %v7658_v8 = vor.u32 %v10235_v1, %v7657_v0  ;;  %3565 = vmatpush.bf16.msra.mxu2 %v7402_v6 }
  0x5d   :  { %v10035_v4 = vld [vmem:[#allocation6 + $0x9c] sm:$0xf0] }
  0x5e   :  { %v7113_v5 = vld [vmem:[#allocation6 + $0x280] sm:$0xf]  ;;  %v6858_v13 = vor.u32 %v10035_v4, %v6857_v3  ;;  %3578 = vmatpush.bf16.msra.mxu3 %v7658_v8 }
  0x5f   :  { %v10099_v7 = vld [vmem:[#allocation6 + $0x29c] sm:$0xf0] }
  0x60   :  { %v7369_v9 = vld [vmem:[#allocation6 + $0x480] sm:$0xf]  ;;  %v7114_v14 = vor.u32 %v10099_v7, %v7113_v5  ;;  %3540 = vmatpush.bf16.msra.mxu0 %v6858_v13 }
  0x61   :  { %v10163_v10 = vld [vmem:[#allocation6 + $0x49c] sm:$0xf0] }
  0x62   :  { %v7625_v11 = vld [vmem:[#allocation6 + $0x680] sm:$0xf]  ;;  %v7370_v18 = vor.u32 %v10163_v10, %v7369_v9  ;;  %3553 = vmatpush.bf16.msra.mxu1 %v7114_v14 }
  0x63   :  { %v10227_v12 = vld [vmem:[#allocation6 + $0x69c] sm:$0xf0] }
  0x64   :  { %v6825_v15 = vld [vmem:[#allocation6 + $0x40] sm:$0xf]  ;;  %v7626_v20 = vor.u32 %v10227_v12, %v7625_v11  ;;  %3566 = vmatpush.bf16.msra.mxu2 %v7370_v18 }
  0x65   :  { %v10027_v16 = vld [vmem:[#allocation6 + $0x5c] sm:$0xf0] }
  0x66   :  { %v7081_v17 = vld [vmem:[#allocation6 + $0x240] sm:$0xf]  ;;  %v6826_v25 = vor.u32 %v10027_v16, %v6825_v15  ;;  %3579 = vmatpush.bf16.msra.mxu3 %v7626_v20 }
  0x67   :  { %v10091_v19 = vld [vmem:[#allocation6 + $0x25c] sm:$0xf0] }
  0x68   :  { %v7337_v21 = vld [vmem:[#allocation6 + $0x440] sm:$0xf]  ;;  %v7082_v28 = vor.u32 %v10091_v19, %v7081_v17  ;;  %3541 = vmatpush.bf16.msra.mxu0 %v6826_v25 }
  0x69   :  { %v10155_v22 = vld [vmem:[#allocation6 + $0x45c] sm:$0xf0] }
  0x6a   :  { %v7593_v23 = vld [vmem:[#allocation6 + $0x640] sm:$0xf]  ;;  %v7338_v32 = vor.u32 %v10155_v22, %v7337_v21  ;;  %3554 = vmatpush.bf16.msra.mxu1 %v7082_v28 }
  0x6b   :  { %v10219_v24 = vld [vmem:[#allocation6 + $0x65c] sm:$0xf0] }
  0x6c   :  { %v6793_v26 = vld [vmem:[#allocation6] sm:$0xf]  ;;  %v7594_v36 = vor.u32 %v10219_v24, %v7593_v23  ;;  %3567 = vmatpush.bf16.msra.mxu2 %v7338_v32 }
  0x6d   :  { %v10019_v27 = vld [vmem:[#allocation6 + $0x1c] sm:$0xf0] }
  0x6e   :  { %v7049_v29 = vld [vmem:[#allocation6 + $0x200] sm:$0xf]  ;;  %v6794_v41 = vor.u32 %v10019_v27, %v6793_v26  ;;  %3580 = vmatpush.bf16.msra.mxu3 %v7594_v36 }
  0x6f   :  { %v10083_v30 = vld [vmem:[#allocation6 + $0x21c] sm:$0xf0] }
  0x70   :  { %v8041_v31 = vld [vmem:[#allocation6 + $0x9c0] sm:$0xf]  ;;  %v7050_v45 = vor.u32 %v10083_v30, %v7049_v29  ;;  %3542 = vmatpush.bf16.msra.mxu0 %v6794_v41 }
  0x71   :  { %v10331_v33 = vld [vmem:[#allocation6 + $0x9dc] sm:$0xf0] }
  0x72   :  { %v8297_v34 = vld [vmem:[#allocation6 + $0xbc0] sm:$0xf]  ;;  %v8042_v46 = vor.u32 %v10331_v33, %v8041_v31  ;;  %3555 = vmatpush.bf16.msra.mxu1 %v7050_v45 }
  0x73   :  { %v10395_v35 = vld [vmem:[#allocation6 + $0xbdc] sm:$0xf0] }
  0x74   :  { %v7305_v37 = vld [vmem:[#allocation6 + $0x400] sm:$0xf]  ;;  %v8298_v49 = vor.u32 %v10395_v35, %v8297_v34  ;;  %3587 = vmatpush.bf16.msrb.mxu0 %v8042_v46 }
  0x75   :  { %v10147_v39 = vld [vmem:[#allocation6 + $0x41c] sm:$0xf0] }
  0x76   :  { %v7561_v40 = vld [vmem:[#allocation6 + $0x600] sm:$0xf]  ;;  %v7306_v52 = vor.u32 %v10147_v39, %v7305_v37  ;;  %3600 = vmatpush.bf16.msrb.mxu1 %v8298_v49 }
  0x77   :  { %v10211_v42 = vld [vmem:[#allocation6 + $0x61c] sm:$0xf0] }
  0x78   :  { %v8553_v43 = vld [vmem:[#allocation6 + $0xdc0] sm:$0xf]  ;;  %v7562_v55 = vor.u32 %v10211_v42, %v7561_v40  ;;  %3568 = vmatpush.bf16.msra.mxu2 %v7306_v52 }
  0x79   :  { %v10459_v44 = vld [vmem:[#allocation6 + $0xddc] sm:$0xf0] }
  0x7a   :  { %v8809_v47 = vld [vmem:[#allocation6 + $0xfc0] sm:$0xf]  ;;  %v8554_v56 = vor.u32 %v10459_v44, %v8553_v43  ;;  %3581 = vmatpush.bf16.msra.mxu3 %v7562_v55 }
  0x7b   :  { %v10523_v48 = vld [vmem:[#allocation6 + $0xfdc] sm:$0xf0] }
  0x7c   :  { %v8009_v50 = vld [vmem:[#allocation6 + $0x980] sm:$0xf]  ;;  %v8810_v57 = vor.u32 %v10523_v48, %v8809_v47  ;;  %3613 = vmatpush.bf16.msrb.mxu2 %v8554_v56 }
  0x7d   :  { %v10323_v51 = vld [vmem:[#allocation6 + $0x99c] sm:$0xf0] }
  0x7e   :  { %v8265_v53 = vld [vmem:[#allocation6 + $0xb80] sm:$0xf]  ;;  %v8010_v60 = vor.u32 %v10323_v51, %v8009_v50  ;;  %3626 = vmatpush.bf16.msrb.mxu3 %v8810_v57 }
  0x7f   :  { %v10387_v54 = vld [vmem:[#allocation6 + $0xb9c] sm:$0xf0] }
  0x80   :  { %v8521_v58 = vld [vmem:[#allocation6 + $0xd80] sm:$0xf]  ;;  %v8266_v63 = vor.u32 %v10387_v54, %v8265_v53  ;;  %3588 = vmatpush.bf16.msrb.mxu0 %v8010_v60 }
  0x81   :  { %v10451_v59 = vld [vmem:[#allocation6 + $0xd9c] sm:$0xf0] }
  0x82   :  { %v8777_v61 = vld [vmem:[#allocation6 + $0xf80] sm:$0xf]  ;;  %v8522_v3 = vor.u32 %v10451_v59, %v8521_v58  ;;  %3601 = vmatpush.bf16.msrb.mxu1 %v8266_v63 }
  0x83   :  { %v10515_v62 = vld [vmem:[#allocation6 + $0xf9c] sm:$0xf0] }
  0x84   :  { %v7977_v0 = vld [vmem:[#allocation6 + $0x940] sm:$0xf]  ;;  %v8778_v4 = vor.u32 %v10515_v62, %v8777_v61  ;;  %3614 = vmatpush.bf16.msrb.mxu2 %v8522_v3 }
  0x85   :  { %v10315_v1 = vld [vmem:[#allocation6 + $0x95c] sm:$0xf0] }
  0x86   :  { %v8233_v2 = vld [vmem:[#allocation6 + $0xb40] sm:$0xf]  ;;  %v7978_v7 = vor.u32 %v10315_v1, %v7977_v0  ;;  %3627 = vmatpush.bf16.msrb.mxu3 %v8778_v4 }
  0x87   :  { %v10379_v38 = vld [vmem:[#allocation6 + $0xb5c] sm:$0xf0] }
  0x88   :  { %v8489_v5 = vld [vmem:[#allocation6 + $0xd40] sm:$0xf]  ;;  %v8234_v10 = vor.u32 %v10379_v38, %v8233_v2  ;;  %3589 = vmatpush.bf16.msrb.mxu0 %v7978_v7 }
  0x89   :  { %v10443_v6 = vld [vmem:[#allocation6 + $0xd5c] sm:$0xf0] }
  0x8a   :  { %v8745_v8 = vld [vmem:[#allocation6 + $0xf40] sm:$0xf]  ;;  %v8490_v15 = vor.u32 %v10443_v6, %v8489_v5  ;;  %3602 = vmatpush.bf16.msrb.mxu1 %v8234_v10 }
  0x8b   :  { %v10507_v9 = vld [vmem:[#allocation6 + $0xf5c] sm:$0xf0] }
  0x8c   :  { %v7945_v11 = vld [vmem:[#allocation6 + $0x900] sm:$0xf]  ;;  %v8746_v16 = vor.u32 %v10507_v9, %v8745_v8  ;;  %3615 = vmatpush.bf16.msrb.mxu2 %v8490_v15  ;;  %v11144_v9 = vld [vmem:[#allocation4] sm:$0xff] }
  0x8d   :  { %v10307_v12 = vld [vmem:[#allocation6 + $0x91c] sm:$0xf0]  ;;  %v177_v10 = vperm.slane %v11144_v9, 0 }
  0x8e   :  { %v8201_v13 = vld [vmem:[#allocation6 + $0xb00] sm:$0xf]  ;;  %v7946_v19 = vor.u32 %v10307_v12, %v7945_v11  ;;  %3628 = vmatpush.bf16.msrb.mxu3 %v8746_v16  ;;  %v178_v11 = vperm.slane %v11144_v9, 1  ;;  %v179_v16 = vperm.slane %v11144_v9, 2 }
  0x8f   :  { %v10371_v14 = vld [vmem:[#allocation6 + $0xb1c] sm:$0xf0] }
  0x90   :  { %v8457_v17 = vld [vmem:[#allocation6 + $0xd00] sm:$0xf]  ;;  %v8202_v22 = vor.u32 %v10371_v14, %v8201_v13  ;;  %3590 = vmatpush.bf16.msrb.mxu0 %v7946_v19  ;;  %v7019_v19 = vld [vmem:[#allocation6 + $0x1e0] sm:$0xf0] }
  0x91   :  { %v10435_v18 = vld [vmem:[#allocation6 + $0xd1c] sm:$0xf0] }
  0x92   :  { %v8713_v20 = vld [vmem:[#allocation6 + $0xf00] sm:$0xf]  ;;  %v8458_v27 = vor.u32 %v10435_v18, %v8457_v17  ;;  %3603 = vmatpush.bf16.msrb.mxu1 %v8202_v22  ;;  %v10071_v18 = vld [vmem:[#allocation6 + $0x1c4] sm:$0xf] }
  0x93   :  { %v10499_v21 = vld [vmem:[#allocation6 + $0xf1c] sm:$0xf0]  ;;  %v7275_v22 = vld [vmem:[#allocation6 + $0x3e0] sm:$0xf0] }
  0x94   :  { %v7913_v23 = vld [vmem:[#allocation6 + $0x8c0] sm:$0xf]  ;;  %v8714_v28 = vor.u32 %v10499_v21, %v8713_v20  ;;  %3616 = vmatpush.bf16.msrb.mxu2 %v8458_v27  ;;  %v10135_v21 = vld [vmem:[#allocation6 + $0x3c4] sm:$0xf] }
  0x95   :  { %v10299_v24 = vld [vmem:[#allocation6 + $0x8dc] sm:$0xf0] }
  0x96   :  { %v8169_v25 = vld [vmem:[#allocation6 + $0xac0] sm:$0xf]  ;;  %v7914_v29 = vor.u32 %v10299_v24, %v7913_v23  ;;  %3629 = vmatpush.bf16.msrb.mxu3 %v8714_v28  ;;  %v180_v24 = vperm.slane %v11144_v9, 3 }
  0x97   :  { %v10363_v26 = vld [vmem:[#allocation6 + $0xadc] sm:$0xf0] }
  0x98   :  { %v8170_v30 = vor.u32 %v10363_v26, %v8169_v25  ;;  %3591 = vmatpush.bf16.msrb.mxu0 %v7914_v29  ;;  %v7881_v31 = vld [vmem:[#allocation6 + $0x880] sm:$0xf]  ;;  %v7022_v26 = vor.u32 %v10071_v18, %v7019_v19  ;;  %v7278_v29 = vor.u32 %v10135_v21, %v7275_v22  ;;  %v183_v18 = vperm.slane %v11144_v9, 6  ;;  %v10247_v19 = vld [vmem:[#allocation6 + $0x744] sm:$0xf] }
  0x99   :  { %v10291_v32 = vld [vmem:[#allocation6 + $0x89c] sm:$0xf0] }
  0x9a   :  { %3604 = vmatpush.bf16.msrb.mxu1 %v8170_v30  ;;  %v8137_v33 = vld [vmem:[#allocation6 + $0xa80] sm:$0xf]  ;;  %v7882_v34 = vor.u32 %v10291_v32, %v7881_v31  ;;  %v10063_v30 = vld [vmem:[#allocation6 + $0x184] sm:$0xf] }
  0x9b   :  { %v10355_v35 = vld [vmem:[#allocation6 + $0xa9c] sm:$0xf0]  ;;  %v6987_v31 = vld [vmem:[#allocation6 + $0x1a0] sm:$0xf0] }
  0x9c   :  { %v8138_v36 = vor.u32 %v10355_v35, %v8137_v33  ;;  %v8425_v37 = vld [vmem:[#allocation6 + $0xcc0] sm:$0xf]  ;;  %3592 = vmatpush.bf16.msrb.mxu0 %v7882_v34 }
  0x9d   :  { %v10427_v39 = vld [vmem:[#allocation6 + $0xcdc] sm:$0xf0] }
  0x9e   :  { %v8426_v40 = vor.u32 %v10427_v39, %v8425_v37  ;;  %v8681_v41 = vld [vmem:[#allocation6 + $0xec0] sm:$0xf]  ;;  %3605 = vmatpush.bf16.msrb.mxu1 %v8138_v36  ;;  %v10127_v36 = vld [vmem:[#allocation6 + $0x384] sm:$0xf] }
  0x9f   :  { %v10491_v42 = vld [vmem:[#allocation6 + $0xedc] sm:$0xf0]  ;;  %v7243_v37 = vld [vmem:[#allocation6 + $0x3a0] sm:$0xf0] }
  0xa0   :  { %v8682_v43 = vor.u32 %v10491_v42, %v8681_v41  ;;  %v7849_v44 = vld [vmem:[#allocation6 + $0x840] sm:$0xf]  ;;  %3617 = vmatpush.bf16.msrb.mxu2 %v8426_v40  ;;  %v10199_v41 = vld [vmem:[#allocation6 + $0x5c4] sm:$0xf] }
  0xa1   :  { %v10283_v45 = vld [vmem:[#allocation6 + $0x85c] sm:$0xf0]  ;;  %v7531_v42 = vld [vmem:[#allocation6 + $0x5e0] sm:$0xf0] }
  0xa2   :  { %v8105_v46 = vld [vmem:[#allocation6 + $0xa40] sm:$0xf]  ;;  %v7850_v47 = vor.u32 %v10283_v45, %v7849_v44  ;;  %3630 = vmatpush.bf16.msrb.mxu3 %v8682_v43  ;;  %v6990_v44 = vor.u32 %v10063_v30, %v6987_v31  ;;  %v10263_v45 = vld [vmem:[#allocation6 + $0x7c4] sm:$0xf]  ;;  %v184_v30 = vperm.slane %v11144_v9, 7 }
  0xa3   :  { %v10347_v48 = vld [vmem:[#allocation6 + $0xa5c] sm:$0xf0] }
  0xa4   :  { %v8106_v49 = vor.u32 %v10347_v48, %v8105_v46  ;;  %v8393_v50 = vld [vmem:[#allocation6 + $0xc80] sm:$0xf]  ;;  %3593 = vmatpush.bf16.msrb.mxu0 %v7850_v47  ;;  %v7787_v46 = vld [vmem:[#allocation6 + $0x7e0] sm:$0xf0]  ;;  %v7246_v48 = vor.u32 %v10127_v36, %v7243_v37 }
  0xa5   :  { %v10419_v51 = vld [vmem:[#allocation6 + $0xc9c] sm:$0xf0]  ;;  %v7435_v36 = vld [vmem:[#allocation6 + $0x520] sm:$0xf0] }
  0xa6   :  { %v8649_v52 = vld [vmem:[#allocation6 + $0xe80] sm:$0xf]  ;;  %v8394_v53 = vor.u32 %v10419_v51, %v8393_v50  ;;  %3606 = vmatpush.bf16.msrb.mxu1 %v8106_v49  ;;  %v10055_v49 = vld [vmem:[#allocation6 + $0x144] sm:$0xf] }
  0xa7   :  { %v10483_v54 = vld [vmem:[#allocation6 + $0xe9c] sm:$0xf0]  ;;  %v6955_v50 = vld [vmem:[#allocation6 + $0x160] sm:$0xf0] }
  0xa8   :  { %v8650_v55 = vor.u32 %v10483_v54, %v8649_v52  ;;  %v7817_v56 = vld [vmem:[#allocation6 + $0x800] sm:$0xf]  ;;  %3618 = vmatpush.bf16.msrb.mxu2 %v8394_v53  ;;  %v10119_v52 = vld [vmem:[#allocation6 + $0x344] sm:$0xf] }
  0xa9   :  { %v10275_v57 = vld [vmem:[#allocation6 + $0x81c] sm:$0xf0]  ;;  %v7211_v53 = vld [vmem:[#allocation6 + $0x360] sm:$0xf0] }
  0xaa   :  { %v7818_v58 = vor.u32 %v10275_v57, %v7817_v56  ;;  %v8073_v59 = vld [vmem:[#allocation6 + $0xa00] sm:$0xf]  ;;  %3631 = vmatpush.bf16.msrb.mxu3 %v8650_v55  ;;  %v7534_v55 = vor.u32 %v10199_v41, %v7531_v42  ;;  %v181_v56 = vperm.slane %v11144_v9, 4  ;;  %v182_v57 = vperm.slane %v11144_v9, 5  ;;  %v10239_v42 = vld [vmem:[#allocation6 + $0x704] sm:$0xf] }
  0xab   :  { %v10339_v60 = vld [vmem:[#allocation6 + $0xa1c] sm:$0xf0] }
  0xac   :  { %v8074_v61 = vor.u32 %v10339_v60, %v8073_v59  ;;  %3594 = vmatpush.bf16.msrb.mxu0 %v7818_v58  ;;  %v8361_v62 = vld [vmem:[#allocation6 + $0xc40] sm:$0xf]  ;;  %v7790_v59 = vor.u32 %v10263_v45, %v7787_v46  ;;  %v6958_v60 = vor.u32 %v10055_v49, %v6955_v50  ;;  %v7115_v49 = vld [vmem:[#allocation6 + $0x2a0] sm:$0xf0] }
  0xad   :  { %v10411_v63 = vld [vmem:[#allocation6 + $0xc5c] sm:$0xf0] }
  0xae   :  { %v8617_v0 = vld [vmem:[#allocation6 + $0xe40] sm:$0xf]  ;;  %3607 = vmatpush.bf16.msrb.mxu1 %v8074_v61  ;;  %v8362_v1 = vor.u32 %v10411_v63, %v8361_v62  ;;  %v10191_v61 = vld [vmem:[#allocation6 + $0x584] sm:$0xf] }
  0xaf   :  { %v10475_v2 = vld [vmem:[#allocation6 + $0xe5c] sm:$0xf0]  ;;  %v7499_v62 = vld [vmem:[#allocation6 + $0x5a0] sm:$0xf0] }
  0xb0   :  { %v8618_v38 = vor.u32 %v10475_v2, %v8617_v0  ;;  %3619 = vmatpush.bf16.msrb.mxu2 %v8362_v1  ;;  %v8329_v3 = vld [vmem:[#allocation6 + $0xc00] sm:$0xf]  ;;  %v326_v12 = vpop.f32.mrf.mxu0  ;;  %v339_v14 = vpop.f32.mrf.mxu1  ;;  %v10255_v63 = vld [vmem:[#allocation6 + $0x784] sm:$0xf]  ;;  %v7214_v2 = vor.u32 %v10119_v52, %v7211_v53 }
  0xb1   :  { %v10403_v4 = vld [vmem:[#allocation6 + $0xc1c] sm:$0xf0]  ;;  %v327_v13 = vadd.f32 %v326_v12, %v177_v10  ;;  %v340_v15 = vadd.f32 %v339_v14, %v178_v11  ;;  %v7502_v12 = vor.u32 %v10191_v61, %v7499_v62  ;;  %v7467_v14 = vld [vmem:[#allocation6 + $0x560] sm:$0xf0] }
  0xb2   :  { %3632 = vmatpush.bf16.msrb.mxu3 %v8618_v38  ;;  %v8330_v5 = vor.u32 %v10403_v4, %v8329_v3  ;;  %v8585_v6 = vld [vmem:[#allocation6 + $0xe00] sm:$0xf]  ;;  %v7755_v38 = vld [vmem:[#allocation6 + $0x7a0] sm:$0xf0] }
  0xb3   :  { %v10467_v7 = vld [vmem:[#allocation6 + $0xe1c] sm:$0xf0]  ;;  %v421_v17 = vmul.f32 0.1, %v327_v13  ;;  %v422_v20 = vmul.f32 0.1, %v340_v15 }
  0xb4   :  { %v8586_v8 = vor.u32 %v10467_v7, %v8585_v6  ;;  %3620 = vmatpush.bf16.msrb.mxu2 %v8330_v5  ;;  %v10047_v3 = vld [vmem:[#allocation6 + $0x104] sm:$0xf] }
  0xb5   :  { %v429_v23 = vmax.f32 %v327_v13, %v421_v17  ;;  %v430_v25 = vmax.f32 %v340_v15, %v422_v20  ;;  %v6923_v4 = vld [vmem:[#allocation6 + $0x120] sm:$0xf0] }
  0xb6   :  { %3633 = vmatpush.bf16.msrb.mxu3 %v8586_v8  ;;  %v10111_v7 = vld [vmem:[#allocation6 + $0x304] sm:$0xf]  ;;  %v6926_v17 = vor.u32 %v10047_v3, %v6923_v4 }
  0xb7   :  { %v11150_v27 = vpack.c.bf16 %v429_v23, %v429_v23  ;;  %v11152_v32 = vpack.c.bf16 %v430_v25, %v430_v25  ;;  %v7179_v8 = vld [vmem:[#allocation6 + $0x320] sm:$0xf0] }
  0xb8   :  { %v352_v28 = vpop.f32.mrf.mxu2  ;;  %v365_v34 = vpop.f32.mrf.mxu3  ;;  %v10183_v13 = vld [vmem:[#allocation6 + $0x544] sm:$0xf]  ;;  %v7182_v22 = vor.u32 %v10111_v7, %v7179_v8 }
  0xb9   :  { %v353_v33 = vadd.f32 %v352_v28, %v179_v16  ;;  %v328_v35 = vpop.f32.mrf.mxu0  ;;  %v366_v39 = vadd.f32 %v365_v34, %v180_v24  ;;  %v341_v40 = vpop.f32.mrf.mxu1  ;;  %3543 = vmatmul.bf16.vlgmr.msra.gmra.mxu0 %v11150_v27  ;;  %3556 = vmatmul.bf16.vlgmr.msra.gmra.mxu1 %v11152_v32  ;;  %v7758_v16 = vor.u32 %v10255_v63, %v7755_v38  ;;  %v7723_v20 = vld [vmem:[#allocation6 + $0x760] sm:$0xf0] }
  0xba   :  { %3639 = vmatpush.bf16.msra.mxu0 %v7022_v26  ;;  %3652 = vmatpush.bf16.msra.mxu1 %v7278_v29  ;;  %v10039_v23 = vld [vmem:[#allocation6 + $0xc4] sm:$0xf]  ;;  %v7470_v31 = vor.u32 %v10183_v13, %v7467_v14  ;;  %v7726_v34 = vor.u32 %v10247_v19, %v7723_v20 }
  0xbb   :  { %v423_v43 = vmul.f32 0.1, %v353_v33  ;;  %v424_v47 = vmul.f32 0.1, %v366_v39  ;;  %v6891_v24 = vld [vmem:[#allocation6 + $0xe0] sm:$0xf0] }
  0xbc   :  { %v10103_v26 = vld [vmem:[#allocation6 + $0x2c4] sm:$0xf]  ;;  %v6894_v40 = vor.u32 %v10039_v23, %v6891_v24 }
  0xbd   :  { %v431_v51 = vmax.f32 %v353_v33, %v423_v43  ;;  %v432_v54 = vmax.f32 %v366_v39, %v424_v47  ;;  %v7147_v28 = vld [vmem:[#allocation6 + $0x2e0] sm:$0xf0] }
  0xbe   :  { %3640 = vmatpush.bf16.msra.mxu0 %v6990_v44  ;;  %3653 = vmatpush.bf16.msra.mxu1 %v7246_v48  ;;  %v10175_v35 = vld [vmem:[#allocation6 + $0x504] sm:$0xf]  ;;  %v7150_v41 = vor.u32 %v10103_v26, %v7147_v28 }
  0xbf   :  { %v11158_v58 = vpack.c.bf16 %v431_v51, %v431_v51  ;;  %v11160_v0 = vpack.c.bf16 %v432_v54, %v432_v54  ;;  %v7691_v43 = vld [vmem:[#allocation6 + $0x720] sm:$0xf0]  ;;  %v7438_v52 = vor.u32 %v10175_v35, %v7435_v36 }
  0xc0   :  { %v354_v1 = vpop.f32.mrf.mxu2  ;;  %v367_v5 = vpop.f32.mrf.mxu3  ;;  %v10031_v44 = vld [vmem:[#allocation6 + $0x84] sm:$0xf] }
  0xc1   :  { %3569 = vmatmul.bf16.vlgmr.msra.gmra.mxu2 %v11158_v58  ;;  %v378_v6 = vpop.f32.mrf.mxu0  ;;  %3582 = vmatmul.bf16.vlgmr.msra.gmra.mxu3 %v11160_v0  ;;  %v391_v11 = vpop.f32.mrf.mxu1  ;;  %v6859_v47 = vld [vmem:[#allocation6 + $0xa0] sm:$0xf0] }
  0xc2   :  { %3665 = vmatpush.bf16.msra.mxu2 %v7534_v55  ;;  %v379_v10 = vadd.f32 %v378_v6, %v181_v56  ;;  %3678 = vmatpush.bf16.msra.mxu3 %v7790_v59  ;;  %v392_v15 = vadd.f32 %v391_v11, %v182_v57  ;;  %v10095_v48 = vld [vmem:[#allocation6 + $0x284] sm:$0xf]  ;;  %v7694_v56 = vor.u32 %v10239_v42, %v7691_v43 }
  0xc3   :  { %3641 = vmatpush.bf16.msra.mxu0 %v6958_v60  ;;  %3654 = vmatpush.bf16.msra.mxu1 %v7214_v2  ;;  %v10167_v53 = vld [vmem:[#allocation6 + $0x4c4] sm:$0xf]  ;;  %v6862_v61 = vor.u32 %v10031_v44, %v6859_v47  ;;  %v7118_v62 = vor.u32 %v10095_v48, %v7115_v49 }
  0xc4   :  { %v425_v21 = vmul.f32 0.1, %v379_v10  ;;  %v426_v25 = vmul.f32 0.1, %v392_v15  ;;  %v7403_v57 = vld [vmem:[#allocation6 + $0x4e0] sm:$0xf0] }
  0xc5   :  { %v10231_v59 = vld [vmem:[#allocation6 + $0x6c4] sm:$0xf]  ;;  %v7406_v6 = vor.u32 %v10167_v53, %v7403_v57 }
  0xc6   :  { %v433_v29 = vmax.f32 %v379_v10, %v425_v21  ;;  %3666 = vmatpush.bf16.msra.mxu2 %v7502_v12  ;;  %v434_v33 = vmax.f32 %v392_v15, %v426_v25  ;;  %3679 = vmatpush.bf16.msra.mxu3 %v7758_v16  ;;  %v7659_v63 = vld [vmem:[#allocation6 + $0x6e0] sm:$0xf0] }
  0xc7   :  { %3642 = vmatpush.bf16.msra.mxu0 %v6926_v17  ;;  %3655 = vmatpush.bf16.msra.mxu1 %v7182_v22  ;;  %v10023_v1 = vld [vmem:[#allocation6 + $0x44] sm:$0xf]  ;;  %v7662_v8 = vor.u32 %v10231_v59, %v7659_v63 }
  0xc8   :  { %v11166_v37 = vpack.c.bf16 %v433_v29, %v433_v29  ;;  %v404_v39 = vpop.f32.mrf.mxu2  ;;  %v11168_v45 = vpack.c.bf16 %v434_v33, %v434_v33  ;;  %v417_v9 = vpop.f32.mrf.mxu3  ;;  %v6827_v38 = vld [vmem:[#allocation6 + $0x60] sm:$0xf0] }
  0xc9   :  { %v405_v46 = vadd.f32 %v404_v39, %v183_v18  ;;  %v380_v50 = vpop.f32.mrf.mxu0  ;;  %v418_v51 = vadd.f32 %v417_v9, %v184_v30  ;;  %v393_v54 = vpop.f32.mrf.mxu1  ;;  %v10087_v3 = vld [vmem:[#allocation6 + $0x244] sm:$0xf]  ;;  %v6830_v14 = vor.u32 %v10023_v1, %v6827_v38 }
  0xca   :  { %3667 = vmatpush.bf16.msra.mxu2 %v7470_v31  ;;  %3595 = vmatmul.bf16.vlgmr.msrb.gmra.mxu0 %v11166_v37  ;;  %v7083_v4 = vld [vmem:[#allocation6 + $0x260] sm:$0xf0] }
  0xcb   :  { %v427_v55 = vmul.f32 0.1, %v405_v46  ;;  %3680 = vmatpush.bf16.msra.mxu3 %v7726_v34  ;;  %3608 = vmatmul.bf16.vlgmr.msrb.gmra.mxu1 %v11168_v45  ;;  %v428_v60 = vmul.f32 0.1, %v418_v51  ;;  %v10159_v10 = vld [vmem:[#allocation6 + $0x484] sm:$0xf]  ;;  %v7086_v15 = vor.u32 %v10087_v3, %v7083_v4 }
  0xcc   :  { %3643 = vmatpush.bf16.msra.mxu0 %v6894_v40  ;;  %3656 = vmatpush.bf16.msra.mxu1 %v7150_v41  ;;  %v7371_v11 = vld [vmem:[#allocation6 + $0x4a0] sm:$0xf0] }
  0xcd   :  { %v435_v2 = vmax.f32 %v405_v46, %v427_v55  ;;  %v436_v5 = vmax.f32 %v418_v51, %v428_v60  ;;  %v10223_v12 = vld [vmem:[#allocation6 + $0x684] sm:$0xf]  ;;  %v7374_v24 = vor.u32 %v10159_v10, %v7371_v11 }
  0xce   :  { %3668 = vmatpush.bf16.msra.mxu2 %v7438_v52  ;;  %v7627_v17 = vld [vmem:[#allocation6 + $0x6a0] sm:$0xf0] }
  0xcf   :  { %v11172_v7 = vpack.c.bf16 %v435_v2, %v435_v2  ;;  %3681 = vmatpush.bf16.msra.mxu3 %v7694_v56  ;;  %v11174_v13 = vpack.c.bf16 %v436_v5, %v436_v5  ;;  %v10015_v18 = vld [vmem:[#allocation6 + $0x4] sm:$0xf]  ;;  %v7630_v29 = vor.u32 %v10223_v12, %v7627_v17 }
  0xd0   :  { %3644 = vmatpush.bf16.msra.mxu0 %v6862_v61  ;;  %3657 = vmatpush.bf16.msra.mxu1 %v7118_v62  ;;  %v406_v16 = vpop.f32.mrf.mxu2  ;;  %v6795_v19 = vld [vmem:[#allocation6 + $0x20] sm:$0xf0]  ;;  %v419_v20 = vpop.f32.mrf.mxu3 }
  0xd1   :  { %3621 = vmatmul.bf16.vlgmr.msrb.gmra.mxu2 %v11172_v7  ;;  %v10079_v21 = vld [vmem:[#allocation6 + $0x204] sm:$0xf]  ;;  %3634 = vmatmul.bf16.vlgmr.msrb.gmra.mxu3 %v11174_v13  ;;  %v6798_v33 = vor.u32 %v10015_v18, %v6795_v19 }
  0xd2   :  { %v7051_v22 = vld [vmem:[#allocation6 + $0x220] sm:$0xf0]  ;;  %3669 = vmatpush.bf16.msra.mxu2 %v7406_v6 }
  0xd3   :  { %v10327_v23 = vld [vmem:[#allocation6 + $0x9c4] sm:$0xf]  ;;  %3682 = vmatpush.bf16.msra.mxu3 %v7662_v8  ;;  %v7054_v34 = vor.u32 %v10079_v21, %v7051_v22 }
  0xd4   :  { %v8043_v25 = vld [vmem:[#allocation6 + $0x9e0] sm:$0xf0]  ;;  %3645 = vmatpush.bf16.msra.mxu0 %v6830_v14  ;;  %3658 = vmatpush.bf16.msra.mxu1 %v7086_v15 }
  0xd5   :  { %v10391_v26 = vld [vmem:[#allocation6 + $0xbc4] sm:$0xf]  ;;  %v8046_v39 = vor.u32 %v10327_v23, %v8043_v25 }
  0xd6   :  { %v8299_v28 = vld [vmem:[#allocation6 + $0xbe0] sm:$0xf0]  ;;  %3670 = vmatpush.bf16.msra.mxu2 %v7374_v24 }
  0xd7   :  { %v10151_v30 = vld [vmem:[#allocation6 + $0x444] sm:$0xf]  ;;  %v8302_v40 = vor.u32 %v10391_v26, %v8299_v28  ;;  %3683 = vmatpush.bf16.msra.mxu3 %v7630_v29 }
  0xd8   :  { %v7339_v31 = vld [vmem:[#allocation6 + $0x460] sm:$0xf0]  ;;  %3646 = vmatpush.bf16.msra.mxu0 %v6798_v33  ;;  %3659 = vmatpush.bf16.msra.mxu1 %v7054_v34 }
  0xd9   :  { %v10215_v35 = vld [vmem:[#allocation6 + $0x644] sm:$0xf]  ;;  %v7342_v42 = vor.u32 %v10151_v30, %v7339_v31 }
  0xda   :  { %v7595_v36 = vld [vmem:[#allocation6 + $0x660] sm:$0xf0] }
  0xdb   :  { %v10319_v41 = vld [vmem:[#allocation6 + $0x984] sm:$0xf]  ;;  %v7598_v9 = vor.u32 %v10215_v35, %v7595_v36  ;;  %3671 = vmatpush.bf16.msra.mxu2 %v7342_v42  ;;  %3647 = vmatmul.bf16.vlgmr.msra.gmra.mxu0 %v11150_v27 }
  0xdc   :  { %v8011_v43 = vld [vmem:[#allocation6 + $0x9a0] sm:$0xf0]  ;;  %3691 = vmatpush.bf16.msrb.mxu0 %v8046_v39  ;;  %3704 = vmatpush.bf16.msrb.mxu1 %v8302_v40 }
  0xdd   :  { %v10383_v44 = vld [vmem:[#allocation6 + $0xb84] sm:$0xf]  ;;  %v8014_v53 = vor.u32 %v10319_v41, %v8011_v43  ;;  %3684 = vmatpush.bf16.msra.mxu3 %v7598_v9  ;;  %3660 = vmatmul.bf16.vlgmr.msra.gmra.mxu1 %v11152_v32 }
  0xde   :  { %v8267_v46 = vld [vmem:[#allocation6 + $0xba0] sm:$0xf0] }
  0xdf   :  { %v10143_v47 = vld [vmem:[#allocation6 + $0x404] sm:$0xf]  ;;  %v8270_v54 = vor.u32 %v10383_v44, %v8267_v46 }
  0xe0   :  { %v7307_v48 = vld [vmem:[#allocation6 + $0x420] sm:$0xf0]  ;;  %3692 = vmatpush.bf16.msrb.mxu0 %v8014_v53 }
  0xe1   :  { %v10207_v49 = vld [vmem:[#allocation6 + $0x604] sm:$0xf]  ;;  %v7310_v59 = vor.u32 %v10143_v47, %v7307_v48  ;;  %3705 = vmatpush.bf16.msrb.mxu1 %v8270_v54 }
  0xe2   :  { %v7563_v50 = vld [vmem:[#allocation6 + $0x620] sm:$0xf0] }
  0xe3   :  { %v10455_v51 = vld [vmem:[#allocation6 + $0xdc4] sm:$0xf]  ;;  %v7566_v63 = vor.u32 %v10207_v49, %v7563_v50  ;;  %3672 = vmatpush.bf16.msra.mxu2 %v7310_v59 }
  0xe4   :  { %v8555_v52 = vld [vmem:[#allocation6 + $0xde0] sm:$0xf0] }
  0xe5   :  { %v10519_v55 = vld [vmem:[#allocation6 + $0xfc4] sm:$0xf]  ;;  %v8558_v1 = vor.u32 %v10455_v51, %v8555_v52  ;;  %3685 = vmatpush.bf16.msra.mxu3 %v7566_v63 }
  0xe6   :  { %v8811_v56 = vld [vmem:[#allocation6 + $0xfe0] sm:$0xf0]  ;;  %3673 = vmatmul.bf16.vlgmr.msra.gmra.mxu2 %v11158_v58 }
  0xe7   :  { %v10311_v57 = vld [vmem:[#allocation6 + $0x944] sm:$0xf]  ;;  %v8814_v2 = vor.u32 %v10519_v55, %v8811_v56  ;;  %3717 = vmatpush.bf16.msrb.mxu2 %v8558_v1 }
  0xe8   :  { %v7979_v60 = vld [vmem:[#allocation6 + $0x960] sm:$0xf0]  ;;  %3686 = vmatmul.bf16.vlgmr.msra.gmra.mxu3 %v11160_v0 }
  0xe9   :  { %v10375_v61 = vld [vmem:[#allocation6 + $0xb44] sm:$0xf]  ;;  %v7982_v4 = vor.u32 %v10311_v57, %v7979_v60  ;;  %3730 = vmatpush.bf16.msrb.mxu3 %v8814_v2 }
  0xea   :  { %v8235_v62 = vld [vmem:[#allocation6 + $0xb60] sm:$0xf0] }
  0xeb   :  { %v10447_v38 = vld [vmem:[#allocation6 + $0xd84] sm:$0xf]  ;;  %v8238_v5 = vor.u32 %v10375_v61, %v8235_v62  ;;  %3693 = vmatpush.bf16.msrb.mxu0 %v7982_v4  ;;  %v7025_v4 = vld [vmem:[#allocation6 + $0x1c8] sm:$0xf] }
  0xec   :  { %v8523_v3 = vld [vmem:[#allocation6 + $0xda0] sm:$0xf0] }
  0xed   :  { %v10511_v6 = vld [vmem:[#allocation6 + $0xf84] sm:$0xf]  ;;  %v8526_v15 = vor.u32 %v10447_v38, %v8523_v3  ;;  %3706 = vmatpush.bf16.msrb.mxu1 %v8238_v5 }
  0xee   :  { %v8779_v8 = vld [vmem:[#allocation6 + $0xfa0] sm:$0xf0] }
  0xef   :  { %v10303_v10 = vld [vmem:[#allocation6 + $0x904] sm:$0xf]  ;;  %v8782_v16 = vor.u32 %v10511_v6, %v8779_v8  ;;  %3718 = vmatpush.bf16.msrb.mxu2 %v8526_v15  ;;  %v10076_v6 = vld [vmem:[#allocation6 + $0x1e4] sm:$0xf0] }
  0xf0   :  { %v7947_v11 = vld [vmem:[#allocation6 + $0x920] sm:$0xf0]  ;;  %v7281_v8 = vld [vmem:[#allocation6 + $0x3c8] sm:$0xf] }
  0xf1   :  { %v10367_v12 = vld [vmem:[#allocation6 + $0xb04] sm:$0xf]  ;;  %v7950_v19 = vor.u32 %v10303_v10, %v7947_v11  ;;  %3731 = vmatpush.bf16.msrb.mxu3 %v8782_v16  ;;  %v10140_v10 = vld [vmem:[#allocation6 + $0x3e4] sm:$0xf0] }
  0xf2   :  { %v8203_v14 = vld [vmem:[#allocation6 + $0xb20] sm:$0xf0] }
  0xf3   :  { %v10439_v17 = vld [vmem:[#allocation6 + $0xd44] sm:$0xf]  ;;  %v8206_v20 = vor.u32 %v10367_v12, %v8203_v14  ;;  %3694 = vmatpush.bf16.msrb.mxu0 %v7950_v19  ;;  %v7026_v19 = vor.u32 %v10076_v6, %v7025_v4  ;;  %v6897_v4 = vld [vmem:[#allocation6 + $0xc8] sm:$0xf] }
  0xf4   :  { %v8491_v18 = vld [vmem:[#allocation6 + $0xd60] sm:$0xf0] }
  0xf5   :  { %v10503_v21 = vld [vmem:[#allocation6 + $0xf44] sm:$0xf]  ;;  %v8494_v28 = vor.u32 %v10439_v17, %v8491_v18  ;;  %3707 = vmatpush.bf16.msrb.mxu1 %v8206_v20  ;;  %v7282_v20 = vor.u32 %v10140_v10, %v7281_v8  ;;  %v7153_v8 = vld [vmem:[#allocation6 + $0x2c8] sm:$0xf] }
  0xf6   :  { %v8747_v22 = vld [vmem:[#allocation6 + $0xf60] sm:$0xf0]  ;;  %v10108_v10 = vld [vmem:[#allocation6 + $0x2e4] sm:$0xf0] }
  0xf7   :  { %v10295_v23 = vld [vmem:[#allocation6 + $0x8c4] sm:$0xf]  ;;  %v8750_v29 = vor.u32 %v10503_v21, %v8747_v22  ;;  %3719 = vmatpush.bf16.msrb.mxu2 %v8494_v28  ;;  %v6993_v21 = vld [vmem:[#allocation6 + $0x188] sm:$0xf] }
  0xf8   :  { %v7915_v24 = vld [vmem:[#allocation6 + $0x8e0] sm:$0xf0] }
  0xf9   :  { %v10359_v25 = vld [vmem:[#allocation6 + $0xac4] sm:$0xf]  ;;  %v7918_v33 = vor.u32 %v10295_v23, %v7915_v24  ;;  %3732 = vmatpush.bf16.msrb.mxu3 %v8750_v29  ;;  %v10068_v23 = vld [vmem:[#allocation6 + $0x1a4] sm:$0xf0] }
  0xfa   :  { %v8171_v26 = vld [vmem:[#allocation6 + $0xae0] sm:$0xf0]  ;;  %v7249_v24 = vld [vmem:[#allocation6 + $0x388] sm:$0xf] }
  0xfb   :  { %v10431_v30 = vld [vmem:[#allocation6 + $0xd04] sm:$0xf]  ;;  %v8174_v34 = vor.u32 %v10359_v25, %v8171_v26  ;;  %3695 = vmatpush.bf16.msrb.mxu0 %v7918_v33  ;;  %v10132_v25 = vld [vmem:[#allocation6 + $0x3a4] sm:$0xf0] }
  0xfc   :  { %v8459_v31 = vld [vmem:[#allocation6 + $0xd20] sm:$0xf0]  ;;  %v7537_v33 = vld [vmem:[#allocation6 + $0x5c8] sm:$0xf] }
  0xfd   :  { %v10495_v35 = vld [vmem:[#allocation6 + $0xf04] sm:$0xf]  ;;  %v8462_v43 = vor.u32 %v10431_v30, %v8459_v31  ;;  %3708 = vmatpush.bf16.msrb.mxu1 %v8174_v34  ;;  %v10204_v34 = vld [vmem:[#allocation6 + $0x5e4] sm:$0xf0] }
  0xfe   :  { %v8715_v36 = vld [vmem:[#allocation6 + $0xf20] sm:$0xf0] }
  0xff   :  { %v10287_v39 = vld [vmem:[#allocation6 + $0x884] sm:$0xf]  ;;  %v8718_v44 = vor.u32 %v10495_v35, %v8715_v36  ;;  %3720 = vmatpush.bf16.msrb.mxu2 %v8462_v43  ;;  %v6994_v35 = vor.u32 %v10068_v23, %v6993_v21  ;;  %v7250_v36 = vor.u32 %v10132_v25, %v7249_v24  ;;  %v10060_v43 = vld [vmem:[#allocation6 + $0x164] sm:$0xf0] }
 0x100   :  { %v7883_v40 = vld [vmem:[#allocation6 + $0x8a0] sm:$0xf0]  ;;  %v10100_v23 = vld [vmem:[#allocation6 + $0x2a4] sm:$0xf0] }
 0x101   :  { %v10351_v41 = vld [vmem:[#allocation6 + $0xa84] sm:$0xf]  ;;  %v7886_v47 = vor.u32 %v10287_v39, %v7883_v40  ;;  %3733 = vmatpush.bf16.msrb.mxu3 %v8718_v44  ;;  %v7793_v39 = vld [vmem:[#allocation6 + $0x7c8] sm:$0xf] }
 0x102   :  { %v8139_v42 = vld [vmem:[#allocation6 + $0xaa0] sm:$0xf0]  ;;  %v10268_v40 = vld [vmem:[#allocation6 + $0x7e4] sm:$0xf0] }
 0x103   :  { %v10423_v46 = vld [vmem:[#allocation6 + $0xcc4] sm:$0xf]  ;;  %v8142_v48 = vor.u32 %v10351_v41, %v8139_v42  ;;  %3696 = vmatpush.bf16.msrb.mxu0 %v7886_v47  ;;  %v6961_v42 = vld [vmem:[#allocation6 + $0x148] sm:$0xf] }
 0x104   :  { %v8427_v9 = vld [vmem:[#allocation6 + $0xce0] sm:$0xf0]  ;;  %v10124_v47 = vld [vmem:[#allocation6 + $0x364] sm:$0xf0] }
 0x105   :  { %v10487_v49 = vld [vmem:[#allocation6 + $0xec4] sm:$0xf]  ;;  %v8430_v55 = vor.u32 %v10423_v46, %v8427_v9  ;;  %3709 = vmatpush.bf16.msrb.mxu1 %v8142_v48  ;;  %v7538_v46 = vor.u32 %v10204_v34, %v7537_v33  ;;  %v7217_v9 = vld [vmem:[#allocation6 + $0x348] sm:$0xf]  ;;  %v7794_v48 = vor.u32 %v10268_v40, %v7793_v39 }
 0x106   :  { %v8683_v50 = vld [vmem:[#allocation6 + $0xee0] sm:$0xf0]  ;;  %v7409_v25 = vld [vmem:[#allocation6 + $0x4c8] sm:$0xf] }
 0x107   :  { %v10279_v51 = vld [vmem:[#allocation6 + $0x844] sm:$0xf]  ;;  %v8686_v56 = vor.u32 %v10487_v49, %v8683_v50  ;;  %3721 = vmatpush.bf16.msrb.mxu2 %v8430_v55  ;;  %v7505_v49 = vld [vmem:[#allocation6 + $0x588] sm:$0xf] }
 0x108   :  { %v7851_v52 = vld [vmem:[#allocation6 + $0x860] sm:$0xf0]  ;;  %v10196_v50 = vld [vmem:[#allocation6 + $0x5a4] sm:$0xf0] }
 0x109   :  { %v10343_v53 = vld [vmem:[#allocation6 + $0xa44] sm:$0xf]  ;;  %v7854_v61 = vor.u32 %v10279_v51, %v7851_v52  ;;  %3734 = vmatpush.bf16.msrb.mxu3 %v8686_v56  ;;  %v6962_v51 = vor.u32 %v10060_v43, %v6961_v42  ;;  %v7761_v52 = vld [vmem:[#allocation6 + $0x788] sm:$0xf] }
 0x10a   :  { %v8107_v54 = vld [vmem:[#allocation6 + $0xa60] sm:$0xf0]  ;;  %v6929_v55 = vld [vmem:[#allocation6 + $0x108] sm:$0xf] }
 0x10b   :  { %v10415_v57 = vld [vmem:[#allocation6 + $0xc84] sm:$0xf]  ;;  %v8110_v62 = vor.u32 %v10343_v53, %v8107_v54  ;;  %3697 = vmatpush.bf16.msrb.mxu0 %v7854_v61  ;;  %v10260_v53 = vld [vmem:[#allocation6 + $0x7a4] sm:$0xf0]  ;;  %v7218_v54 = vor.u32 %v10124_v47, %v7217_v9 }
 0x10c   :  { %v8395_v59 = vld [vmem:[#allocation6 + $0xca0] sm:$0xf0]  ;;  %v10052_v56 = vld [vmem:[#allocation6 + $0x124] sm:$0xf0]  ;;  %v7762_v61 = vor.u32 %v10260_v53, %v7761_v52 }
 0x10d   :  { %v10479_v60 = vld [vmem:[#allocation6 + $0xe84] sm:$0xf]  ;;  %v8398_v5 = vor.u32 %v10415_v57, %v8395_v59  ;;  %3710 = vmatpush.bf16.msrb.mxu1 %v8110_v62  ;;  %v7506_v57 = vor.u32 %v10196_v50, %v7505_v49  ;;  %v7185_v59 = vld [vmem:[#allocation6 + $0x308] sm:$0xf] }
 0x10e   :  { %v8651_v63 = vld [vmem:[#allocation6 + $0xea0] sm:$0xf0]  ;;  %v7473_v62 = vld [vmem:[#allocation6 + $0x548] sm:$0xf] }
 0x10f   :  { %v10271_v1 = vld [vmem:[#allocation6 + $0x804] sm:$0xf]  ;;  %v8654_v11 = vor.u32 %v10479_v60, %v8651_v63  ;;  %3722 = vmatpush.bf16.msrb.mxu2 %v8398_v5  ;;  %v10116_v60 = vld [vmem:[#allocation6 + $0x324] sm:$0xf0] }
 0x110   :  { %v7819_v2 = vld [vmem:[#allocation6 + $0x820] sm:$0xf0]  ;;  %v10188_v63 = vld [vmem:[#allocation6 + $0x564] sm:$0xf0] }
 0x111   :  { %v10335_v38 = vld [vmem:[#allocation6 + $0xa04] sm:$0xf]  ;;  %v7822_v15 = vor.u32 %v10271_v1, %v7819_v2  ;;  %3735 = vmatpush.bf16.msrb.mxu3 %v8654_v11  ;;  %v6930_v1 = vor.u32 %v10052_v56, %v6929_v55  ;;  %v7729_v2 = vld [vmem:[#allocation6 + $0x748] sm:$0xf]  ;;  %v7474_v6 = vor.u32 %v10188_v63, %v7473_v62 }
 0x112   :  { %v8075_v3 = vld [vmem:[#allocation6 + $0xa20] sm:$0xf0]  ;;  %v10044_v5 = vld [vmem:[#allocation6 + $0xe4] sm:$0xf0] }
 0x113   :  { %v10407_v12 = vld [vmem:[#allocation6 + $0xc44] sm:$0xf]  ;;  %v8078_v16 = vor.u32 %v10335_v38, %v8075_v3  ;;  %3698 = vmatpush.bf16.msrb.mxu0 %v7822_v15  ;;  %v10252_v38 = vld [vmem:[#allocation6 + $0x764] sm:$0xf0]  ;;  %v7186_v3 = vor.u32 %v10116_v60, %v7185_v59  ;;  %v6898_v15 = vor.u32 %v10044_v5, %v6897_v4 }
 0x114   :  { %v8363_v14 = vld [vmem:[#allocation6 + $0xc60] sm:$0xf0]  ;;  %v7730_v11 = vor.u32 %v10252_v38, %v7729_v2  ;;  %v6833_v33 = vld [vmem:[#allocation6 + $0x48] sm:$0xf] }
 0x115   :  { %v10471_v17 = vld [vmem:[#allocation6 + $0xe44] sm:$0xf]  ;;  %v8366_v22 = vor.u32 %v10407_v12, %v8363_v14  ;;  %3711 = vmatpush.bf16.msrb.mxu1 %v8078_v16  ;;  %v7441_v12 = vld [vmem:[#allocation6 + $0x508] sm:$0xf] }
 0x116   :  { %v8619_v18 = vld [vmem:[#allocation6 + $0xe60] sm:$0xf0]  ;;  %3699 = vmatmul.bf16.vlgmr.msrb.gmra.mxu0 %v11166_v37  ;;  %v10180_v14 = vld [vmem:[#allocation6 + $0x524] sm:$0xf0] }
 0x117   :  { %v8622_v26 = vor.u32 %v10471_v17, %v8619_v18  ;;  %v10399_v28 = vld [vmem:[#allocation6 + $0xc04] sm:$0xf]  ;;  %3743 = vmatpush.bf16.msra.mxu0 %v7026_v19  ;;  %3723 = vmatpush.bf16.msrb.mxu2 %v8366_v22  ;;  %v7697_v16 = vld [vmem:[#allocation6 + $0x708] sm:$0xf]  ;;  %v7154_v18 = vor.u32 %v10108_v10, %v7153_v8  ;;  %v7442_v21 = vor.u32 %v10180_v14, %v7441_v12 }
 0x118   :  { %v8331_v29 = vld [vmem:[#allocation6 + $0xc20] sm:$0xf0]  ;;  %3712 = vmatmul.bf16.vlgmr.msrb.gmra.mxu1 %v11168_v45  ;;  %v10244_v17 = vld [vmem:[#allocation6 + $0x724] sm:$0xf0] }
 0x119   :  { %v10463_v30 = vld [vmem:[#allocation6 + $0xe04] sm:$0xf]  ;;  %3756 = vmatpush.bf16.msra.mxu1 %v7282_v20  ;;  %v8334_v41 = vor.u32 %v10399_v28, %v8331_v29  ;;  %3736 = vmatpush.bf16.msrb.mxu3 %v8622_v26  ;;  %v6865_v19 = vld [vmem:[#allocation6 + $0x88] sm:$0xf]  ;;  %v7698_v24 = vor.u32 %v10244_v17, %v7697_v16 }
 0x11a   :  { %v8587_v31 = vld [vmem:[#allocation6 + $0xe20] sm:$0xf0]  ;;  %v10036_v20 = vld [vmem:[#allocation6 + $0xa4] sm:$0xf0] }
 0x11b   :  { %v8590_v44 = vor.u32 %v10463_v30, %v8587_v31  ;;  %3744 = vmatpush.bf16.msra.mxu0 %v6994_v35  ;;  %3724 = vmatpush.bf16.msrb.mxu2 %v8334_v41  ;;  %v7121_v22 = vld [vmem:[#allocation6 + $0x288] sm:$0xf]  ;;  %v6866_v28 = vor.u32 %v10036_v20, %v6865_v19 }
 0x11c   :  { %v10172_v26 = vld [vmem:[#allocation6 + $0x4e4] sm:$0xf0]  ;;  %v7122_v31 = vor.u32 %v10100_v23, %v7121_v22 }
 0x11d   :  { %3757 = vmatpush.bf16.msra.mxu1 %v7250_v36  ;;  %3737 = vmatpush.bf16.msrb.mxu3 %v8590_v44  ;;  %v7665_v29 = vld [vmem:[#allocation6 + $0x6c8] sm:$0xf]  ;;  %v7410_v35 = vor.u32 %v10172_v26, %v7409_v25 }
 0x11e   :  { %3725 = vmatmul.bf16.vlgmr.msrb.gmra.mxu2 %v11172_v7  ;;  %v10236_v30 = vld [vmem:[#allocation6 + $0x6e4] sm:$0xf0] }
 0x11f   :  { %3769 = vmatpush.bf16.msra.mxu2 %v7538_v46  ;;  %3745 = vmatpush.bf16.msra.mxu0 %v6962_v51  ;;  %v10028_v34 = vld [vmem:[#allocation6 + $0x64] sm:$0xf0]  ;;  %v7666_v40 = vor.u32 %v10236_v30, %v7665_v29 }
 0x120   :  { %3738 = vmatmul.bf16.vlgmr.msrb.gmra.mxu3 %v11174_v13  ;;  %v7089_v36 = vld [vmem:[#allocation6 + $0x248] sm:$0xf]  ;;  %v6834_v43 = vor.u32 %v10028_v34, %v6833_v33 }
 0x121   :  { %3782 = vmatpush.bf16.msra.mxu3 %v7794_v48  ;;  %3758 = vmatpush.bf16.msra.mxu1 %v7218_v54  ;;  %v10092_v39 = vld [vmem:[#allocation6 + $0x264] sm:$0xf0] }
 0x122   :  { %v7377_v41 = vld [vmem:[#allocation6 + $0x488] sm:$0xf]  ;;  %v7090_v47 = vor.u32 %v10092_v39, %v7089_v36 }
 0x123   :  { %3770 = vmatpush.bf16.msra.mxu2 %v7506_v57  ;;  %3746 = vmatpush.bf16.msra.mxu0 %v6930_v1  ;;  %v10164_v42 = vld [vmem:[#allocation6 + $0x4a4] sm:$0xf0] }
 0x124   :  { %v7633_v44 = vld [vmem:[#allocation6 + $0x688] sm:$0xf]  ;;  %v7378_v51 = vor.u32 %v10164_v42, %v7377_v41 }
 0x125   :  { %3783 = vmatpush.bf16.msra.mxu3 %v7762_v61  ;;  %3759 = vmatpush.bf16.msra.mxu1 %v7186_v3  ;;  %v10228_v46 = vld [vmem:[#allocation6 + $0x6a4] sm:$0xf0] }
 0x126   :  { %v6801_v9 = vld [vmem:[#allocation6 + $0x8] sm:$0xf]  ;;  %v7634_v55 = vor.u32 %v10228_v46, %v7633_v44 }
 0x127   :  { %3771 = vmatpush.bf16.msra.mxu2 %v7474_v6  ;;  %3747 = vmatpush.bf16.msra.mxu0 %v6898_v15  ;;  %v10020_v48 = vld [vmem:[#allocation6 + $0x24] sm:$0xf0] }
 0x128   :  { %v7057_v49 = vld [vmem:[#allocation6 + $0x208] sm:$0xf]  ;;  %v6802_v60 = vor.u32 %v10020_v48, %v6801_v9 }
 0x129   :  { %3784 = vmatpush.bf16.msra.mxu3 %v7730_v11  ;;  %3760 = vmatpush.bf16.msra.mxu1 %v7154_v18  ;;  %v10084_v50 = vld [vmem:[#allocation6 + $0x224] sm:$0xf0] }
 0x12a   :  { %v8049_v52 = vld [vmem:[#allocation6 + $0x9c8] sm:$0xf]  ;;  %v7058_v63 = vor.u32 %v10084_v50, %v7057_v49 }
 0x12b   :  { %3772 = vmatpush.bf16.msra.mxu2 %v7442_v21  ;;  %3748 = vmatpush.bf16.msra.mxu0 %v6866_v28  ;;  %v10332_v53 = vld [vmem:[#allocation6 + $0x9e4] sm:$0xf0] }
 0x12c   :  { %v8305_v54 = vld [vmem:[#allocation6 + $0xbc8] sm:$0xf]  ;;  %v8050_v1 = vor.u32 %v10332_v53, %v8049_v52 }
 0x12d   :  { %3785 = vmatpush.bf16.msra.mxu3 %v7698_v24  ;;  %3761 = vmatpush.bf16.msra.mxu1 %v7122_v31  ;;  %v10396_v56 = vld [vmem:[#allocation6 + $0xbe4] sm:$0xf0] }
 0x12e   :  { %v7345_v57 = vld [vmem:[#allocation6 + $0x448] sm:$0xf]  ;;  %v8306_v38 = vor.u32 %v10396_v56, %v8305_v54 }
 0x12f   :  { %3773 = vmatpush.bf16.msra.mxu2 %v7410_v35  ;;  %v10156_v59 = vld [vmem:[#allocation6 + $0x464] sm:$0xf0]  ;;  %3749 = vmatpush.bf16.msra.mxu0 %v6834_v43 }
 0x130   :  { %v7601_v61 = vld [vmem:[#allocation6 + $0x648] sm:$0xf]  ;;  %v7346_v3 = vor.u32 %v10156_v59, %v7345_v57 }
 0x131   :  { %3786 = vmatpush.bf16.msra.mxu3 %v7666_v40  ;;  %v10220_v62 = vld [vmem:[#allocation6 + $0x664] sm:$0xf0]  ;;  %3762 = vmatpush.bf16.msra.mxu1 %v7090_v47 }
 0x132   :  { %v8017_v2 = vld [vmem:[#allocation6 + $0x988] sm:$0xf]  ;;  %v7602_v8 = vor.u32 %v10220_v62, %v7601_v61 }
 0x133   :  { %3774 = vmatpush.bf16.msra.mxu2 %v7378_v51  ;;  %v10324_v4 = vld [vmem:[#allocation6 + $0x9a4] sm:$0xf0]  ;;  %3750 = vmatpush.bf16.msra.mxu0 %v6802_v60 }
 0x134   :  { %v8273_v5 = vld [vmem:[#allocation6 + $0xb88] sm:$0xf]  ;;  %v8018_v17 = vor.u32 %v10324_v4, %v8017_v2 }
 0x135   :  { %v10388_v6 = vld [vmem:[#allocation6 + $0xba4] sm:$0xf0]  ;;  %3787 = vmatpush.bf16.msra.mxu3 %v7634_v55  ;;  %3763 = vmatpush.bf16.msra.mxu1 %v7058_v63 }
 0x136   :  { %v7313_v10 = vld [vmem:[#allocation6 + $0x408] sm:$0xf]  ;;  %v8274_v20 = vor.u32 %v10388_v6, %v8273_v5  ;;  %3751 = vmatmul.bf16.vlgmr.msra.gmra.mxu0 %v11150_v27 }
 0x137   :  { %v10148_v11 = vld [vmem:[#allocation6 + $0x424] sm:$0xf0]  ;;  %3795 = vmatpush.bf16.msrb.mxu0 %v8050_v1  ;;  %3775 = vmatpush.bf16.msra.mxu2 %v7346_v3 }
 0x138   :  { %v7569_v12 = vld [vmem:[#allocation6 + $0x608] sm:$0xf]  ;;  %v7314_v21 = vor.u32 %v10148_v11, %v7313_v10  ;;  %3764 = vmatmul.bf16.vlgmr.msra.gmra.mxu1 %v11152_v32 }
 0x139   :  { %v10212_v14 = vld [vmem:[#allocation6 + $0x624] sm:$0xf0]  ;;  %3808 = vmatpush.bf16.msrb.mxu1 %v8306_v38  ;;  %3788 = vmatpush.bf16.msra.mxu3 %v7602_v8 }
 0x13a   :  { %v8561_v15 = vld [vmem:[#allocation6 + $0xdc8] sm:$0xf]  ;;  %v7570_v24 = vor.u32 %v10212_v14, %v7569_v12 }
 0x13b   :  { %v10460_v16 = vld [vmem:[#allocation6 + $0xde4] sm:$0xf0]  ;;  %3796 = vmatpush.bf16.msrb.mxu0 %v8018_v17  ;;  %3776 = vmatpush.bf16.msra.mxu2 %v7314_v21 }
 0x13c   :  { %v8817_v18 = vld [vmem:[#allocation6 + $0xfc8] sm:$0xf]  ;;  %v8562_v25 = vor.u32 %v10460_v16, %v8561_v15 }
 0x13d   :  { %v10524_v19 = vld [vmem:[#allocation6 + $0xfe4] sm:$0xf0]  ;;  %3809 = vmatpush.bf16.msrb.mxu1 %v8274_v20  ;;  %3789 = vmatpush.bf16.msra.mxu3 %v7570_v24 }
 0x13e   :  { %v7985_v22 = vld [vmem:[#allocation6 + $0x948] sm:$0xf]  ;;  %v8818_v29 = vor.u32 %v10524_v19, %v8817_v18  ;;  %3777 = vmatmul.bf16.vlgmr.msra.gmra.mxu2 %v11158_v58 }
 0x13f   :  { %v10316_v23 = vld [vmem:[#allocation6 + $0x964] sm:$0xf0]  ;;  %3821 = vmatpush.bf16.msrb.mxu2 %v8562_v25 }
 0x140   :  { %v8241_v26 = vld [vmem:[#allocation6 + $0xb48] sm:$0xf]  ;;  %v7986_v33 = vor.u32 %v10316_v23, %v7985_v22  ;;  %3790 = vmatmul.bf16.vlgmr.msra.gmra.mxu3 %v11160_v0 }
 0x141   :  { %v10380_v28 = vld [vmem:[#allocation6 + $0xb64] sm:$0xf0]  ;;  %3834 = vmatpush.bf16.msrb.mxu3 %v8818_v29 }
 0x142   :  { %v8529_v30 = vld [vmem:[#allocation6 + $0xd88] sm:$0xf]  ;;  %v8242_v36 = vor.u32 %v10380_v28, %v8241_v26  ;;  %3797 = vmatpush.bf16.msrb.mxu0 %v7986_v33 }
 0x143   :  { %v10452_v31 = vld [vmem:[#allocation6 + $0xda4] sm:$0xf0] }
 0x144   :  { %v8785_v34 = vld [vmem:[#allocation6 + $0xf88] sm:$0xf]  ;;  %v8530_v41 = vor.u32 %v10452_v31, %v8529_v30  ;;  %3810 = vmatpush.bf16.msrb.mxu1 %v8242_v36  ;;  %v10136_v36 = vld [vmem:[#allocation6 + $0x3cc] sm:$0xf] }
 0x145   :  { %v10516_v35 = vld [vmem:[#allocation6 + $0xfa4] sm:$0xf0] }
 0x146   :  { %v7953_v39 = vld [vmem:[#allocation6 + $0x908] sm:$0xf]  ;;  %v8786_v44 = vor.u32 %v10516_v35, %v8785_v34  ;;  %3822 = vmatpush.bf16.msrb.mxu2 %v8530_v41  ;;  %v10072_v34 = vld [vmem:[#allocation6 + $0x1cc] sm:$0xf] }
 0x147   :  { %v10308_v40 = vld [vmem:[#allocation6 + $0x924] sm:$0xf0]  ;;  %v7027_v35 = vld [vmem:[#allocation6 + $0x1e8] sm:$0xf0] }
 0x148   :  { %v8209_v42 = vld [vmem:[#allocation6 + $0xb08] sm:$0xf]  ;;  %v7954_v47 = vor.u32 %v10308_v40, %v7953_v39  ;;  %3835 = vmatpush.bf16.msrb.mxu3 %v8786_v44  ;;  %v7283_v40 = vld [vmem:[#allocation6 + $0x3e8] sm:$0xf0] }
 0x149   :  { %v10372_v43 = vld [vmem:[#allocation6 + $0xb24] sm:$0xf0] }
 0x14a   :  { %v8497_v46 = vld [vmem:[#allocation6 + $0xd48] sm:$0xf]  ;;  %v8210_v50 = vor.u32 %v10372_v43, %v8209_v42  ;;  %3798 = vmatpush.bf16.msrb.mxu0 %v7954_v47  ;;  %v7030_v47 = vor.u32 %v10072_v34, %v7027_v35  ;;  %v10248_v35 = vld [vmem:[#allocation6 + $0x74c] sm:$0xf] }
 0x14b   :  { %v10444_v9 = vld [vmem:[#allocation6 + $0xd64] sm:$0xf0] }
 0x14c   :  { %v8753_v48 = vld [vmem:[#allocation6 + $0xf48] sm:$0xf]  ;;  %v8498_v53 = vor.u32 %v10444_v9, %v8497_v46  ;;  %3811 = vmatpush.bf16.msrb.mxu1 %v8210_v50 }
 0x14d   :  { %v10508_v49 = vld [vmem:[#allocation6 + $0xf64] sm:$0xf0] }
 0x14e   :  { %v7921_v51 = vld [vmem:[#allocation6 + $0x8c8] sm:$0xf]  ;;  %v8754_v56 = vor.u32 %v10508_v49, %v8753_v48  ;;  %3823 = vmatpush.bf16.msrb.mxu2 %v8498_v53  ;;  %v10064_v48 = vld [vmem:[#allocation6 + $0x18c] sm:$0xf]  ;;  %v7286_v49 = vor.u32 %v10136_v36, %v7283_v40 }
 0x14f   :  { %v10300_v52 = vld [vmem:[#allocation6 + $0x8e4] sm:$0xf0]  ;;  %v7251_v53 = vld [vmem:[#allocation6 + $0x3a8] sm:$0xf0] }
 0x150   :  { %v8177_v54 = vld [vmem:[#allocation6 + $0xac8] sm:$0xf]  ;;  %v7922_v60 = vor.u32 %v10300_v52, %v7921_v51  ;;  %3836 = vmatpush.bf16.msrb.mxu3 %v8754_v56  ;;  %v6995_v51 = vld [vmem:[#allocation6 + $0x1a8] sm:$0xf0] }
 0x151   :  { %v10364_v55 = vld [vmem:[#allocation6 + $0xae4] sm:$0xf0]  ;;  %v10128_v52 = vld [vmem:[#allocation6 + $0x38c] sm:$0xf] }
 0x152   :  { %v8465_v57 = vld [vmem:[#allocation6 + $0xd08] sm:$0xf]  ;;  %v8178_v63 = vor.u32 %v10364_v55, %v8177_v54  ;;  %3799 = vmatpush.bf16.msrb.mxu0 %v7922_v60  ;;  %v10200_v60 = vld [vmem:[#allocation6 + $0x5cc] sm:$0xf] }
 0x153   :  { %v10436_v59 = vld [vmem:[#allocation6 + $0xd24] sm:$0xf0]  ;;  %v7731_v36 = vld [vmem:[#allocation6 + $0x768] sm:$0xf0] }
 0x154   :  { %v8721_v61 = vld [vmem:[#allocation6 + $0xf08] sm:$0xf]  ;;  %v8466_v38 = vor.u32 %v10436_v59, %v8465_v57  ;;  %3812 = vmatpush.bf16.msrb.mxu1 %v8178_v63  ;;  %v10264_v63 = vld [vmem:[#allocation6 + $0x7cc] sm:$0xf] }
 0x155   :  { %v10500_v62 = vld [vmem:[#allocation6 + $0xf24] sm:$0xf0]  ;;  %v10040_v40 = vld [vmem:[#allocation6 + $0xcc] sm:$0xf] }
 0x156   :  { %v7889_v1 = vld [vmem:[#allocation6 + $0x888] sm:$0xf]  ;;  %v8722_v5 = vor.u32 %v10500_v62, %v8721_v61  ;;  %3824 = vmatpush.bf16.msrb.mxu2 %v8466_v38  ;;  %v7539_v61 = vld [vmem:[#allocation6 + $0x5e8] sm:$0xf0]  ;;  %v6998_v62 = vor.u32 %v10064_v48, %v6995_v51 }
 0x157   :  { %v10292_v2 = vld [vmem:[#allocation6 + $0x8a4] sm:$0xf0]  ;;  %v7443_v48 = vld [vmem:[#allocation6 + $0x528] sm:$0xf0] }
 0x158   :  { %v8145_v3 = vld [vmem:[#allocation6 + $0xa88] sm:$0xf]  ;;  %v7890_v10 = vor.u32 %v10292_v2, %v7889_v1  ;;  %3837 = vmatpush.bf16.msrb.mxu3 %v8722_v5  ;;  %v7795_v1 = vld [vmem:[#allocation6 + $0x7e8] sm:$0xf0]  ;;  %v7254_v2 = vor.u32 %v10128_v52, %v7251_v53  ;;  %v11190_v5 = vld [vmem:[#allocation7] sm:$0xff] }
 0x159   :  { %v10356_v4 = vld [vmem:[#allocation6 + $0xaa4] sm:$0xf0]  ;;  %v7699_v51 = vld [vmem:[#allocation6 + $0x728] sm:$0xf0] }
 0x15a   :  { %v8433_v6 = vld [vmem:[#allocation6 + $0xcc8] sm:$0xf]  ;;  %v8146_v14 = vor.u32 %v10356_v4, %v8145_v3  ;;  %3800 = vmatpush.bf16.msrb.mxu0 %v7890_v10  ;;  %v10056_v3 = vld [vmem:[#allocation6 + $0x14c] sm:$0xf] }
 0x15b   :  { %v10428_v8 = vld [vmem:[#allocation6 + $0xce4] sm:$0xf0]  ;;  %v6963_v4 = vld [vmem:[#allocation6 + $0x168] sm:$0xf0] }
 0x15c   :  { %v8689_v11 = vld [vmem:[#allocation6 + $0xec8] sm:$0xf]  ;;  %v8434_v17 = vor.u32 %v10428_v8, %v8433_v6  ;;  %3813 = vmatpush.bf16.msrb.mxu1 %v8146_v14  ;;  %v7542_v8 = vor.u32 %v10200_v60, %v7539_v61  ;;  %v10120_v10 = vld [vmem:[#allocation6 + $0x34c] sm:$0xf] }
 0x15d   :  { %v10492_v12 = vld [vmem:[#allocation6 + $0xee4] sm:$0xf0]  ;;  %v10192_v14 = vld [vmem:[#allocation6 + $0x58c] sm:$0xf] }
 0x15e   :  { %v7857_v15 = vld [vmem:[#allocation6 + $0x848] sm:$0xf]  ;;  %v8690_v20 = vor.u32 %v10492_v12, %v8689_v11  ;;  %3825 = vmatpush.bf16.msrb.mxu2 %v8434_v17  ;;  %v7219_v11 = vld [vmem:[#allocation6 + $0x368] sm:$0xf0]  ;;  %v7798_v12 = vor.u32 %v10264_v63, %v7795_v1  ;;  %v959_v17 = vperm.slane %v11190_v5, 0 }
 0x15f   :  { %v10284_v16 = vld [vmem:[#allocation6 + $0x864] sm:$0xf0]  ;;  %v10032_v53 = vld [vmem:[#allocation6 + $0x8c] sm:$0xf] }
 0x160   :  { %v8113_v18 = vld [vmem:[#allocation6 + $0xa48] sm:$0xf]  ;;  %v7858_v23 = vor.u32 %v10284_v16, %v7857_v15  ;;  %3838 = vmatpush.bf16.msrb.mxu3 %v8690_v20  ;;  %v7507_v15 = vld [vmem:[#allocation6 + $0x5a8] sm:$0xf0]  ;;  %v6966_v16 = vor.u32 %v10056_v3, %v6963_v4  ;;  %v7222_v20 = vor.u32 %v10120_v10, %v7219_v11 }
 0x161   :  { %v10348_v19 = vld [vmem:[#allocation6 + $0xa64] sm:$0xf0]  ;;  %v10168_v61 = vld [vmem:[#allocation6 + $0x4cc] sm:$0xf] }
 0x162   :  { %v8401_v21 = vld [vmem:[#allocation6 + $0xc88] sm:$0xf]  ;;  %v8114_v28 = vor.u32 %v10348_v19, %v8113_v18  ;;  %3801 = vmatpush.bf16.msrb.mxu0 %v7858_v23  ;;  %v10256_v18 = vld [vmem:[#allocation6 + $0x78c] sm:$0xf]  ;;  %v7510_v23 = vor.u32 %v10192_v14, %v7507_v15 }
 0x163   :  { %v10420_v22 = vld [vmem:[#allocation6 + $0xca4] sm:$0xf0]  ;;  %v7763_v19 = vld [vmem:[#allocation6 + $0x7a8] sm:$0xf0] }
 0x164   :  { %v8657_v24 = vld [vmem:[#allocation6 + $0xe88] sm:$0xf]  ;;  %v8402_v33 = vor.u32 %v10420_v22, %v8401_v21  ;;  %3814 = vmatpush.bf16.msrb.mxu1 %v8114_v28  ;;  %v10048_v21 = vld [vmem:[#allocation6 + $0x10c] sm:$0xf]  ;;  %v7766_v28 = vor.u32 %v10256_v18, %v7763_v19 }
 0x165   :  { %v10484_v25 = vld [vmem:[#allocation6 + $0xea4] sm:$0xf0]  ;;  %v6931_v22 = vld [vmem:[#allocation6 + $0x128] sm:$0xf0] }
 0x166   :  { %v7825_v26 = vld [vmem:[#allocation6 + $0x808] sm:$0xf]  ;;  %v8658_v39 = vor.u32 %v10484_v25, %v8657_v24  ;;  %3826 = vmatpush.bf16.msrb.mxu2 %v8402_v33  ;;  %v10112_v24 = vld [vmem:[#allocation6 + $0x30c] sm:$0xf]  ;;  %v3557_v33 = vpop.f32.mrf.mxu1  ;;  %v6934_v34 = vor.u32 %v10048_v21, %v6931_v22  ;;  %v3583_v22 = vpop.f32.mrf.mxu3 }
 0x167   :  { %v10276_v29 = vld [vmem:[#allocation6 + $0x824] sm:$0xf0]  ;;  %v7187_v25 = vld [vmem:[#allocation6 + $0x328] sm:$0xf0] }
 0x168   :  { %v8081_v30 = vld [vmem:[#allocation6 + $0xa08] sm:$0xf]  ;;  %v7826_v43 = vor.u32 %v10276_v29, %v7825_v26  ;;  %3839 = vmatpush.bf16.msrb.mxu3 %v8658_v39  ;;  %v3544_v26 = vpop.f32.mrf.mxu0  ;;  %v10184_v29 = vld [vmem:[#allocation6 + $0x54c] sm:$0xf]  ;;  %v7190_v39 = vor.u32 %v10112_v24, %v7187_v25 }
 0x169   :  { %v10340_v31 = vld [vmem:[#allocation6 + $0xa24] sm:$0xf0]  ;;  %v10024_v4 = vld [vmem:[#allocation6 + $0x4c] sm:$0xf] }
 0x16a   :  { %v8369_v41 = vld [vmem:[#allocation6 + $0xc48] sm:$0xf]  ;;  %v8082_v9 = vor.u32 %v10340_v31, %v8081_v30  ;;  %3802 = vmatpush.bf16.msrb.mxu0 %v7826_v43  ;;  %v7475_v30 = vld [vmem:[#allocation6 + $0x568] sm:$0xf0]  ;;  %v3545_v31 = vadd.f32 %v3544_v26, %v959_v17 }
 0x16b   :  { %v10412_v42 = vld [vmem:[#allocation6 + $0xc64] sm:$0xf0]  ;;  %v7478_v43 = vor.u32 %v10184_v29, %v7475_v30  ;;  %v10088_v10 = vld [vmem:[#allocation6 + $0x24c] sm:$0xf] }
 0x16c   :  { %v8625_v44 = vld [vmem:[#allocation6 + $0xe48] sm:$0xf]  ;;  %v8370_v50 = vor.u32 %v10412_v42, %v8369_v41  ;;  %3815 = vmatpush.bf16.msrb.mxu1 %v8082_v9  ;;  %v6899_v41 = vld [vmem:[#allocation6 + $0xe8] sm:$0xf0]  ;;  %v3558_v42 = vadd.f32 %v3557_v33, %v3545_v31  ;;  %v7734_v9 = vor.u32 %v10248_v35, %v7731_v36 }
 0x16d   :  { %v10476_v46 = vld [vmem:[#allocation6 + $0xe64] sm:$0xf0]  ;;  %3803 = vmatmul.bf16.vlgmr.msrb.gmra.mxu0 %v11166_v37  ;;  %v7091_v11 = vld [vmem:[#allocation6 + $0x268] sm:$0xf0] }
 0x16e   :  { %v8626_v54 = vor.u32 %v10476_v46, %v8625_v44  ;;  %v8337_v55 = vld [vmem:[#allocation6 + $0xc08] sm:$0xf]  ;;  %3847 = vmatpush.bf16.msra.mxu0 %v7030_v47  ;;  %3827 = vmatpush.bf16.msrb.mxu2 %v8370_v50  ;;  %v10104_v44 = vld [vmem:[#allocation6 + $0x2cc] sm:$0xf]  ;;  %v3559_v63 = vpop.f32.mrf.mxu1 }
 0x16f   :  { %v10404_v56 = vld [vmem:[#allocation6 + $0xc24] sm:$0xf0]  ;;  %3816 = vmatmul.bf16.vlgmr.msrb.gmra.mxu1 %v11168_v45  ;;  %v7155_v46 = vld [vmem:[#allocation6 + $0x2e8] sm:$0xf0] }
 0x170   :  { %v8593_v57 = vld [vmem:[#allocation6 + $0xe08] sm:$0xf]  ;;  %3860 = vmatpush.bf16.msra.mxu1 %v7286_v49  ;;  %v8338_v38 = vor.u32 %v10404_v56, %v8337_v55  ;;  %3840 = vmatpush.bf16.msrb.mxu3 %v8626_v54  ;;  %v10176_v47 = vld [vmem:[#allocation6 + $0x50c] sm:$0xf]  ;;  %v6902_v49 = vor.u32 %v10040_v40, %v6899_v41  ;;  %v7158_v52 = vor.u32 %v10104_v44, %v7155_v46 }
 0x171   :  { %v10468_v59 = vld [vmem:[#allocation6 + $0xe24] sm:$0xf0]  ;;  %v10240_v50 = vld [vmem:[#allocation6 + $0x70c] sm:$0xf]  ;;  %v7446_v55 = vor.u32 %v10176_v47, %v7443_v48 }
 0x172   :  { %v8594_v6 = vor.u32 %v10468_v59, %v8593_v57  ;;  %3848 = vmatpush.bf16.msra.mxu0 %v6998_v62  ;;  %3828 = vmatpush.bf16.msrb.mxu2 %v8338_v38  ;;  %v6867_v54 = vld [vmem:[#allocation6 + $0xa8] sm:$0xf0]  ;;  %v3546_v59 = vpop.f32.mrf.mxu0  ;;  %v7702_v60 = vor.u32 %v10240_v50, %v7699_v51 }
 0x173   :  { %v10096_v56 = vld [vmem:[#allocation6 + $0x28c] sm:$0xf]  ;;  %v6870_v1 = vor.u32 %v10032_v53, %v6867_v54 }
 0x174   :  { %3861 = vmatpush.bf16.msra.mxu1 %v7254_v2  ;;  %3841 = vmatpush.bf16.msrb.mxu3 %v8594_v6  ;;  %v7123_v57 = vld [vmem:[#allocation6 + $0x2a8] sm:$0xf0] }
 0x175   :  { %3829 = vmatmul.bf16.vlgmr.msrb.gmra.mxu2 %v11172_v7  ;;  %v7411_v62 = vld [vmem:[#allocation6 + $0x4e8] sm:$0xf0]  ;;  %v7126_v3 = vor.u32 %v10096_v56, %v7123_v57 }
 0x176   :  { %3873 = vmatpush.bf16.msra.mxu2 %v7542_v8  ;;  %3849 = vmatpush.bf16.msra.mxu0 %v6966_v16  ;;  %v10232_v2 = vld [vmem:[#allocation6 + $0x6cc] sm:$0xf]  ;;  %v7414_v8 = vor.u32 %v10168_v61, %v7411_v62  ;;  %v3570_v16 = vpop.f32.mrf.mxu2  ;;  %v3609_v41 = vpop.f32.mrf.mxu1 }
 0x177   :  { %3842 = vmatmul.bf16.vlgmr.msrb.gmra.mxu3 %v11174_v13  ;;  %v7667_v38 = vld [vmem:[#allocation6 + $0x6e8] sm:$0xf0]  ;;  %v3571_v21 = vadd.f32 %v3570_v16, %v3558_v42 }
 0x178   :  { %3886 = vmatpush.bf16.msra.mxu3 %v7798_v12  ;;  %3862 = vmatpush.bf16.msra.mxu1 %v7222_v20  ;;  %v6835_v6 = vld [vmem:[#allocation6 + $0x68] sm:$0xf0]  ;;  %v7670_v12 = vor.u32 %v10232_v2, %v7667_v38 }
 0x179   :  { %v10160_v14 = vld [vmem:[#allocation6 + $0x48c] sm:$0xf]  ;;  %v6838_v17 = vor.u32 %v10024_v4, %v6835_v6  ;;  %v3584_v33 = vadd.f32 %v3583_v22, %v3571_v21 }
 0x17a   :  { %3874 = vmatpush.bf16.msra.mxu2 %v7510_v23  ;;  %3850 = vmatpush.bf16.msra.mxu0 %v6934_v34  ;;  %v7379_v15 = vld [vmem:[#allocation6 + $0x4a8] sm:$0xf0]  ;;  %v7094_v23 = vor.u32 %v10088_v10, %v7091_v11  ;;  %v3596_v34 = vpop.f32.mrf.mxu0 }
 0x17b   :  { %v10224_v18 = vld [vmem:[#allocation6 + $0x68c] sm:$0xf]  ;;  %v3597_v46 = vadd.f32 %v3596_v34, %v3584_v33 }
 0x17c   :  { %3887 = vmatpush.bf16.msra.mxu3 %v7766_v28  ;;  %3863 = vmatpush.bf16.msra.mxu1 %v7190_v39  ;;  %v7635_v19 = vld [vmem:[#allocation6 + $0x6a8] sm:$0xf0]  ;;  %v7382_v28 = vor.u32 %v10160_v14, %v7379_v15 }
 0x17d   :  { %v10016_v20 = vld [vmem:[#allocation6 + $0xc] sm:$0xf]  ;;  %v7638_v35 = vor.u32 %v10224_v18, %v7635_v19  ;;  %v3610_v54 = vadd.f32 %v3609_v41, %v3597_v46 }
 0x17e   :  { %3875 = vmatpush.bf16.msra.mxu2 %v7478_v43  ;;  %3851 = vmatpush.bf16.msra.mxu0 %v6902_v49  ;;  %v6803_v24 = vld [vmem:[#allocation6 + $0x28] sm:$0xf0] }
 0x17f   :  { %v10080_v25 = vld [vmem:[#allocation6 + $0x20c] sm:$0xf]  ;;  %v6806_v42 = vor.u32 %v10016_v20, %v6803_v24 }
 0x180   :  { %3888 = vmatpush.bf16.msra.mxu3 %v7734_v9  ;;  %3864 = vmatpush.bf16.msra.mxu1 %v7158_v52  ;;  %v7059_v26 = vld [vmem:[#allocation6 + $0x228] sm:$0xf0] }
 0x181   :  { %v10328_v29 = vld [vmem:[#allocation6 + $0x9cc] sm:$0xf]  ;;  %v7062_v9 = vor.u32 %v10080_v25, %v7059_v26 }
 0x182   :  { %3876 = vmatpush.bf16.msra.mxu2 %v7446_v55  ;;  %3852 = vmatpush.bf16.msra.mxu0 %v6870_v1  ;;  %v8051_v30 = vld [vmem:[#allocation6 + $0x9e8] sm:$0xf0]  ;;  %v3585_v1 = vpop.f32.mrf.mxu3  ;;  %v3598_v11 = vpop.f32.mrf.mxu0 }
 0x183   :  { %v10392_v31 = vld [vmem:[#allocation6 + $0xbcc] sm:$0xf]  ;;  %v8054_v47 = vor.u32 %v10328_v29, %v8051_v30 }
 0x184   :  { %3889 = vmatpush.bf16.msra.mxu3 %v7702_v60  ;;  %3865 = vmatpush.bf16.msra.mxu1 %v7126_v3  ;;  %v8307_v36 = vld [vmem:[#allocation6 + $0xbe8] sm:$0xf0]  ;;  %v3572_v60 = vpop.f32.mrf.mxu2 }
 0x185   :  { %v10152_v39 = vld [vmem:[#allocation6 + $0x44c] sm:$0xf]  ;;  %v8310_v49 = vor.u32 %v10392_v31, %v8307_v36 }
 0x186   :  { %3877 = vmatpush.bf16.msra.mxu2 %v7414_v8  ;;  %v7347_v40 = vld [vmem:[#allocation6 + $0x468] sm:$0xf0]  ;;  %3853 = vmatpush.bf16.msra.mxu0 %v6838_v17  ;;  %v3611_v17 = vpop.f32.mrf.mxu1 }
 0x187   :  { %v10216_v43 = vld [vmem:[#allocation6 + $0x64c] sm:$0xf]  ;;  %v7350_v50 = vor.u32 %v10152_v39, %v7347_v40  ;;  %v960_v40 = vperm.slane %v11190_v5, 1 }
 0x188   :  { %3890 = vmatpush.bf16.msra.mxu3 %v7670_v12  ;;  %v7603_v44 = vld [vmem:[#allocation6 + $0x668] sm:$0xf0]  ;;  %3866 = vmatpush.bf16.msra.mxu1 %v7094_v23 }
 0x189   :  { %v10320_v48 = vld [vmem:[#allocation6 + $0x98c] sm:$0xf]  ;;  %v7606_v55 = vor.u32 %v10216_v43, %v7603_v44 }
 0x18a   :  { %3878 = vmatpush.bf16.msra.mxu2 %v7382_v28  ;;  %v8019_v51 = vld [vmem:[#allocation6 + $0x9a8] sm:$0xf0]  ;;  %3854 = vmatpush.bf16.msra.mxu0 %v6806_v42  ;;  %v3635_v39 = vpop.f32.mrf.mxu3 }
 0x18b   :  { %v10384_v52 = vld [vmem:[#allocation6 + $0xb8c] sm:$0xf]  ;;  %v8022_v2 = vor.u32 %v10320_v48, %v8019_v51  ;;  %v3648_v51 = vpop.f32.mrf.mxu0 }
 0x18c   :  { %v8275_v53 = vld [vmem:[#allocation6 + $0xba8] sm:$0xf0]  ;;  %3891 = vmatpush.bf16.msra.mxu3 %v7638_v35  ;;  %3867 = vmatpush.bf16.msra.mxu1 %v7062_v9  ;;  %v3622_v31 = vpop.f32.mrf.mxu2 }
 0x18d   :  { %v10144_v56 = vld [vmem:[#allocation6 + $0x40c] sm:$0xf]  ;;  %v8278_v4 = vor.u32 %v10384_v52, %v8275_v53  ;;  %3855 = vmatmul.bf16.vlgmr.msra.gmra.mxu0 %v11150_v27  ;;  %v3623_v36 = vadd.f32 %v3622_v31, %v3610_v54 }
 0x18e   :  { %v7315_v57 = vld [vmem:[#allocation6 + $0x428] sm:$0xf0]  ;;  %3899 = vmatpush.bf16.msrb.mxu0 %v8054_v47  ;;  %3879 = vmatpush.bf16.msra.mxu2 %v7350_v50 }
 0x18f   :  { %v10208_v59 = vld [vmem:[#allocation6 + $0x60c] sm:$0xf]  ;;  %v7318_v6 = vor.u32 %v10144_v56, %v7315_v57  ;;  %3868 = vmatmul.bf16.vlgmr.msra.gmra.mxu1 %v11152_v32  ;;  %v11202_v47 = vadd.f32 %v3635_v39, %v3623_v36  ;;  %v3661_v56 = vpop.f32.mrf.mxu1 }
 0x190   :  { %v7571_v61 = vld [vmem:[#allocation6 + $0x628] sm:$0xf0]  ;;  %3912 = vmatpush.bf16.msrb.mxu1 %v8310_v49  ;;  %3892 = vmatpush.bf16.msra.mxu3 %v7606_v55  ;;  %v3649_v55 = vadd.f32 %v3648_v51, %v960_v40  ;;  %v7033_v40 = vld [vmem:[#allocation6 + $0x1d0] sm:$0xf] }
 0x191   :  { %v10456_v62 = vld [vmem:[#allocation6 + $0xdcc] sm:$0xf]  ;;  %v7574_v12 = vor.u32 %v10208_v59, %v7571_v61 }
 0x192   :  { %v8563_v63 = vld [vmem:[#allocation6 + $0xde8] sm:$0xf0]  ;;  %3900 = vmatpush.bf16.msrb.mxu0 %v8022_v2  ;;  %3880 = vmatpush.bf16.msra.mxu2 %v7318_v6  ;;  %v3662_v1 = vadd.f32 %v3661_v56, %v3649_v55  ;;  %v3637_v11 = vpop.f32.mrf.mxu3  ;;  %v7001_v56 = vld [vmem:[#allocation6 + $0x190] sm:$0xf] }
 0x193   :  { %v10520_v38 = vld [vmem:[#allocation6 + $0xfcc] sm:$0xf]  ;;  %v8566_v14 = vor.u32 %v10456_v62, %v8563_v63  ;;  %v7801_v11 = vld [vmem:[#allocation6 + $0x7d0] sm:$0xf] }
 0x194   :  { %v8819_v3 = vld [vmem:[#allocation6 + $0xfe8] sm:$0xf0]  ;;  %3913 = vmatpush.bf16.msrb.mxu1 %v8278_v4  ;;  %3893 = vmatpush.bf16.msra.mxu3 %v7574_v12  ;;  %v3624_v4 = vpop.f32.mrf.mxu2 }
 0x195   :  { %v10312_v8 = vld [vmem:[#allocation6 + $0x94c] sm:$0xf]  ;;  %v8822_v18 = vor.u32 %v10520_v38, %v8819_v3  ;;  %3881 = vmatmul.bf16.vlgmr.msra.gmra.mxu2 %v11158_v58 }
 0x196   :  { %v7987_v10 = vld [vmem:[#allocation6 + $0x968] sm:$0xf0]  ;;  %3925 = vmatpush.bf16.msrb.mxu2 %v8566_v14 }
 0x197   :  { %v10376_v15 = vld [vmem:[#allocation6 + $0xb4c] sm:$0xf]  ;;  %v7990_v21 = vor.u32 %v10312_v8, %v7987_v10  ;;  %3894 = vmatmul.bf16.vlgmr.msra.gmra.mxu3 %v11160_v0 }
 0x198   :  { %v8243_v16 = vld [vmem:[#allocation6 + $0xb68] sm:$0xf0]  ;;  %3938 = vmatpush.bf16.msrb.mxu3 %v8822_v18 }
 0x199   :  { %v10448_v19 = vld [vmem:[#allocation6 + $0xd8c] sm:$0xf]  ;;  %v8246_v24 = vor.u32 %v10376_v15, %v8243_v16  ;;  %3901 = vmatpush.bf16.msrb.mxu0 %v7990_v21 }
 0x19a   :  { %v8531_v20 = vld [vmem:[#allocation6 + $0xda8] sm:$0xf0] }
 0x19b   :  { %v10512_v22 = vld [vmem:[#allocation6 + $0xf8c] sm:$0xf]  ;;  %v8534_v28 = vor.u32 %v10448_v19, %v8531_v20  ;;  %3914 = vmatpush.bf16.msrb.mxu1 %v8246_v24 }
 0x19c   :  { %v8787_v23 = vld [vmem:[#allocation6 + $0xfa8] sm:$0xf0] }
 0x19d   :  { %v10304_v25 = vld [vmem:[#allocation6 + $0x90c] sm:$0xf]  ;;  %v8790_v33 = vor.u32 %v10512_v22, %v8787_v23  ;;  %3926 = vmatpush.bf16.msrb.mxu2 %v8534_v28  ;;  %v3650_v22 = vpop.f32.mrf.mxu0 }
 0x19e   :  { %v7955_v26 = vld [vmem:[#allocation6 + $0x928] sm:$0xf0] }
 0x19f   :  { %v10368_v29 = vld [vmem:[#allocation6 + $0xb0c] sm:$0xf]  ;;  %v7958_v41 = vor.u32 %v10304_v25, %v7955_v26  ;;  %3939 = vmatpush.bf16.msrb.mxu3 %v8790_v33  ;;  %v3663_v26 = vpop.f32.mrf.mxu1 }
 0x1a0   :  { %v8211_v30 = vld [vmem:[#allocation6 + $0xb28] sm:$0xf0]  ;;  %v10197_v26 = vld [vmem:[#allocation6 + $0x5ac] sm:$0xf0] }
 0x1a1   :  { %v10440_v34 = vld [vmem:[#allocation6 + $0xd4c] sm:$0xf]  ;;  %v8214_v44 = vor.u32 %v10368_v29, %v8211_v30  ;;  %3902 = vmatpush.bf16.msrb.mxu0 %v7958_v41  ;;  %v10077_v41 = vld [vmem:[#allocation6 + $0x1ec] sm:$0xf0] }
 0x1a2   :  { %v8499_v35 = vld [vmem:[#allocation6 + $0xd68] sm:$0xf0]  ;;  %v7034_v55 = vor.u32 %v10077_v41, %v7033_v40  ;;  %v7481_v41 = vld [vmem:[#allocation6 + $0x550] sm:$0xf] }
 0x1a3   :  { %v10504_v42 = vld [vmem:[#allocation6 + $0xf4c] sm:$0xf]  ;;  %v8502_v48 = vor.u32 %v10440_v34, %v8499_v35  ;;  %3915 = vmatpush.bf16.msrb.mxu1 %v8214_v44  ;;  %v10141_v44 = vld [vmem:[#allocation6 + $0x3ec] sm:$0xf0] }
 0x1a4   :  { %v8755_v43 = vld [vmem:[#allocation6 + $0xf68] sm:$0xf0] }
 0x1a5   :  { %v10296_v46 = vld [vmem:[#allocation6 + $0x8cc] sm:$0xf]  ;;  %v8758_v52 = vor.u32 %v10504_v42, %v8755_v43  ;;  %3927 = vmatpush.bf16.msrb.mxu2 %v8502_v48  ;;  %v7289_v42 = vld [vmem:[#allocation6 + $0x3d0] sm:$0xf]  ;;  %v3674_v48 = vpop.f32.mrf.mxu2 }
 0x1a6   :  { %v7923_v9 = vld [vmem:[#allocation6 + $0x8e8] sm:$0xf0] }
 0x1a7   :  { %v10360_v49 = vld [vmem:[#allocation6 + $0xacc] sm:$0xf]  ;;  %v7926_v57 = vor.u32 %v10296_v46, %v7923_v9  ;;  %3940 = vmatpush.bf16.msrb.mxu3 %v8758_v52 }
 0x1a8   :  { %v8179_v50 = vld [vmem:[#allocation6 + $0xae8] sm:$0xf0] }
 0x1a9   :  { %v10432_v53 = vld [vmem:[#allocation6 + $0xd0c] sm:$0xf]  ;;  %v8182_v61 = vor.u32 %v10360_v49, %v8179_v50  ;;  %3903 = vmatpush.bf16.msrb.mxu0 %v7926_v57  ;;  %v3687_v49 = vpop.f32.mrf.mxu3  ;;  %v7290_v57 = vor.u32 %v10141_v44, %v7289_v42  ;;  %v10189_v42 = vld [vmem:[#allocation6 + $0x56c] sm:$0xf0] }
 0x1aa   :  { %v8467_v54 = vld [vmem:[#allocation6 + $0xd28] sm:$0xf0]  ;;  %v7737_v44 = vld [vmem:[#allocation6 + $0x750] sm:$0xf] }
 0x1ab   :  { %v10496_v59 = vld [vmem:[#allocation6 + $0xf0c] sm:$0xf]  ;;  %v8470_v2 = vor.u32 %v10432_v53, %v8467_v54  ;;  %3916 = vmatpush.bf16.msrb.mxu1 %v8182_v61  ;;  %v3675_v53 = vadd.f32 %v3674_v48, %v3662_v1  ;;  %v7257_v61 = vld [vmem:[#allocation6 + $0x390] sm:$0xf] }
 0x1ac   :  { %v8723_v60 = vld [vmem:[#allocation6 + $0xf28] sm:$0xf0]  ;;  %v7545_v1 = vld [vmem:[#allocation6 + $0x5d0] sm:$0xf] }
 0x1ad   :  { %v10288_v62 = vld [vmem:[#allocation6 + $0x88c] sm:$0xf]  ;;  %v8726_v6 = vor.u32 %v10496_v59, %v8723_v60  ;;  %3928 = vmatpush.bf16.msrb.mxu2 %v8470_v2  ;;  %v10069_v60 = vld [vmem:[#allocation6 + $0x1ac] sm:$0xf0]  ;;  %v3676_v22 = vpop.f32.mrf.mxu2 }
 0x1ae   :  { %v7891_v63 = vld [vmem:[#allocation6 + $0x8a8] sm:$0xf0]  ;;  %v6905_v48 = vld [vmem:[#allocation6 + $0xd0] sm:$0xf] }
 0x1af   :  { %v10352_v38 = vld [vmem:[#allocation6 + $0xa8c] sm:$0xf]  ;;  %v7894_v12 = vor.u32 %v10288_v62, %v7891_v63  ;;  %3941 = vmatpush.bf16.msrb.mxu3 %v8726_v6  ;;  %v10133_v62 = vld [vmem:[#allocation6 + $0x3ac] sm:$0xf0]  ;;  %v11204_v63 = vadd.f32 %v3687_v49, %v3675_v53  ;;  %v3700_v53 = vpop.f32.mrf.mxu0 }
 0x1b0   :  { %v8147_v3 = vld [vmem:[#allocation6 + $0xaa8] sm:$0xf0]  ;;  %v10045_v49 = vld [vmem:[#allocation6 + $0xec] sm:$0xf0] }
 0x1b1   :  { %v10424_v8 = vld [vmem:[#allocation6 + $0xccc] sm:$0xf]  ;;  %v8150_v16 = vor.u32 %v10352_v38, %v8147_v3  ;;  %3904 = vmatpush.bf16.msrb.mxu0 %v7894_v12  ;;  %v10269_v12 = vld [vmem:[#allocation6 + $0x7ec] sm:$0xf0] }
 0x1b2   :  { %v8435_v10 = vld [vmem:[#allocation6 + $0xce8] sm:$0xf0] }
 0x1b3   :  { %v10488_v14 = vld [vmem:[#allocation6 + $0xecc] sm:$0xf]  ;;  %v8438_v19 = vor.u32 %v10424_v8, %v8435_v10  ;;  %3917 = vmatpush.bf16.msrb.mxu1 %v8150_v16  ;;  %v10205_v8 = vld [vmem:[#allocation6 + $0x5ec] sm:$0xf0]  ;;  %v7002_v10 = vor.u32 %v10069_v60, %v7001_v56  ;;  %v6906_v60 = vor.u32 %v10045_v49, %v6905_v48 }
 0x1b4   :  { %v8691_v15 = vld [vmem:[#allocation6 + $0xee8] sm:$0xf0]  ;;  %v6969_v16 = vld [vmem:[#allocation6 + $0x150] sm:$0xf] }
 0x1b5   :  { %v10280_v17 = vld [vmem:[#allocation6 + $0x84c] sm:$0xf]  ;;  %v8694_v23 = vor.u32 %v10488_v14, %v8691_v15  ;;  %3929 = vmatpush.bf16.msrb.mxu2 %v8438_v19  ;;  %v7258_v14 = vor.u32 %v10133_v62, %v7257_v61  ;;  %v7546_v19 = vor.u32 %v10205_v8, %v7545_v1  ;;  %v10181_v56 = vld [vmem:[#allocation6 + $0x52c] sm:$0xf0] }
 0x1b6   :  { %v7859_v18 = vld [vmem:[#allocation6 + $0x868] sm:$0xf0]  ;;  %v7705_v61 = vld [vmem:[#allocation6 + $0x710] sm:$0xf] }
 0x1b7   :  { %v10344_v20 = vld [vmem:[#allocation6 + $0xa4c] sm:$0xf]  ;;  %v7862_v28 = vor.u32 %v10280_v17, %v7859_v18  ;;  %3942 = vmatpush.bf16.msrb.mxu3 %v8694_v23  ;;  %v10061_v17 = vld [vmem:[#allocation6 + $0x16c] sm:$0xf0]  ;;  %v3689_v23 = vpop.f32.mrf.mxu3  ;;  %v3702_v22 = vpop.f32.mrf.mxu0 }
 0x1b8   :  { %v8115_v21 = vld [vmem:[#allocation6 + $0xa68] sm:$0xf0]  ;;  %v10245_v62 = vld [vmem:[#allocation6 + $0x72c] sm:$0xf0] }
 0x1b9   :  { %v10416_v24 = vld [vmem:[#allocation6 + $0xc8c] sm:$0xf]  ;;  %v8118_v33 = vor.u32 %v10344_v20, %v8115_v21  ;;  %3905 = vmatpush.bf16.msrb.mxu0 %v7862_v28  ;;  %v7225_v20 = vld [vmem:[#allocation6 + $0x350] sm:$0xf]  ;;  %v6970_v28 = vor.u32 %v10061_v17, %v6969_v16 }
 0x1ba   :  { %v8403_v25 = vld [vmem:[#allocation6 + $0xca8] sm:$0xf0]  ;;  %v10125_v21 = vld [vmem:[#allocation6 + $0x36c] sm:$0xf0] }
 0x1bb   :  { %v10480_v29 = vld [vmem:[#allocation6 + $0xe8c] sm:$0xf]  ;;  %v8406_v39 = vor.u32 %v10416_v24, %v8403_v25  ;;  %3918 = vmatpush.bf16.msrb.mxu1 %v8118_v33  ;;  %v7802_v24 = vor.u32 %v10269_v12, %v7801_v11  ;;  %v7513_v25 = vld [vmem:[#allocation6 + $0x590] sm:$0xf] }
 0x1bc   :  { %v8659_v30 = vld [vmem:[#allocation6 + $0xea8] sm:$0xf0]  ;;  %v6937_v33 = vld [vmem:[#allocation6 + $0x110] sm:$0xf] }
 0x1bd   :  { %v10272_v31 = vld [vmem:[#allocation6 + $0x80c] sm:$0xf]  ;;  %v8662_v43 = vor.u32 %v10480_v29, %v8659_v30  ;;  %3930 = vmatpush.bf16.msrb.mxu2 %v8406_v39  ;;  %v7769_v29 = vld [vmem:[#allocation6 + $0x790] sm:$0xf] }
 0x1be   :  { %v7827_v34 = vld [vmem:[#allocation6 + $0x828] sm:$0xf0]  ;;  %v10261_v30 = vld [vmem:[#allocation6 + $0x7ac] sm:$0xf0] }
 0x1bf   :  { %v10336_v35 = vld [vmem:[#allocation6 + $0xa0c] sm:$0xf]  ;;  %v7830_v50 = vor.u32 %v10272_v31, %v7827_v34  ;;  %3943 = vmatpush.bf16.msrb.mxu3 %v8662_v43  ;;  %v7226_v31 = vor.u32 %v10125_v21, %v7225_v20  ;;  %v10053_v34 = vld [vmem:[#allocation6 + $0x12c] sm:$0xf0]  ;;  %v7770_v40 = vor.u32 %v10261_v30, %v7769_v29 }
 0x1c0   :  { %v8083_v36 = vld [vmem:[#allocation6 + $0xa28] sm:$0xf0]  ;;  %v10117_v39 = vld [vmem:[#allocation6 + $0x32c] sm:$0xf0]  ;;  %v6938_v43 = vor.u32 %v10053_v34, %v6937_v33 }
 0x1c1   :  { %v10408_v46 = vld [vmem:[#allocation6 + $0xc4c] sm:$0xf]  ;;  %v8086_v54 = vor.u32 %v10336_v35, %v8083_v36  ;;  %3906 = vmatpush.bf16.msrb.mxu0 %v7830_v50  ;;  %v7514_v35 = vor.u32 %v10197_v26, %v7513_v25  ;;  %v7193_v36 = vld [vmem:[#allocation6 + $0x310] sm:$0xf]  ;;  %v7482_v50 = vor.u32 %v10189_v42, %v7481_v41 }
 0x1c2   :  { %v8371_v9 = vld [vmem:[#allocation6 + $0xc68] sm:$0xf0]  ;;  %v7129_v1 = vld [vmem:[#allocation6 + $0x290] sm:$0xf] }
 0x1c3   :  { %v10472_v51 = vld [vmem:[#allocation6 + $0xe4c] sm:$0xf]  ;;  %v8374_v59 = vor.u32 %v10408_v46, %v8371_v9  ;;  %3919 = vmatpush.bf16.msrb.mxu1 %v8086_v54  ;;  %v10253_v46 = vld [vmem:[#allocation6 + $0x76c] sm:$0xf0]  ;;  %v7194_v9 = vor.u32 %v10117_v39, %v7193_v36 }
 0x1c4   :  { %v8627_v52 = vld [vmem:[#allocation6 + $0xe68] sm:$0xf0]  ;;  %3907 = vmatmul.bf16.vlgmr.msrb.gmra.mxu0 %v11166_v37  ;;  %v7738_v54 = vor.u32 %v10253_v46, %v7737_v44  ;;  %v10101_v8 = vld [vmem:[#allocation6 + $0x2ac] sm:$0xf0] }
 0x1c5   :  { %v8630_v2 = vor.u32 %v10472_v51, %v8627_v52  ;;  %v10400_v38 = vld [vmem:[#allocation6 + $0xc0c] sm:$0xf]  ;;  %3951 = vmatpush.bf16.msra.mxu0 %v7034_v55  ;;  %3931 = vmatpush.bf16.msrb.mxu2 %v8374_v59  ;;  %v7161_v51 = vld [vmem:[#allocation6 + $0x2d0] sm:$0xf]  ;;  %v3713_v59 = vpop.f32.mrf.mxu1  ;;  %v7130_v16 = vor.u32 %v10101_v8, %v7129_v1 }
 0x1c6   :  { %v8339_v3 = vld [vmem:[#allocation6 + $0xc28] sm:$0xf0]  ;;  %3920 = vmatmul.bf16.vlgmr.msrb.gmra.mxu1 %v11168_v45  ;;  %v10109_v52 = vld [vmem:[#allocation6 + $0x2ec] sm:$0xf0] }
 0x1c7   :  { %v10464_v4 = vld [vmem:[#allocation6 + $0xe0c] sm:$0xf]  ;;  %3964 = vmatpush.bf16.msra.mxu1 %v7290_v57  ;;  %v8342_v15 = vor.u32 %v10400_v38, %v8339_v3  ;;  %3944 = vmatpush.bf16.msrb.mxu3 %v8630_v2  ;;  %v7449_v55 = vld [vmem:[#allocation6 + $0x510] sm:$0xf]  ;;  %v3701_v57 = vadd.f32 %v3700_v53, %v11204_v63  ;;  %v7162_v2 = vor.u32 %v10109_v52, %v7161_v51 }
 0x1c8   :  { %v8595_v6 = vld [vmem:[#allocation6 + $0xe28] sm:$0xf0]  ;;  %v6873_v38 = vld [vmem:[#allocation6 + $0x90] sm:$0xf] }
 0x1c9   :  { %v8598_v18 = vor.u32 %v10464_v4, %v8595_v6  ;;  %3952 = vmatpush.bf16.msra.mxu0 %v7002_v10  ;;  %3932 = vmatpush.bf16.msrb.mxu2 %v8342_v15  ;;  %v10037_v3 = vld [vmem:[#allocation6 + $0xac] sm:$0xf0]  ;;  %v3714_v4 = vadd.f32 %v3713_v59, %v3701_v57  ;;  %v7450_v6 = vor.u32 %v10181_v56, %v7449_v55 }
 0x1ca   :  { %v7706_v10 = vor.u32 %v10245_v62, %v7705_v61  ;;  %v7417_v11 = vld [vmem:[#allocation6 + $0x4d0] sm:$0xf]  ;;  %v6874_v63 = vor.u32 %v10037_v3, %v6873_v38 }
 0x1cb   :  { %3965 = vmatpush.bf16.msra.mxu1 %v7258_v14  ;;  %3945 = vmatpush.bf16.msrb.mxu3 %v8598_v18  ;;  %v10173_v12 = vld [vmem:[#allocation6 + $0x4ec] sm:$0xf0] }
 0x1cc   :  { %3933 = vmatmul.bf16.vlgmr.msrb.gmra.mxu2 %v11172_v7  ;;  %v7673_v14 = vld [vmem:[#allocation6 + $0x6d0] sm:$0xf] }
 0x1cd   :  { %3977 = vmatpush.bf16.msra.mxu2 %v7546_v19  ;;  %3953 = vmatpush.bf16.msra.mxu0 %v6970_v28  ;;  %v10237_v15 = vld [vmem:[#allocation6 + $0x6ec] sm:$0xf0]  ;;  %v7418_v19 = vor.u32 %v10173_v12, %v7417_v11  ;;  %v3715_v26 = vpop.f32.mrf.mxu1 }
 0x1ce   :  { %3946 = vmatmul.bf16.vlgmr.msrb.gmra.mxu3 %v11174_v13  ;;  %v6841_v17 = vld [vmem:[#allocation6 + $0x50] sm:$0xf]  ;;  %v7674_v23 = vor.u32 %v10237_v15, %v7673_v14 }
 0x1cf   :  { %3990 = vmatpush.bf16.msra.mxu3 %v7802_v24  ;;  %3966 = vmatpush.bf16.msra.mxu1 %v7226_v31  ;;  %v10029_v18 = vld [vmem:[#allocation6 + $0x6c] sm:$0xf0] }
 0x1d0   :  { %v7097_v20 = vld [vmem:[#allocation6 + $0x250] sm:$0xf]  ;;  %v6842_v28 = vor.u32 %v10029_v18, %v6841_v17 }
 0x1d1   :  { %3978 = vmatpush.bf16.msra.mxu2 %v7514_v35  ;;  %3954 = vmatpush.bf16.msra.mxu0 %v6938_v43  ;;  %v10093_v21 = vld [vmem:[#allocation6 + $0x26c] sm:$0xf0]  ;;  %v3726_v43 = vpop.f32.mrf.mxu2 }
 0x1d2   :  { %v7385_v24 = vld [vmem:[#allocation6 + $0x490] sm:$0xf]  ;;  %v7098_v33 = vor.u32 %v10093_v21, %v7097_v20  ;;  %v3727_v49 = vadd.f32 %v3726_v43, %v3714_v4  ;;  %v961_v43 = vperm.slane %v11190_v5, 2 }
 0x1d3   :  { %3991 = vmatpush.bf16.msra.mxu3 %v7770_v40  ;;  %3967 = vmatpush.bf16.msra.mxu1 %v7194_v9  ;;  %v10165_v25 = vld [vmem:[#allocation6 + $0x4ac] sm:$0xf0] }
 0x1d4   :  { %v7641_v29 = vld [vmem:[#allocation6 + $0x690] sm:$0xf]  ;;  %v7386_v39 = vor.u32 %v10165_v25, %v7385_v24 }
 0x1d5   :  { %3979 = vmatpush.bf16.msra.mxu2 %v7482_v50  ;;  %3955 = vmatpush.bf16.msra.mxu0 %v6906_v60  ;;  %v10229_v30 = vld [vmem:[#allocation6 + $0x6ac] sm:$0xf0]  ;;  %v3739_v50 = vpop.f32.mrf.mxu3  ;;  %v3765_v5 = vpop.f32.mrf.mxu1 }
 0x1d6   :  { %v6809_v31 = vld [vmem:[#allocation6 + $0x10] sm:$0xf]  ;;  %v7642_v44 = vor.u32 %v10229_v30, %v7641_v29  ;;  %v11211_v57 = vadd.f32 %v3739_v50, %v3727_v49 }
 0x1d7   :  { %3992 = vmatpush.bf16.msra.mxu3 %v7738_v54  ;;  %3968 = vmatpush.bf16.msra.mxu1 %v7162_v2  ;;  %v10021_v34 = vld [vmem:[#allocation6 + $0x2c] sm:$0xf0] }
 0x1d8   :  { %v7065_v35 = vld [vmem:[#allocation6 + $0x210] sm:$0xf]  ;;  %v6810_v51 = vor.u32 %v10021_v34, %v6809_v31 }
 0x1d9   :  { %3980 = vmatpush.bf16.msra.mxu2 %v7450_v6  ;;  %3956 = vmatpush.bf16.msra.mxu0 %v6874_v63  ;;  %v10085_v36 = vld [vmem:[#allocation6 + $0x22c] sm:$0xf0]  ;;  %v3728_v18 = vpop.f32.mrf.mxu2 }
 0x1da   :  { %v8057_v40 = vld [vmem:[#allocation6 + $0x9d0] sm:$0xf]  ;;  %v7066_v54 = vor.u32 %v10085_v36, %v7065_v35 }
 0x1db   :  { %3993 = vmatpush.bf16.msra.mxu3 %v7706_v10  ;;  %3969 = vmatpush.bf16.msra.mxu1 %v7130_v16  ;;  %v10333_v41 = vld [vmem:[#allocation6 + $0x9ec] sm:$0xf0] }
 0x1dc   :  { %v8313_v42 = vld [vmem:[#allocation6 + $0xbd0] sm:$0xf]  ;;  %v8058_v55 = vor.u32 %v10333_v41, %v8057_v40 }
 0x1dd   :  { %3981 = vmatpush.bf16.msra.mxu2 %v7418_v19  ;;  %v10397_v46 = vld [vmem:[#allocation6 + $0xbec] sm:$0xf0]  ;;  %3957 = vmatpush.bf16.msra.mxu0 %v6842_v28 }
 0x1de   :  { %v7353_v9 = vld [vmem:[#allocation6 + $0x450] sm:$0xf]  ;;  %v8314_v59 = vor.u32 %v10397_v46, %v8313_v42 }
 0x1df   :  { %3994 = vmatpush.bf16.msra.mxu3 %v7674_v23  ;;  %v10157_v48 = vld [vmem:[#allocation6 + $0x46c] sm:$0xf0]  ;;  %3970 = vmatpush.bf16.msra.mxu1 %v7098_v33  ;;  %v3741_v23 = vpop.f32.mrf.mxu3 }
 0x1e0   :  { %v7609_v52 = vld [vmem:[#allocation6 + $0x650] sm:$0xf]  ;;  %v7354_v60 = vor.u32 %v10157_v48, %v7353_v9 }
 0x1e1   :  { %v10221_v53 = vld [vmem:[#allocation6 + $0x66c] sm:$0xf0]  ;;  %3982 = vmatpush.bf16.msra.mxu2 %v7386_v39  ;;  %3958 = vmatpush.bf16.msra.mxu0 %v6810_v51 }
 0x1e2   :  { %v8025_v56 = vld [vmem:[#allocation6 + $0x990] sm:$0xf]  ;;  %v7610_v38 = vor.u32 %v10221_v53, %v7609_v52 }
 0x1e3   :  { %v10325_v61 = vld [vmem:[#allocation6 + $0x9ac] sm:$0xf0]  ;;  %3995 = vmatpush.bf16.msra.mxu3 %v7642_v44  ;;  %3971 = vmatpush.bf16.msra.mxu1 %v7066_v54  ;;  %v3752_v54 = vpop.f32.mrf.mxu0 }
 0x1e4   :  { %v8281_v62 = vld [vmem:[#allocation6 + $0xb90] sm:$0xf]  ;;  %v8026_v11 = vor.u32 %v10325_v61, %v8025_v56  ;;  %3959 = vmatmul.bf16.vlgmr.msra.gmra.mxu0 %v11150_v27 }
 0x1e5   :  { %v10389_v2 = vld [vmem:[#allocation6 + $0xbac] sm:$0xf0]  ;;  %4003 = vmatpush.bf16.msrb.mxu0 %v8058_v55  ;;  %3983 = vmatpush.bf16.msra.mxu2 %v7354_v60  ;;  %v3753_v60 = vadd.f32 %v3752_v54, %v961_v43  ;;  %v10137_v43 = vld [vmem:[#allocation6 + $0x3d4] sm:$0xf] }
 0x1e6   :  { %v7321_v3 = vld [vmem:[#allocation6 + $0x410] sm:$0xf]  ;;  %v8282_v14 = vor.u32 %v10389_v2, %v8281_v62  ;;  %3972 = vmatmul.bf16.vlgmr.msra.gmra.mxu1 %v11152_v32 }
 0x1e7   :  { %v10149_v4 = vld [vmem:[#allocation6 + $0x42c] sm:$0xf0]  ;;  %4016 = vmatpush.bf16.msrb.mxu1 %v8314_v59  ;;  %3996 = vmatpush.bf16.msra.mxu3 %v7610_v38 }
 0x1e8   :  { %v7577_v6 = vld [vmem:[#allocation6 + $0x610] sm:$0xf]  ;;  %v7322_v15 = vor.u32 %v10149_v4, %v7321_v3 }
 0x1e9   :  { %v10213_v1 = vld [vmem:[#allocation6 + $0x62c] sm:$0xf0]  ;;  %4004 = vmatpush.bf16.msrb.mxu0 %v8026_v11 }
 0x1ea   :  { %v8569_v8 = vld [vmem:[#allocation6 + $0xdd0] sm:$0xf]  ;;  %v7578_v19 = vor.u32 %v10213_v1, %v7577_v6  ;;  %3984 = vmatpush.bf16.msra.mxu2 %v7322_v15  ;;  %v3766_v6 = vadd.f32 %v3765_v5, %v3753_v60 }
 0x1eb   :  { %v10461_v10 = vld [vmem:[#allocation6 + $0xdec] sm:$0xf0]  ;;  %4017 = vmatpush.bf16.msrb.mxu1 %v8282_v14  ;;  %v3754_v23 = vpop.f32.mrf.mxu0 }
 0x1ec   :  { %v8825_v12 = vld [vmem:[#allocation6 + $0xfd0] sm:$0xf]  ;;  %v8570_v20 = vor.u32 %v10461_v10, %v8569_v8  ;;  %3997 = vmatpush.bf16.msra.mxu3 %v7578_v19  ;;  %v7227_v23 = vld [vmem:[#allocation6 + $0x370] sm:$0xf0] }
 0x1ed   :  { %v10525_v63 = vld [vmem:[#allocation6 + $0xfec] sm:$0xf0]  ;;  %3985 = vmatmul.bf16.vlgmr.msra.gmra.mxu2 %v11158_v58 }
 0x1ee   :  { %v7993_v16 = vld [vmem:[#allocation6 + $0x950] sm:$0xf]  ;;  %v8826_v24 = vor.u32 %v10525_v63, %v8825_v12  ;;  %4029 = vmatpush.bf16.msrb.mxu2 %v8570_v20 }
 0x1ef   :  { %v10317_v17 = vld [vmem:[#allocation6 + $0x96c] sm:$0xf0]  ;;  %3998 = vmatmul.bf16.vlgmr.msra.gmra.mxu3 %v11160_v0 }
 0x1f0   :  { %v8249_v21 = vld [vmem:[#allocation6 + $0xb50] sm:$0xf]  ;;  %v7994_v28 = vor.u32 %v10317_v17, %v7993_v16  ;;  %4042 = vmatpush.bf16.msrb.mxu3 %v8826_v24 }
 0x1f1   :  { %v10381_v22 = vld [vmem:[#allocation6 + $0xb6c] sm:$0xf0] }
 0x1f2   :  { %v8537_v25 = vld [vmem:[#allocation6 + $0xd90] sm:$0xf]  ;;  %v8250_v31 = vor.u32 %v10381_v22, %v8249_v21  ;;  %4005 = vmatpush.bf16.msrb.mxu0 %v7994_v28  ;;  %v3767_v28 = vpop.f32.mrf.mxu1 }
 0x1f3   :  { %v10453_v26 = vld [vmem:[#allocation6 + $0xdac] sm:$0xf0]  ;;  %v7515_v28 = vld [vmem:[#allocation6 + $0x5b0] sm:$0xf0] }
 0x1f4   :  { %v8793_v29 = vld [vmem:[#allocation6 + $0xf90] sm:$0xf]  ;;  %v8538_v35 = vor.u32 %v10453_v26, %v8537_v25  ;;  %4018 = vmatpush.bf16.msrb.mxu1 %v8250_v31 }
 0x1f5   :  { %v10517_v30 = vld [vmem:[#allocation6 + $0xfac] sm:$0xf0] }
 0x1f6   :  { %v7961_v33 = vld [vmem:[#allocation6 + $0x910] sm:$0xf]  ;;  %v8794_v40 = vor.u32 %v10517_v30, %v8793_v29  ;;  %4030 = vmatpush.bf16.msrb.mxu2 %v8538_v35 }
 0x1f7   :  { %v10309_v34 = vld [vmem:[#allocation6 + $0x92c] sm:$0xf0] }
 0x1f8   :  { %v8217_v36 = vld [vmem:[#allocation6 + $0xb10] sm:$0xf]  ;;  %v7962_v44 = vor.u32 %v10309_v34, %v7961_v33  ;;  %4043 = vmatpush.bf16.msrb.mxu3 %v8794_v40 }
 0x1f9   :  { %v10373_v39 = vld [vmem:[#allocation6 + $0xb2c] sm:$0xf0] }
 0x1fa   :  { %v8505_v41 = vld [vmem:[#allocation6 + $0xd50] sm:$0xf]  ;;  %v8218_v48 = vor.u32 %v10373_v39, %v8217_v36  ;;  %4006 = vmatpush.bf16.msrb.mxu0 %v7962_v44  ;;  %v3778_v44 = vpop.f32.mrf.mxu2 }
 0x1fb   :  { %v10445_v42 = vld [vmem:[#allocation6 + $0xd6c] sm:$0xf0] }
 0x1fc   :  { %v8761_v46 = vld [vmem:[#allocation6 + $0xf50] sm:$0xf]  ;;  %v8506_v51 = vor.u32 %v10445_v42, %v8505_v41  ;;  %4019 = vmatpush.bf16.msrb.mxu1 %v8218_v48  ;;  %v10073_v41 = vld [vmem:[#allocation6 + $0x1d4] sm:$0xf] }
 0x1fd   :  { %v10509_v9 = vld [vmem:[#allocation6 + $0xf6c] sm:$0xf0]  ;;  %v7035_v42 = vld [vmem:[#allocation6 + $0x1f0] sm:$0xf0] }
 0x1fe   :  { %v7929_v49 = vld [vmem:[#allocation6 + $0x8d0] sm:$0xf]  ;;  %v8762_v55 = vor.u32 %v10509_v9, %v8761_v46  ;;  %4031 = vmatpush.bf16.msrb.mxu2 %v8506_v51  ;;  %v7291_v9 = vld [vmem:[#allocation6 + $0x3f0] sm:$0xf0]  ;;  %v3791_v51 = vpop.f32.mrf.mxu3 }
 0x1ff   :  { %v10301_v50 = vld [vmem:[#allocation6 + $0x8ec] sm:$0xf0]  ;;  %v7294_v5 = vor.u32 %v10137_v43, %v7291_v9  ;;  %v7483_v43 = vld [vmem:[#allocation6 + $0x570] sm:$0xf0] }
 0x200   :  { %v8185_v52 = vld [vmem:[#allocation6 + $0xad0] sm:$0xf]  ;;  %v7930_v61 = vor.u32 %v10301_v50, %v7929_v49  ;;  %4044 = vmatpush.bf16.msrb.mxu3 %v8762_v55  ;;  %v3779_v50 = vadd.f32 %v3778_v44, %v3766_v6  ;;  %v7739_v9 = vld [vmem:[#allocation6 + $0x770] sm:$0xf0] }
 0x201   :  { %v10365_v53 = vld [vmem:[#allocation6 + $0xaec] sm:$0xf0] }
 0x202   :  { %v8473_v56 = vld [vmem:[#allocation6 + $0xd10] sm:$0xf]  ;;  %v8186_v38 = vor.u32 %v10365_v53, %v8185_v52  ;;  %4007 = vmatpush.bf16.msrb.mxu0 %v7930_v61  ;;  %v11218_v60 = vadd.f32 %v3791_v51, %v3779_v50  ;;  %v6907_v50 = vld [vmem:[#allocation6 + $0xf0] sm:$0xf0] }
 0x203   :  { %v10437_v59 = vld [vmem:[#allocation6 + $0xd2c] sm:$0xf0] }
 0x204   :  { %v8729_v62 = vld [vmem:[#allocation6 + $0xf10] sm:$0xf]  ;;  %v8474_v1 = vor.u32 %v10437_v59, %v8473_v56  ;;  %4020 = vmatpush.bf16.msrb.mxu1 %v8186_v38  ;;  %v7038_v56 = vor.u32 %v10073_v41, %v7035_v42  ;;  %v10065_v59 = vld [vmem:[#allocation6 + $0x194] sm:$0xf] }
 0x205   :  { %v10501_v2 = vld [vmem:[#allocation6 + $0xf2c] sm:$0xf0]  ;;  %v7259_v38 = vld [vmem:[#allocation6 + $0x3b0] sm:$0xf0] }
 0x206   :  { %v7897_v3 = vld [vmem:[#allocation6 + $0x890] sm:$0xf]  ;;  %v8730_v11 = vor.u32 %v10501_v2, %v8729_v62  ;;  %4032 = vmatpush.bf16.msrb.mxu2 %v8474_v1  ;;  %v7003_v62 = vld [vmem:[#allocation6 + $0x1b0] sm:$0xf0] }
 0x207   :  { %v10293_v4 = vld [vmem:[#allocation6 + $0x8ac] sm:$0xf0]  ;;  %v10129_v2 = vld [vmem:[#allocation6 + $0x394] sm:$0xf] }
 0x208   :  { %v8153_v8 = vld [vmem:[#allocation6 + $0xa90] sm:$0xf]  ;;  %v7898_v14 = vor.u32 %v10293_v4, %v7897_v3  ;;  %4045 = vmatpush.bf16.msrb.mxu3 %v8730_v11  ;;  %v7547_v11 = vld [vmem:[#allocation6 + $0x5f0] sm:$0xf0] }
 0x209   :  { %v10357_v10 = vld [vmem:[#allocation6 + $0xaac] sm:$0xf0]  ;;  %v10185_v42 = vld [vmem:[#allocation6 + $0x554] sm:$0xf] }
 0x20a   :  { %v8441_v12 = vld [vmem:[#allocation6 + $0xcd0] sm:$0xf]  ;;  %v8154_v17 = vor.u32 %v10357_v10, %v8153_v8  ;;  %4008 = vmatpush.bf16.msrb.mxu0 %v7898_v14  ;;  %v10201_v10 = vld [vmem:[#allocation6 + $0x5d4] sm:$0xf]  ;;  %v7486_v51 = vor.u32 %v10185_v42, %v7483_v43 }
 0x20b   :  { %v10429_v63 = vld [vmem:[#allocation6 + $0xcec] sm:$0xf0]  ;;  %v7803_v14 = vld [vmem:[#allocation6 + $0x7f0] sm:$0xf0] }
 0x20c   :  { %v8697_v15 = vld [vmem:[#allocation6 + $0xed0] sm:$0xf]  ;;  %v8442_v20 = vor.u32 %v10429_v63, %v8441_v12  ;;  %4021 = vmatpush.bf16.msrb.mxu1 %v8154_v17  ;;  %v7006_v12 = vor.u32 %v10065_v59, %v7003_v62  ;;  %v10265_v63 = vld [vmem:[#allocation6 + $0x7d4] sm:$0xf] }
 0x20d   :  { %v10493_v16 = vld [vmem:[#allocation6 + $0xeec] sm:$0xf0]  ;;  %v10057_v17 = vld [vmem:[#allocation6 + $0x154] sm:$0xf] }
 0x20e   :  { %v7865_v18 = vld [vmem:[#allocation6 + $0x850] sm:$0xf]  ;;  %v8698_v24 = vor.u32 %v10493_v16, %v8697_v15  ;;  %4033 = vmatpush.bf16.msrb.mxu2 %v8442_v20  ;;  %v7262_v15 = vor.u32 %v10129_v2, %v7259_v38  ;;  %v7451_v59 = vld [vmem:[#allocation6 + $0x530] sm:$0xf0] }
 0x20f   :  { %v10285_v19 = vld [vmem:[#allocation6 + $0x86c] sm:$0xf0]  ;;  %v10241_v2 = vld [vmem:[#allocation6 + $0x714] sm:$0xf] }
 0x210   :  { %v8121_v21 = vld [vmem:[#allocation6 + $0xa50] sm:$0xf]  ;;  %v7866_v29 = vor.u32 %v10285_v19, %v7865_v18  ;;  %4046 = vmatpush.bf16.msrb.mxu3 %v8698_v24  ;;  %v6971_v18 = vld [vmem:[#allocation6 + $0x170] sm:$0xf0]  ;;  %v3780_v19 = vpop.f32.mrf.mxu2  ;;  %v3793_v24 = vpop.f32.mrf.mxu3 }
 0x211   :  { %v10349_v22 = vld [vmem:[#allocation6 + $0xa6c] sm:$0xf0]  ;;  %v7707_v38 = vld [vmem:[#allocation6 + $0x730] sm:$0xf0] }
 0x212   :  { %v8409_v25 = vld [vmem:[#allocation6 + $0xc90] sm:$0xf]  ;;  %v8122_v34 = vor.u32 %v10349_v22, %v8121_v21  ;;  %4009 = vmatpush.bf16.msrb.mxu0 %v7866_v29  ;;  %v7550_v21 = vor.u32 %v10201_v10, %v7547_v11  ;;  %v10121_v22 = vld [vmem:[#allocation6 + $0x354] sm:$0xf]  ;;  %v6974_v29 = vor.u32 %v10057_v17, %v6971_v18 }
 0x213   :  { %v10421_v26 = vld [vmem:[#allocation6 + $0xcac] sm:$0xf0]  ;;  %v10097_v10 = vld [vmem:[#allocation6 + $0x294] sm:$0xf] }
 0x214   :  { %v8665_v30 = vld [vmem:[#allocation6 + $0xe90] sm:$0xf]  ;;  %v8410_v40 = vor.u32 %v10421_v26, %v8409_v25  ;;  %4022 = vmatpush.bf16.msrb.mxu1 %v8122_v34  ;;  %v7806_v25 = vor.u32 %v10265_v63, %v7803_v14  ;;  %v10193_v26 = vld [vmem:[#allocation6 + $0x594] sm:$0xf] }
 0x215   :  { %v10485_v31 = vld [vmem:[#allocation6 + $0xeac] sm:$0xf0]  ;;  %v10049_v34 = vld [vmem:[#allocation6 + $0x114] sm:$0xf] }
 0x216   :  { %v7833_v33 = vld [vmem:[#allocation6 + $0x810] sm:$0xf]  ;;  %v8666_v46 = vor.u32 %v10485_v31, %v8665_v30  ;;  %4034 = vmatpush.bf16.msrb.mxu2 %v8410_v40  ;;  %v10257_v30 = vld [vmem:[#allocation6 + $0x794] sm:$0xf] }
 0x217   :  { %v10277_v35 = vld [vmem:[#allocation6 + $0x82c] sm:$0xf0]  ;;  %v7771_v31 = vld [vmem:[#allocation6 + $0x7b0] sm:$0xf0] }
 0x218   :  { %v8089_v36 = vld [vmem:[#allocation6 + $0xa10] sm:$0xf]  ;;  %v7834_v52 = vor.u32 %v10277_v35, %v7833_v33  ;;  %4047 = vmatpush.bf16.msrb.mxu3 %v8666_v46  ;;  %v7230_v33 = vor.u32 %v10121_v22, %v7227_v23  ;;  %v6939_v35 = vld [vmem:[#allocation6 + $0x130] sm:$0xf0]  ;;  %v7774_v41 = vor.u32 %v10257_v30, %v7771_v31 }
 0x219   :  { %v10341_v39 = vld [vmem:[#allocation6 + $0xa2c] sm:$0xf0]  ;;  %v7195_v40 = vld [vmem:[#allocation6 + $0x330] sm:$0xf0]  ;;  %v6942_v44 = vor.u32 %v10049_v34, %v6939_v35 }
 0x21a   :  { %v8377_v48 = vld [vmem:[#allocation6 + $0xc50] sm:$0xf]  ;;  %v8090_v55 = vor.u32 %v10341_v39, %v8089_v36  ;;  %4010 = vmatpush.bf16.msrb.mxu0 %v7834_v52  ;;  %v7518_v36 = vor.u32 %v10193_v26, %v7515_v28  ;;  %v10113_v39 = vld [vmem:[#allocation6 + $0x314] sm:$0xf] }
 0x21b   :  { %v10413_v49 = vld [vmem:[#allocation6 + $0xc6c] sm:$0xf0]  ;;  %v10249_v46 = vld [vmem:[#allocation6 + $0x754] sm:$0xf] }
 0x21c   :  { %v8633_v53 = vld [vmem:[#allocation6 + $0xe50] sm:$0xf]  ;;  %v8378_v61 = vor.u32 %v10413_v49, %v8377_v48  ;;  %4023 = vmatpush.bf16.msrb.mxu1 %v8090_v55  ;;  %v7198_v48 = vor.u32 %v10113_v39, %v7195_v40  ;;  %v10041_v49 = vld [vmem:[#allocation6 + $0xd4] sm:$0xf]  ;;  %v7742_v55 = vor.u32 %v10249_v46, %v7739_v9 }
 0x21d   :  { %v10477_v54 = vld [vmem:[#allocation6 + $0xe6c] sm:$0xf0]  ;;  %4011 = vmatmul.bf16.vlgmr.msrb.gmra.mxu0 %v11166_v37  ;;  %v10105_v52 = vld [vmem:[#allocation6 + $0x2d4] sm:$0xf]  ;;  %v6910_v62 = vor.u32 %v10041_v49, %v6907_v50 }
 0x21e   :  { %v8634_v3 = vor.u32 %v10477_v54, %v8633_v53  ;;  %v8345_v4 = vld [vmem:[#allocation6 + $0xc10] sm:$0xf]  ;;  %4055 = vmatpush.bf16.msra.mxu0 %v7038_v56  ;;  %4035 = vmatpush.bf16.msrb.mxu2 %v8378_v61  ;;  %v7163_v53 = vld [vmem:[#allocation6 + $0x2f0] sm:$0xf0]  ;;  %v3804_v54 = vpop.f32.mrf.mxu0  ;;  %v3817_v61 = vpop.f32.mrf.mxu1 }
 0x21f   :  { %v10405_v6 = vld [vmem:[#allocation6 + $0xc2c] sm:$0xf0]  ;;  %4024 = vmatmul.bf16.vlgmr.msrb.gmra.mxu1 %v11168_v45  ;;  %v10177_v56 = vld [vmem:[#allocation6 + $0x514] sm:$0xf] }
 0x220   :  { %v8601_v1 = vld [vmem:[#allocation6 + $0xe10] sm:$0xf]  ;;  %4068 = vmatpush.bf16.msra.mxu1 %v7294_v5  ;;  %v8346_v16 = vor.u32 %v10405_v6, %v8345_v4  ;;  %4048 = vmatpush.bf16.msrb.mxu3 %v8634_v3  ;;  %v3805_v5 = vadd.f32 %v3804_v54, %v11218_v60  ;;  %v7166_v3 = vor.u32 %v10105_v52, %v7163_v53  ;;  %v10033_v4 = vld [vmem:[#allocation6 + $0x94] sm:$0xf] }
 0x221   :  { %v10469_v8 = vld [vmem:[#allocation6 + $0xe2c] sm:$0xf0]  ;;  %v6875_v6 = vld [vmem:[#allocation6 + $0xb0] sm:$0xf0] }
 0x222   :  { %v8602_v20 = vor.u32 %v10469_v8, %v8601_v1  ;;  %4056 = vmatpush.bf16.msra.mxu0 %v7006_v12  ;;  %4036 = vmatpush.bf16.msrb.mxu2 %v8346_v16  ;;  %v3818_v1 = vadd.f32 %v3817_v61, %v3805_v5  ;;  %v7454_v8 = vor.u32 %v10177_v56, %v7451_v59  ;;  %v7131_v11 = vld [vmem:[#allocation6 + $0x2b0] sm:$0xf0] }
 0x223   :  { %v7710_v12 = vor.u32 %v10241_v2, %v7707_v38  ;;  %v10169_v63 = vld [vmem:[#allocation6 + $0x4d4] sm:$0xf]  ;;  %v6878_v60 = vor.u32 %v10033_v4, %v6875_v6  ;;  %v7134_v17 = vor.u32 %v10097_v10, %v7131_v11 }
 0x224   :  { %4069 = vmatpush.bf16.msra.mxu1 %v7262_v15  ;;  %4049 = vmatpush.bf16.msrb.mxu3 %v8602_v20  ;;  %v7419_v14 = vld [vmem:[#allocation6 + $0x4f0] sm:$0xf0] }
 0x225   :  { %4037 = vmatmul.bf16.vlgmr.msrb.gmra.mxu2 %v11172_v7  ;;  %v10233_v15 = vld [vmem:[#allocation6 + $0x6d4] sm:$0xf]  ;;  %v7422_v20 = vor.u32 %v10169_v63, %v7419_v14 }
 0x226   :  { %4081 = vmatpush.bf16.msra.mxu2 %v7550_v21  ;;  %4057 = vmatpush.bf16.msra.mxu0 %v6974_v29  ;;  %v7675_v16 = vld [vmem:[#allocation6 + $0x6f0] sm:$0xf0]  ;;  %v3806_v23 = vpop.f32.mrf.mxu0  ;;  %v3819_v28 = vpop.f32.mrf.mxu1 }
 0x227   :  { %4050 = vmatmul.bf16.vlgmr.msrb.gmra.mxu3 %v11174_v13  ;;  %v10025_v18 = vld [vmem:[#allocation6 + $0x54] sm:$0xf]  ;;  %v7678_v24 = vor.u32 %v10233_v15, %v7675_v16 }
 0x228   :  { %4094 = vmatpush.bf16.msra.mxu3 %v7806_v25  ;;  %4070 = vmatpush.bf16.msra.mxu1 %v7230_v33  ;;  %v6843_v19 = vld [vmem:[#allocation6 + $0x70] sm:$0xf0] }
 0x229   :  { %v10089_v21 = vld [vmem:[#allocation6 + $0x254] sm:$0xf]  ;;  %v6846_v29 = vor.u32 %v10025_v18, %v6843_v19 }
 0x22a   :  { %4082 = vmatpush.bf16.msra.mxu2 %v7518_v36  ;;  %4058 = vmatpush.bf16.msra.mxu0 %v6942_v44  ;;  %v7099_v22 = vld [vmem:[#allocation6 + $0x270] sm:$0xf0]  ;;  %v3830_v44 = vpop.f32.mrf.mxu2 }
 0x22b   :  { %v10161_v25 = vld [vmem:[#allocation6 + $0x494] sm:$0xf]  ;;  %v7102_v34 = vor.u32 %v10089_v21, %v7099_v22  ;;  %v3831_v50 = vadd.f32 %v3830_v44, %v3818_v1  ;;  %v11230_v44 = vld [vmem:[#allocation7] sm:$0xff] }
 0x22c   :  { %4095 = vmatpush.bf16.msra.mxu3 %v7774_v41  ;;  %4071 = vmatpush.bf16.msra.mxu1 %v7198_v48  ;;  %v7387_v26 = vld [vmem:[#allocation6 + $0x4b0] sm:$0xf0] }
 0x22d   :  { %v10225_v30 = vld [vmem:[#allocation6 + $0x694] sm:$0xf]  ;;  %v7390_v40 = vor.u32 %v10161_v25, %v7387_v26 }
 0x22e   :  { %4083 = vmatpush.bf16.msra.mxu2 %v7486_v51  ;;  %4059 = vmatpush.bf16.msra.mxu0 %v6910_v62  ;;  %v7643_v31 = vld [vmem:[#allocation6 + $0x6b0] sm:$0xf0]  ;;  %v3843_v51 = vpop.f32.mrf.mxu3 }
 0x22f   :  { %v10017_v33 = vld [vmem:[#allocation6 + $0x14] sm:$0xf]  ;;  %v7646_v46 = vor.u32 %v10225_v30, %v7643_v31  ;;  %v11225_v5 = vadd.f32 %v3843_v51, %v3831_v50 }
 0x230   :  { %4096 = vmatpush.bf16.msra.mxu3 %v7742_v55  ;;  %4072 = vmatpush.bf16.msra.mxu1 %v7166_v3  ;;  %v6811_v35 = vld [vmem:[#allocation6 + $0x30] sm:$0xf0] }
 0x231   :  { %v10081_v36 = vld [vmem:[#allocation6 + $0x214] sm:$0xf]  ;;  %v6814_v52 = vor.u32 %v10017_v33, %v6811_v35 }
 0x232   :  { %4084 = vmatpush.bf16.msra.mxu2 %v7454_v8  ;;  %4060 = vmatpush.bf16.msra.mxu0 %v6878_v60  ;;  %v7067_v39 = vld [vmem:[#allocation6 + $0x230] sm:$0xf0]  ;;  %v3832_v19 = vpop.f32.mrf.mxu2 }
 0x233   :  { %v10329_v41 = vld [vmem:[#allocation6 + $0x9d4] sm:$0xf]  ;;  %v7070_v55 = vor.u32 %v10081_v36, %v7067_v39 }
 0x234   :  { %4097 = vmatpush.bf16.msra.mxu3 %v7710_v12  ;;  %4073 = vmatpush.bf16.msra.mxu1 %v7134_v17  ;;  %v8059_v42 = vld [vmem:[#allocation6 + $0x9f0] sm:$0xf0] }
 0x235   :  { %v10393_v43 = vld [vmem:[#allocation6 + $0xbd4] sm:$0xf]  ;;  %v8062_v56 = vor.u32 %v10329_v41, %v8059_v42 }
 0x236   :  { %4085 = vmatpush.bf16.msra.mxu2 %v7422_v20  ;;  %v8315_v9 = vld [vmem:[#allocation6 + $0xbf0] sm:$0xf0]  ;;  %4061 = vmatpush.bf16.msra.mxu0 %v6846_v29 }
 0x237   :  { %v10153_v48 = vld [vmem:[#allocation6 + $0x454] sm:$0xf]  ;;  %v8318_v61 = vor.u32 %v10393_v43, %v8315_v9 }
 0x238   :  { %4098 = vmatpush.bf16.msra.mxu3 %v7678_v24  ;;  %v7355_v49 = vld [vmem:[#allocation6 + $0x470] sm:$0xf0]  ;;  %4074 = vmatpush.bf16.msra.mxu1 %v7102_v34  ;;  %v3845_v24 = vpop.f32.mrf.mxu3 }
 0x239   :  { %v10217_v53 = vld [vmem:[#allocation6 + $0x654] sm:$0xf]  ;;  %v7358_v62 = vor.u32 %v10153_v48, %v7355_v49 }
 0x23a   :  { %v7611_v54 = vld [vmem:[#allocation6 + $0x670] sm:$0xf0]  ;;  %4086 = vmatpush.bf16.msra.mxu2 %v7390_v40  ;;  %4062 = vmatpush.bf16.msra.mxu0 %v6814_v52 }
 0x23b   :  { %v10321_v59 = vld [vmem:[#allocation6 + $0x994] sm:$0xf]  ;;  %v7614_v4 = vor.u32 %v10217_v53, %v7611_v54 }
 0x23c   :  { %v8027_v2 = vld [vmem:[#allocation6 + $0x9b0] sm:$0xf0]  ;;  %4099 = vmatpush.bf16.msra.mxu3 %v7646_v46  ;;  %4075 = vmatpush.bf16.msra.mxu1 %v7070_v55  ;;  %v962_v46 = vperm.slane %v11230_v44, 3 }
 0x23d   :  { %v10385_v38 = vld [vmem:[#allocation6 + $0xb94] sm:$0xf]  ;;  %v8030_v63 = vor.u32 %v10321_v59, %v8027_v2  ;;  %4063 = vmatmul.bf16.vlgmr.msra.gmra.mxu0 %v11150_v27 }
 0x23e   :  { %v8283_v3 = vld [vmem:[#allocation6 + $0xbb0] sm:$0xf0]  ;;  %4107 = vmatpush.bf16.msrb.mxu0 %v8062_v56  ;;  %4087 = vmatpush.bf16.msra.mxu2 %v7358_v62  ;;  %v3856_v56 = vpop.f32.mrf.mxu0 }
 0x23f   :  { %v10145_v6 = vld [vmem:[#allocation6 + $0x414] sm:$0xf]  ;;  %v8286_v15 = vor.u32 %v10385_v38, %v8283_v3  ;;  %4076 = vmatmul.bf16.vlgmr.msra.gmra.mxu1 %v11152_v32  ;;  %v3857_v2 = vadd.f32 %v3856_v56, %v962_v46  ;;  %v3869_v38 = vpop.f32.mrf.mxu1  ;;  %v7041_v46 = vld [vmem:[#allocation6 + $0x1d8] sm:$0xf] }
 0x240   :  { %v7323_v1 = vld [vmem:[#allocation6 + $0x430] sm:$0xf0]  ;;  %4120 = vmatpush.bf16.msrb.mxu1 %v8318_v61  ;;  %4100 = vmatpush.bf16.msra.mxu3 %v7614_v4 }
 0x241   :  { %v10209_v8 = vld [vmem:[#allocation6 + $0x614] sm:$0xf]  ;;  %v7326_v16 = vor.u32 %v10145_v6, %v7323_v1 }
 0x242   :  { %v7579_v10 = vld [vmem:[#allocation6 + $0x630] sm:$0xf0]  ;;  %4108 = vmatpush.bf16.msrb.mxu0 %v8030_v63 }
 0x243   :  { %v10457_v11 = vld [vmem:[#allocation6 + $0xdd4] sm:$0xf]  ;;  %v7582_v20 = vor.u32 %v10209_v8, %v7579_v10  ;;  %4088 = vmatpush.bf16.msra.mxu2 %v7326_v16 }
 0x244   :  { %v8571_v12 = vld [vmem:[#allocation6 + $0xdf0] sm:$0xf0]  ;;  %4121 = vmatpush.bf16.msrb.mxu1 %v8286_v15 }
 0x245   :  { %v10521_v14 = vld [vmem:[#allocation6 + $0xfd4] sm:$0xf]  ;;  %v8574_v21 = vor.u32 %v10457_v11, %v8571_v12  ;;  %4101 = vmatpush.bf16.msra.mxu3 %v7582_v20  ;;  %v3870_v11 = vadd.f32 %v3869_v38, %v3857_v2  ;;  %v7009_v38 = vld [vmem:[#allocation6 + $0x198] sm:$0xf] }
 0x246   :  { %v8827_v60 = vld [vmem:[#allocation6 + $0xff0] sm:$0xf0]  ;;  %4089 = vmatmul.bf16.vlgmr.msra.gmra.mxu2 %v11158_v58 }
 0x247   :  { %v10313_v17 = vld [vmem:[#allocation6 + $0x954] sm:$0xf]  ;;  %v8830_v25 = vor.u32 %v10521_v14, %v8827_v60  ;;  %4133 = vmatpush.bf16.msrb.mxu2 %v8574_v21 }
 0x248   :  { %v7995_v18 = vld [vmem:[#allocation6 + $0x970] sm:$0xf0]  ;;  %4102 = vmatmul.bf16.vlgmr.msra.gmra.mxu3 %v11160_v0 }
 0x249   :  { %v10377_v22 = vld [vmem:[#allocation6 + $0xb54] sm:$0xf]  ;;  %v7998_v29 = vor.u32 %v10313_v17, %v7995_v18  ;;  %4146 = vmatpush.bf16.msrb.mxu3 %v8830_v25 }
 0x24a   :  { %v8251_v23 = vld [vmem:[#allocation6 + $0xb70] sm:$0xf0] }
 0x24b   :  { %v10449_v26 = vld [vmem:[#allocation6 + $0xd94] sm:$0xf]  ;;  %v8254_v33 = vor.u32 %v10377_v22, %v8251_v23  ;;  %4109 = vmatpush.bf16.msrb.mxu0 %v7998_v29 }
 0x24c   :  { %v8539_v28 = vld [vmem:[#allocation6 + $0xdb0] sm:$0xf0] }
 0x24d   :  { %v10513_v30 = vld [vmem:[#allocation6 + $0xf94] sm:$0xf]  ;;  %v8542_v36 = vor.u32 %v10449_v26, %v8539_v28  ;;  %4122 = vmatpush.bf16.msrb.mxu1 %v8254_v33  ;;  %v3858_v26 = vpop.f32.mrf.mxu0 }
 0x24e   :  { %v8795_v31 = vld [vmem:[#allocation6 + $0xfb0] sm:$0xf0] }
 0x24f   :  { %v10305_v34 = vld [vmem:[#allocation6 + $0x914] sm:$0xf]  ;;  %v8798_v41 = vor.u32 %v10513_v30, %v8795_v31  ;;  %4134 = vmatpush.bf16.msrb.mxu2 %v8542_v36  ;;  %v3871_v31 = vpop.f32.mrf.mxu1 }
 0x250   :  { %v7963_v35 = vld [vmem:[#allocation6 + $0x930] sm:$0xf0] }
 0x251   :  { %v10369_v39 = vld [vmem:[#allocation6 + $0xb14] sm:$0xf]  ;;  %v7966_v9 = vor.u32 %v10305_v34, %v7963_v35  ;;  %4147 = vmatpush.bf16.msrb.mxu3 %v8798_v41 }
 0x252   :  { %v8219_v40 = vld [vmem:[#allocation6 + $0xb30] sm:$0xf0] }
 0x253   :  { %v10441_v42 = vld [vmem:[#allocation6 + $0xd54] sm:$0xf]  ;;  %v8222_v50 = vor.u32 %v10369_v39, %v8219_v40  ;;  %4110 = vmatpush.bf16.msrb.mxu0 %v7966_v9  ;;  %v10078_v9 = vld [vmem:[#allocation6 + $0x1f4] sm:$0xf0] }
 0x254   :  { %v8507_v43 = vld [vmem:[#allocation6 + $0xd70] sm:$0xf0]  ;;  %v7042_v2 = vor.u32 %v10078_v9, %v7041_v46  ;;  %v7201_v46 = vld [vmem:[#allocation6 + $0x318] sm:$0xf] }
 0x255   :  { %v10505_v48 = vld [vmem:[#allocation6 + $0xf54] sm:$0xf]  ;;  %v8510_v53 = vor.u32 %v10441_v42, %v8507_v43  ;;  %4123 = vmatpush.bf16.msrb.mxu1 %v8222_v50  ;;  %v10118_v9 = vld [vmem:[#allocation6 + $0x334] sm:$0xf0] }
 0x256   :  { %v8763_v49 = vld [vmem:[#allocation6 + $0xf70] sm:$0xf0] }
 0x257   :  { %v10297_v51 = vld [vmem:[#allocation6 + $0x8d4] sm:$0xf]  ;;  %v8766_v59 = vor.u32 %v10505_v48, %v8763_v49  ;;  %4135 = vmatpush.bf16.msrb.mxu2 %v8510_v53  ;;  %v7297_v48 = vld [vmem:[#allocation6 + $0x3d8] sm:$0xf]  ;;  %v3882_v49 = vpop.f32.mrf.mxu2 }
 0x258   :  { %v7931_v52 = vld [vmem:[#allocation6 + $0x8f0] sm:$0xf0] }
 0x259   :  { %v10361_v54 = vld [vmem:[#allocation6 + $0xad4] sm:$0xf]  ;;  %v7934_v3 = vor.u32 %v10297_v51, %v7931_v52  ;;  %4148 = vmatpush.bf16.msrb.mxu3 %v8766_v59  ;;  %v10142_v51 = vld [vmem:[#allocation6 + $0x3f4] sm:$0xf0] }
 0x25a   :  { %v8187_v55 = vld [vmem:[#allocation6 + $0xaf0] sm:$0xf0] }
 0x25b   :  { %v10433_v61 = vld [vmem:[#allocation6 + $0xd14] sm:$0xf]  ;;  %v8190_v1 = vor.u32 %v10361_v54, %v8187_v55  ;;  %4111 = vmatpush.bf16.msrb.mxu0 %v7934_v3  ;;  %v3883_v54 = vadd.f32 %v3882_v49, %v3870_v11  ;;  %v3895_v55 = vpop.f32.mrf.mxu3  ;;  %v7489_v49 = vld [vmem:[#allocation6 + $0x558] sm:$0xf] }
 0x25c   :  { %v8475_v62 = vld [vmem:[#allocation6 + $0xd30] sm:$0xf0] }
 0x25d   :  { %v10497_v4 = vld [vmem:[#allocation6 + $0xf14] sm:$0xf]  ;;  %v8478_v12 = vor.u32 %v10433_v61, %v8475_v62  ;;  %4124 = vmatpush.bf16.msrb.mxu1 %v8190_v1  ;;  %v11234_v3 = vadd.f32 %v3895_v55, %v3883_v54  ;;  %v10070_v1 = vld [vmem:[#allocation6 + $0x1b4] sm:$0xf0]  ;;  %v7202_v54 = vor.u32 %v10118_v9, %v7201_v46 }
 0x25e   :  { %v8731_v6 = vld [vmem:[#allocation6 + $0xf30] sm:$0xf0]  ;;  %v6913_v55 = vld [vmem:[#allocation6 + $0xd8] sm:$0xf] }
 0x25f   :  { %v10289_v8 = vld [vmem:[#allocation6 + $0x894] sm:$0xf]  ;;  %v8734_v60 = vor.u32 %v10497_v4, %v8731_v6  ;;  %4136 = vmatpush.bf16.msrb.mxu2 %v8478_v12  ;;  %v7298_v4 = vor.u32 %v10142_v51, %v7297_v48  ;;  %v10022_v46 = vld [vmem:[#allocation6 + $0x34] sm:$0xf0] }
 0x260   :  { %v7899_v10 = vld [vmem:[#allocation6 + $0x8b0] sm:$0xf0]  ;;  %v7073_v9 = vld [vmem:[#allocation6 + $0x218] sm:$0xf] }
 0x261   :  { %v10353_v63 = vld [vmem:[#allocation6 + $0xa94] sm:$0xf]  ;;  %v7902_v17 = vor.u32 %v10289_v8, %v7899_v10  ;;  %4149 = vmatpush.bf16.msrb.mxu3 %v8734_v60  ;;  %v7265_v8 = vld [vmem:[#allocation6 + $0x398] sm:$0xf] }
 0x262   :  { %v8155_v14 = vld [vmem:[#allocation6 + $0xab0] sm:$0xf0]  ;;  %v10134_v10 = vld [vmem:[#allocation6 + $0x3b4] sm:$0xf0] }
 0x263   :  { %v10425_v15 = vld [vmem:[#allocation6 + $0xcd4] sm:$0xf]  ;;  %v8158_v20 = vor.u32 %v10353_v63, %v8155_v14  ;;  %4112 = vmatpush.bf16.msrb.mxu0 %v7902_v17  ;;  %v7010_v17 = vor.u32 %v10070_v1, %v7009_v38 }
 0x264   :  { %v8443_v16 = vld [vmem:[#allocation6 + $0xcf0] sm:$0xf0] }
 0x265   :  { %v10489_v18 = vld [vmem:[#allocation6 + $0xed4] sm:$0xf]  ;;  %v8446_v23 = vor.u32 %v10425_v15, %v8443_v16  ;;  %4125 = vmatpush.bf16.msrb.mxu1 %v8158_v20  ;;  %v7553_v15 = vld [vmem:[#allocation6 + $0x5d8] sm:$0xf]  ;;  %v7266_v20 = vor.u32 %v10134_v10, %v7265_v8  ;;  %v3921_v8 = vpop.f32.mrf.mxu1 }
 0x266   :  { %v8699_v19 = vld [vmem:[#allocation6 + $0xef0] sm:$0xf0]  ;;  %v10206_v16 = vld [vmem:[#allocation6 + $0x5f4] sm:$0xf0] }
 0x267   :  { %v10281_v21 = vld [vmem:[#allocation6 + $0x854] sm:$0xf]  ;;  %v8702_v28 = vor.u32 %v10489_v18, %v8699_v19  ;;  %4137 = vmatpush.bf16.msrb.mxu2 %v8446_v23  ;;  %v7809_v18 = vld [vmem:[#allocation6 + $0x7d8] sm:$0xf]  ;;  %v7554_v26 = vor.u32 %v10206_v16, %v7553_v15 }
 0x268   :  { %v7867_v22 = vld [vmem:[#allocation6 + $0x870] sm:$0xf0]  ;;  %v10270_v19 = vld [vmem:[#allocation6 + $0x7f4] sm:$0xf0] }
 0x269   :  { %v10345_v24 = vld [vmem:[#allocation6 + $0xa54] sm:$0xf]  ;;  %v7870_v33 = vor.u32 %v10281_v21, %v7867_v22  ;;  %4150 = vmatpush.bf16.msrb.mxu3 %v8702_v28  ;;  %v6977_v22 = vld [vmem:[#allocation6 + $0x158] sm:$0xf]  ;;  %v7810_v31 = vor.u32 %v10270_v19, %v7809_v18 }
 0x26a   :  { %v8123_v25 = vld [vmem:[#allocation6 + $0xa70] sm:$0xf0]  ;;  %v10062_v23 = vld [vmem:[#allocation6 + $0x174] sm:$0xf0] }
 0x26b   :  { %v10417_v29 = vld [vmem:[#allocation6 + $0xc94] sm:$0xf]  ;;  %v8126_v39 = vor.u32 %v10345_v24, %v8123_v25  ;;  %4113 = vmatpush.bf16.msrb.mxu0 %v7870_v33  ;;  %v3884_v24 = vpop.f32.mrf.mxu2  ;;  %v7233_v28 = vld [vmem:[#allocation6 + $0x358] sm:$0xf] }
 0x26c   :  { %v8411_v30 = vld [vmem:[#allocation6 + $0xcb0] sm:$0xf0]  ;;  %v7521_v33 = vld [vmem:[#allocation6 + $0x598] sm:$0xf] }
 0x26d   :  { %v10481_v34 = vld [vmem:[#allocation6 + $0xe94] sm:$0xf]  ;;  %v8414_v43 = vor.u32 %v10417_v29, %v8411_v30  ;;  %4126 = vmatpush.bf16.msrb.mxu1 %v8126_v39  ;;  %v10126_v29 = vld [vmem:[#allocation6 + $0x374] sm:$0xf0]  ;;  %v3897_v30 = vpop.f32.mrf.mxu3 }
 0x26e   :  { %v8667_v35 = vld [vmem:[#allocation6 + $0xeb0] sm:$0xf0]  ;;  %v10262_v39 = vld [vmem:[#allocation6 + $0x7b4] sm:$0xf0] }
 0x26f   :  { %v10273_v36 = vld [vmem:[#allocation6 + $0x814] sm:$0xf]  ;;  %v8670_v50 = vor.u32 %v10481_v34, %v8667_v35  ;;  %4138 = vmatpush.bf16.msrb.mxu2 %v8414_v43  ;;  %v10198_v34 = vld [vmem:[#allocation6 + $0x5b4] sm:$0xf0]  ;;  %v6978_v35 = vor.u32 %v10062_v23, %v6977_v22 }
 0x270   :  { %v7835_v40 = vld [vmem:[#allocation6 + $0x830] sm:$0xf0]  ;;  %v7522_v43 = vor.u32 %v10198_v34, %v7521_v33  ;;  %v10102_v18 = vld [vmem:[#allocation6 + $0x2b4] sm:$0xf0] }
 0x271   :  { %v10337_v41 = vld [vmem:[#allocation6 + $0xa14] sm:$0xf]  ;;  %v7838_v56 = vor.u32 %v10273_v36, %v7835_v40  ;;  %4151 = vmatpush.bf16.msrb.mxu3 %v8670_v50  ;;  %v7777_v36 = vld [vmem:[#allocation6 + $0x798] sm:$0xf]  ;;  %v7234_v40 = vor.u32 %v10126_v29, %v7233_v28 }
 0x272   :  { %v8091_v42 = vld [vmem:[#allocation6 + $0xa30] sm:$0xf0]  ;;  %v7778_v48 = vor.u32 %v10262_v39, %v7777_v36  ;;  %v10190_v50 = vld [vmem:[#allocation6 + $0x574] sm:$0xf0]  ;;  %v3923_v36 = vpop.f32.mrf.mxu1 }
 0x273   :  { %v10409_v52 = vld [vmem:[#allocation6 + $0xc54] sm:$0xf]  ;;  %v8094_v62 = vor.u32 %v10337_v41, %v8091_v42  ;;  %4114 = vmatpush.bf16.msrb.mxu0 %v7838_v56  ;;  %v6945_v41 = vld [vmem:[#allocation6 + $0x118] sm:$0xf] }
 0x274   :  { %v8379_v53 = vld [vmem:[#allocation6 + $0xc70] sm:$0xf0]  ;;  %v10054_v42 = vld [vmem:[#allocation6 + $0x134] sm:$0xf0] }
 0x275   :  { %v10473_v59 = vld [vmem:[#allocation6 + $0xe54] sm:$0xf]  ;;  %v8382_v6 = vor.u32 %v10409_v52, %v8379_v53  ;;  %4127 = vmatpush.bf16.msrb.mxu1 %v8094_v62  ;;  %v6946_v51 = vor.u32 %v10054_v42, %v6945_v41  ;;  %v7745_v52 = vld [vmem:[#allocation6 + $0x758] sm:$0xf] }
 0x276   :  { %v8635_v61 = vld [vmem:[#allocation6 + $0xe70] sm:$0xf0]  ;;  %4115 = vmatmul.bf16.vlgmr.msrb.gmra.mxu0 %v11166_v37  ;;  %v10254_v53 = vld [vmem:[#allocation6 + $0x774] sm:$0xf0] }
 0x277   :  { %v8638_v12 = vor.u32 %v10473_v59, %v8635_v61  ;;  %v10401_v11 = vld [vmem:[#allocation6 + $0xc14] sm:$0xf]  ;;  %4159 = vmatpush.bf16.msra.mxu0 %v7042_v2  ;;  %4139 = vmatpush.bf16.msrb.mxu2 %v8382_v6  ;;  %v10046_v56 = vld [vmem:[#allocation6 + $0xf4] sm:$0xf0]  ;;  %v7490_v59 = vor.u32 %v10190_v50, %v7489_v49  ;;  %v3908_v2 = vpop.f32.mrf.mxu0  ;;  %v7746_v38 = vor.u32 %v10254_v53, %v7745_v52  ;;  %v3934_v53 = vpop.f32.mrf.mxu2 }
 0x278   :  { %v8347_v63 = vld [vmem:[#allocation6 + $0xc30] sm:$0xf0]  ;;  %4128 = vmatmul.bf16.vlgmr.msrb.gmra.mxu1 %v11168_v45  ;;  %v7169_v61 = vld [vmem:[#allocation6 + $0x2d8] sm:$0xf]  ;;  %v3909_v1 = vadd.f32 %v3908_v2, %v11234_v3  ;;  %v6914_v10 = vor.u32 %v10046_v56, %v6913_v55 }
 0x279   :  { %v10465_v14 = vld [vmem:[#allocation6 + $0xe14] sm:$0xf]  ;;  %4172 = vmatpush.bf16.msra.mxu1 %v7298_v4  ;;  %v8350_v21 = vor.u32 %v10401_v11, %v8347_v63  ;;  %4152 = vmatpush.bf16.msrb.mxu3 %v8638_v12  ;;  %v10110_v62 = vld [vmem:[#allocation6 + $0x2f4] sm:$0xf0] }
 0x27a   :  { %v8603_v60 = vld [vmem:[#allocation6 + $0xe30] sm:$0xf0]  ;;  %v7457_v4 = vld [vmem:[#allocation6 + $0x518] sm:$0xf]  ;;  %v7170_v63 = vor.u32 %v10110_v62, %v7169_v61  ;;  %v3922_v15 = vadd.f32 %v3921_v8, %v3909_v1  ;;  %v3947_v62 = vpop.f32.mrf.mxu3 }
 0x27b   :  { %v8606_v25 = vor.u32 %v10465_v14, %v8603_v60  ;;  %4160 = vmatpush.bf16.msra.mxu0 %v7010_v17  ;;  %4140 = vmatpush.bf16.msrb.mxu2 %v8350_v21  ;;  %v10182_v6 = vld [vmem:[#allocation6 + $0x534] sm:$0xf0] }
 0x27c   :  { %v7713_v12 = vld [vmem:[#allocation6 + $0x718] sm:$0xf]  ;;  %v7458_v16 = vor.u32 %v10182_v6, %v7457_v4  ;;  %v3935_v61 = vadd.f32 %v3934_v53, %v3922_v15 }
 0x27d   :  { %4173 = vmatpush.bf16.msra.mxu1 %v7266_v20  ;;  %4153 = vmatpush.bf16.msrb.mxu3 %v8606_v25  ;;  %v10246_v11 = vld [vmem:[#allocation6 + $0x734] sm:$0xf0] }
 0x27e   :  { %4141 = vmatmul.bf16.vlgmr.msrb.gmra.mxu2 %v11172_v7  ;;  %v6881_v14 = vld [vmem:[#allocation6 + $0x98] sm:$0xf]  ;;  %v7714_v19 = vor.u32 %v10246_v11, %v7713_v12 }
 0x27f   :  { %4185 = vmatpush.bf16.msra.mxu2 %v7554_v26  ;;  %4161 = vmatpush.bf16.msra.mxu0 %v6978_v35  ;;  %v10038_v60 = vld [vmem:[#allocation6 + $0xb4] sm:$0xf0] }
 0x280   :  { %4154 = vmatmul.bf16.vlgmr.msrb.gmra.mxu3 %v11174_v13  ;;  %v7137_v17 = vld [vmem:[#allocation6 + $0x298] sm:$0xf]  ;;  %v6882_v3 = vor.u32 %v10038_v60, %v6881_v14 }
 0x281   :  { %4198 = vmatpush.bf16.msra.mxu3 %v7810_v31  ;;  %4174 = vmatpush.bf16.msra.mxu1 %v7234_v40  ;;  %v7425_v20 = vld [vmem:[#allocation6 + $0x4d8] sm:$0xf]  ;;  %v7138_v24 = vor.u32 %v10102_v18, %v7137_v17  ;;  %v3910_v31 = vpop.f32.mrf.mxu0 }
 0x282   :  { %v10174_v21 = vld [vmem:[#allocation6 + $0x4f4] sm:$0xf0] }
 0x283   :  { %4186 = vmatpush.bf16.msra.mxu2 %v7522_v43  ;;  %4162 = vmatpush.bf16.msra.mxu0 %v6946_v51  ;;  %v7681_v22 = vld [vmem:[#allocation6 + $0x6d8] sm:$0xf]  ;;  %v7426_v28 = vor.u32 %v10174_v21, %v7425_v20 }
 0x284   :  { %v10238_v23 = vld [vmem:[#allocation6 + $0x6f4] sm:$0xf0] }
 0x285   :  { %4199 = vmatpush.bf16.msra.mxu3 %v7778_v48  ;;  %4175 = vmatpush.bf16.msra.mxu1 %v7202_v54  ;;  %v6849_v25 = vld [vmem:[#allocation6 + $0x58] sm:$0xf]  ;;  %v7682_v33 = vor.u32 %v10238_v23, %v7681_v22 }
 0x286   :  { %v10030_v26 = vld [vmem:[#allocation6 + $0x74] sm:$0xf0] }
 0x287   :  { %4187 = vmatpush.bf16.msra.mxu2 %v7490_v59  ;;  %4163 = vmatpush.bf16.msra.mxu0 %v6914_v10  ;;  %v7105_v29 = vld [vmem:[#allocation6 + $0x258] sm:$0xf]  ;;  %v6850_v39 = vor.u32 %v10030_v26, %v6849_v25  ;;  %v11241_v10 = vadd.f32 %v3947_v62, %v3935_v61 }
 0x288   :  { %v10094_v30 = vld [vmem:[#allocation6 + $0x274] sm:$0xf0] }
 0x289   :  { %4200 = vmatpush.bf16.msra.mxu3 %v7746_v38  ;;  %4176 = vmatpush.bf16.msra.mxu1 %v7170_v63  ;;  %v7393_v34 = vld [vmem:[#allocation6 + $0x498] sm:$0xf]  ;;  %v7106_v43 = vor.u32 %v10094_v30, %v7105_v29  ;;  %v3936_v29 = vpop.f32.mrf.mxu2 }
 0x28a   :  { %v10166_v35 = vld [vmem:[#allocation6 + $0x4b4] sm:$0xf0] }
 0x28b   :  { %4188 = vmatpush.bf16.msra.mxu2 %v7458_v16  ;;  %4164 = vmatpush.bf16.msra.mxu0 %v6882_v3  ;;  %v7649_v40 = vld [vmem:[#allocation6 + $0x698] sm:$0xf]  ;;  %v7394_v49 = vor.u32 %v10166_v35, %v7393_v34  ;;  %v3949_v35 = vpop.f32.mrf.mxu3 }
 0x28c   :  { %v10230_v41 = vld [vmem:[#allocation6 + $0x6b4] sm:$0xf0] }
 0x28d   :  { %4201 = vmatpush.bf16.msra.mxu3 %v7714_v19  ;;  %v6817_v42 = vld [vmem:[#allocation6 + $0x18] sm:$0xf]  ;;  %4177 = vmatpush.bf16.msra.mxu1 %v7138_v24  ;;  %v7650_v54 = vor.u32 %v10230_v41, %v7649_v40 }
 0x28e   :  { %v10086_v48 = vld [vmem:[#allocation6 + $0x234] sm:$0xf0]  ;;  %v6818_v2 = vor.u32 %v10022_v46, %v6817_v42 }
 0x28f   :  { %4189 = vmatpush.bf16.msra.mxu2 %v7426_v28  ;;  %v8065_v50 = vld [vmem:[#allocation6 + $0x9d8] sm:$0xf]  ;;  %4165 = vmatpush.bf16.msra.mxu0 %v6850_v39  ;;  %v7074_v6 = vor.u32 %v10086_v48, %v7073_v9 }
 0x290   :  { %v10334_v51 = vld [vmem:[#allocation6 + $0x9f4] sm:$0xf0] }
 0x291   :  { %v8321_v52 = vld [vmem:[#allocation6 + $0xbd8] sm:$0xf]  ;;  %4202 = vmatpush.bf16.msra.mxu3 %v7682_v33  ;;  %4178 = vmatpush.bf16.msra.mxu1 %v7106_v43  ;;  %v8066_v1 = vor.u32 %v10334_v51, %v8065_v50 }
 0x292   :  { %v10398_v55 = vld [vmem:[#allocation6 + $0xbf4] sm:$0xf0] }
 0x293   :  { %v7361_v56 = vld [vmem:[#allocation6 + $0x458] sm:$0xf]  ;;  %4190 = vmatpush.bf16.msra.mxu2 %v7394_v49  ;;  %v8322_v12 = vor.u32 %v10398_v55, %v8321_v52  ;;  %4166 = vmatpush.bf16.msra.mxu0 %v6818_v2  ;;  %v963_v55 = vperm.slane %v11230_v44, 4  ;;  %v3973_v44 = vpop.f32.mrf.mxu1 }
 0x294   :  { %v10158_v59 = vld [vmem:[#allocation6 + $0x474] sm:$0xf0] }
 0x295   :  { %v7617_v38 = vld [vmem:[#allocation6 + $0x658] sm:$0xf]  ;;  %v7362_v11 = vor.u32 %v10158_v59, %v7361_v56  ;;  %4203 = vmatpush.bf16.msra.mxu3 %v7650_v54  ;;  %4179 = vmatpush.bf16.msra.mxu1 %v7074_v6 }
 0x296   :  { %v10222_v4 = vld [vmem:[#allocation6 + $0x674] sm:$0xf0]  ;;  %4167 = vmatmul.bf16.vlgmr.msra.gmra.mxu0 %v11150_v27 }
 0x297   :  { %v8033_v8 = vld [vmem:[#allocation6 + $0x998] sm:$0xf]  ;;  %v7618_v16 = vor.u32 %v10222_v4, %v7617_v38  ;;  %4211 = vmatpush.bf16.msrb.mxu0 %v8066_v1  ;;  %4191 = vmatpush.bf16.msra.mxu2 %v7362_v11 }
 0x298   :  { %v10326_v63 = vld [vmem:[#allocation6 + $0x9b4] sm:$0xf0]  ;;  %4180 = vmatmul.bf16.vlgmr.msra.gmra.mxu1 %v11152_v32 }
 0x299   :  { %v8289_v14 = vld [vmem:[#allocation6 + $0xb98] sm:$0xf]  ;;  %v8034_v3 = vor.u32 %v10326_v63, %v8033_v8  ;;  %4224 = vmatpush.bf16.msrb.mxu1 %v8322_v12  ;;  %4204 = vmatpush.bf16.msra.mxu3 %v7618_v16  ;;  %v3960_v8 = vpop.f32.mrf.mxu0 }
 0x29a   :  { %v10390_v60 = vld [vmem:[#allocation6 + $0xbb4] sm:$0xf0] }
 0x29b   :  { %v7329_v15 = vld [vmem:[#allocation6 + $0x418] sm:$0xf]  ;;  %v8290_v24 = vor.u32 %v10390_v60, %v8289_v14  ;;  %4212 = vmatpush.bf16.msrb.mxu0 %v8034_v3  ;;  %v3961_v14 = vadd.f32 %v3960_v8, %v963_v55  ;;  %v10074_v55 = vld [vmem:[#allocation6 + $0x1dc] sm:$0xf] }
 0x29c   :  { %v10150_v17 = vld [vmem:[#allocation6 + $0x434] sm:$0xf0] }
 0x29d   :  { %v7585_v18 = vld [vmem:[#allocation6 + $0x618] sm:$0xf]  ;;  %v7330_v25 = vor.u32 %v10150_v17, %v7329_v15  ;;  %4225 = vmatpush.bf16.msrb.mxu1 %v8290_v24 }
 0x29e   :  { %v10214_v19 = vld [vmem:[#allocation6 + $0x634] sm:$0xf0] }
 0x29f   :  { %v8577_v20 = vld [vmem:[#allocation6 + $0xdd8] sm:$0xf]  ;;  %v7586_v30 = vor.u32 %v10214_v19, %v7585_v18  ;;  %4192 = vmatpush.bf16.msra.mxu2 %v7330_v25 }
 0x2a0   :  { %v10462_v21 = vld [vmem:[#allocation6 + $0xdf4] sm:$0xf0] }
 0x2a1   :  { %v8833_v22 = vld [vmem:[#allocation6 + $0xfd8] sm:$0xf]  ;;  %v8578_v31 = vor.u32 %v10462_v21, %v8577_v20  ;;  %4205 = vmatpush.bf16.msra.mxu3 %v7586_v30  ;;  %v3974_v20 = vadd.f32 %v3973_v44, %v3961_v14  ;;  %v10066_v44 = vld [vmem:[#allocation6 + $0x19c] sm:$0xf] }
 0x2a2   :  { %v10526_v23 = vld [vmem:[#allocation6 + $0xff4] sm:$0xf0]  ;;  %4193 = vmatmul.bf16.vlgmr.msra.gmra.mxu2 %v11158_v58 }
 0x2a3   :  { %v8001_v26 = vld [vmem:[#allocation6 + $0x958] sm:$0xf]  ;;  %v8834_v36 = vor.u32 %v10526_v23, %v8833_v22  ;;  %4237 = vmatpush.bf16.msrb.mxu2 %v8578_v31 }
 0x2a4   :  { %v10318_v28 = vld [vmem:[#allocation6 + $0x974] sm:$0xf0]  ;;  %4206 = vmatmul.bf16.vlgmr.msra.gmra.mxu3 %v11160_v0 }
 0x2a5   :  { %v8257_v33 = vld [vmem:[#allocation6 + $0xb58] sm:$0xf]  ;;  %v8002_v41 = vor.u32 %v10318_v28, %v8001_v26  ;;  %4250 = vmatpush.bf16.msrb.mxu3 %v8834_v36 }
 0x2a6   :  { %v10382_v34 = vld [vmem:[#allocation6 + $0xb74] sm:$0xf0] }
 0x2a7   :  { %v8545_v39 = vld [vmem:[#allocation6 + $0xd98] sm:$0xf]  ;;  %v8258_v46 = vor.u32 %v10382_v34, %v8257_v33  ;;  %4213 = vmatpush.bf16.msrb.mxu0 %v8002_v41 }
 0x2a8   :  { %v10454_v40 = vld [vmem:[#allocation6 + $0xdb4] sm:$0xf0] }
 0x2a9   :  { %v8801_v42 = vld [vmem:[#allocation6 + $0xf98] sm:$0xf]  ;;  %v8546_v49 = vor.u32 %v10454_v40, %v8545_v39  ;;  %4226 = vmatpush.bf16.msrb.mxu1 %v8258_v46  ;;  %v3962_v39 = vpop.f32.mrf.mxu0 }
 0x2aa   :  { %v10518_v43 = vld [vmem:[#allocation6 + $0xfb4] sm:$0xf0] }
 0x2ab   :  { %v7969_v9 = vld [vmem:[#allocation6 + $0x918] sm:$0xf]  ;;  %v8802_v52 = vor.u32 %v10518_v43, %v8801_v42  ;;  %4238 = vmatpush.bf16.msrb.mxu2 %v8546_v49  ;;  %v3975_v43 = vpop.f32.mrf.mxu1 }
 0x2ac   :  { %v10310_v48 = vld [vmem:[#allocation6 + $0x934] sm:$0xf0] }
 0x2ad   :  { %v8225_v50 = vld [vmem:[#allocation6 + $0xb18] sm:$0xf]  ;;  %v7970_v56 = vor.u32 %v10310_v48, %v7969_v9  ;;  %4251 = vmatpush.bf16.msrb.mxu3 %v8802_v52 }
 0x2ae   :  { %v10374_v51 = vld [vmem:[#allocation6 + $0xb34] sm:$0xf0] }
 0x2af   :  { %v8513_v53 = vld [vmem:[#allocation6 + $0xd58] sm:$0xf]  ;;  %v8226_v62 = vor.u32 %v10374_v51, %v8225_v50  ;;  %4214 = vmatpush.bf16.msrb.mxu0 %v7970_v56  ;;  %v7043_v56 = vld [vmem:[#allocation6 + $0x1f8] sm:$0xf0] }
 0x2b0   :  { %v10446_v54 = vld [vmem:[#allocation6 + $0xd74] sm:$0xf0]  ;;  %v7046_v14 = vor.u32 %v10074_v55, %v7043_v56  ;;  %v10114_v55 = vld [vmem:[#allocation6 + $0x31c] sm:$0xf] }
 0x2b1   :  { %v8769_v59 = vld [vmem:[#allocation6 + $0xf58] sm:$0xf]  ;;  %v8514_v4 = vor.u32 %v10446_v54, %v8513_v53  ;;  %4227 = vmatpush.bf16.msrb.mxu1 %v8226_v62  ;;  %v7203_v56 = vld [vmem:[#allocation6 + $0x338] sm:$0xf0] }
 0x2b2   :  { %v10510_v61 = vld [vmem:[#allocation6 + $0xf74] sm:$0xf0] }
 0x2b3   :  { %v7937_v2 = vld [vmem:[#allocation6 + $0x8d8] sm:$0xf]  ;;  %v8770_v12 = vor.u32 %v10510_v61, %v8769_v59  ;;  %4239 = vmatpush.bf16.msrb.mxu2 %v8514_v4  ;;  %v10138_v59 = vld [vmem:[#allocation6 + $0x3dc] sm:$0xf]  ;;  %v3986_v61 = vpop.f32.mrf.mxu2 }
 0x2b4   :  { %v10302_v38 = vld [vmem:[#allocation6 + $0x8f4] sm:$0xf0] }
 0x2b5   :  { %v8193_v6 = vld [vmem:[#allocation6 + $0xad8] sm:$0xf]  ;;  %v7938_v60 = vor.u32 %v10302_v38, %v7937_v2  ;;  %4252 = vmatpush.bf16.msrb.mxu3 %v8770_v12  ;;  %v7299_v2 = vld [vmem:[#allocation6 + $0x3f8] sm:$0xf0] }
 0x2b6   :  { %v10366_v1 = vld [vmem:[#allocation6 + $0xaf4] sm:$0xf0] }
 0x2b7   :  { %v8481_v11 = vld [vmem:[#allocation6 + $0xd18] sm:$0xf]  ;;  %v8194_v17 = vor.u32 %v10366_v1, %v8193_v6  ;;  %4215 = vmatpush.bf16.msrb.mxu0 %v7938_v60  ;;  %v3987_v6 = vadd.f32 %v3986_v61, %v3974_v20  ;;  %v3999_v1 = vpop.f32.mrf.mxu3  ;;  %v10186_v61 = vld [vmem:[#allocation6 + $0x55c] sm:$0xf] }
 0x2b8   :  { %v10438_v63 = vld [vmem:[#allocation6 + $0xd34] sm:$0xf0] }
 0x2b9   :  { %v8737_v16 = vld [vmem:[#allocation6 + $0xf18] sm:$0xf]  ;;  %v8482_v21 = vor.u32 %v10438_v63, %v8481_v11  ;;  %4228 = vmatpush.bf16.msrb.mxu1 %v8194_v17  ;;  %v11248_v60 = vadd.f32 %v3999_v1, %v3987_v6  ;;  %v7011_v17 = vld [vmem:[#allocation6 + $0x1b8] sm:$0xf0]  ;;  %v7206_v6 = vor.u32 %v10114_v55, %v7203_v56 }
 0x2ba   :  { %v10502_v15 = vld [vmem:[#allocation6 + $0xf34] sm:$0xf0]  ;;  %v10042_v1 = vld [vmem:[#allocation6 + $0xdc] sm:$0xf] }
 0x2bb   :  { %v7905_v18 = vld [vmem:[#allocation6 + $0x898] sm:$0xf]  ;;  %v8738_v23 = vor.u32 %v10502_v15, %v8737_v16  ;;  %4240 = vmatpush.bf16.msrb.mxu2 %v8482_v21  ;;  %v7302_v16 = vor.u32 %v10138_v59, %v7299_v2  ;;  %v6819_v55 = vld [vmem:[#allocation6 + $0x38] sm:$0xf0] }
 0x2bc   :  { %v10294_v19 = vld [vmem:[#allocation6 + $0x8b4] sm:$0xf0]  ;;  %v10082_v56 = vld [vmem:[#allocation6 + $0x21c] sm:$0xf] }
 0x2bd   :  { %v8161_v3 = vld [vmem:[#allocation6 + $0xa98] sm:$0xf]  ;;  %v7906_v26 = vor.u32 %v10294_v19, %v7905_v18  ;;  %4253 = vmatpush.bf16.msrb.mxu3 %v8738_v23  ;;  %v10130_v18 = vld [vmem:[#allocation6 + $0x39c] sm:$0xf] }
 0x2be   :  { %v10358_v22 = vld [vmem:[#allocation6 + $0xab4] sm:$0xf0]  ;;  %v7267_v19 = vld [vmem:[#allocation6 + $0x3b8] sm:$0xf0] }
 0x2bf   :  { %v8449_v24 = vld [vmem:[#allocation6 + $0xcd8] sm:$0xf]  ;;  %v8162_v30 = vor.u32 %v10358_v22, %v8161_v3  ;;  %4216 = vmatpush.bf16.msrb.mxu0 %v7906_v26  ;;  %v7014_v26 = vor.u32 %v10066_v44, %v7011_v17 }
 0x2c0   :  { %v10430_v25 = vld [vmem:[#allocation6 + $0xcf4] sm:$0xf0] }
 0x2c1   :  { %v8705_v28 = vld [vmem:[#allocation6 + $0xed8] sm:$0xf]  ;;  %v8450_v34 = vor.u32 %v10430_v25, %v8449_v24  ;;  %4229 = vmatpush.bf16.msrb.mxu1 %v8162_v30  ;;  %v10202_v24 = vld [vmem:[#allocation6 + $0x5dc] sm:$0xf]  ;;  %v7270_v30 = vor.u32 %v10130_v18, %v7267_v19  ;;  %v4025_v18 = vpop.f32.mrf.mxu1 }
 0x2c2   :  { %v10494_v29 = vld [vmem:[#allocation6 + $0xef4] sm:$0xf0]  ;;  %v7555_v25 = vld [vmem:[#allocation6 + $0x5f8] sm:$0xf0] }
 0x2c3   :  { %v7873_v31 = vld [vmem:[#allocation6 + $0x858] sm:$0xf]  ;;  %v8706_v40 = vor.u32 %v10494_v29, %v8705_v28  ;;  %4241 = vmatpush.bf16.msrb.mxu2 %v8450_v34  ;;  %v10266_v28 = vld [vmem:[#allocation6 + $0x7dc] sm:$0xf]  ;;  %v7558_v39 = vor.u32 %v10202_v24, %v7555_v25 }
 0x2c4   :  { %v10286_v33 = vld [vmem:[#allocation6 + $0x874] sm:$0xf0]  ;;  %v7811_v29 = vld [vmem:[#allocation6 + $0x7f8] sm:$0xf0] }
 0x2c5   :  { %v8129_v35 = vld [vmem:[#allocation6 + $0xa58] sm:$0xf]  ;;  %v7874_v46 = vor.u32 %v10286_v33, %v7873_v31  ;;  %4254 = vmatpush.bf16.msrb.mxu3 %v8706_v40  ;;  %v10058_v33 = vld [vmem:[#allocation6 + $0x15c] sm:$0xf]  ;;  %v7814_v43 = vor.u32 %v10266_v28, %v7811_v29 }
 0x2c6   :  { %v10350_v36 = vld [vmem:[#allocation6 + $0xa74] sm:$0xf0]  ;;  %v6979_v34 = vld [vmem:[#allocation6 + $0x178] sm:$0xf0] }
 0x2c7   :  { %v8417_v41 = vld [vmem:[#allocation6 + $0xc98] sm:$0xf]  ;;  %v8130_v50 = vor.u32 %v10350_v36, %v8129_v35  ;;  %4217 = vmatpush.bf16.msrb.mxu0 %v7874_v46  ;;  %v3988_v35 = vpop.f32.mrf.mxu2  ;;  %v10122_v40 = vld [vmem:[#allocation6 + $0x35c] sm:$0xf] }
 0x2c8   :  { %v10422_v42 = vld [vmem:[#allocation6 + $0xcb4] sm:$0xf0]  ;;  %v10194_v46 = vld [vmem:[#allocation6 + $0x59c] sm:$0xf] }
 0x2c9   :  { %v8673_v9 = vld [vmem:[#allocation6 + $0xe98] sm:$0xf]  ;;  %v8418_v54 = vor.u32 %v10422_v42, %v8417_v41  ;;  %4230 = vmatpush.bf16.msrb.mxu1 %v8130_v50  ;;  %v7235_v41 = vld [vmem:[#allocation6 + $0x378] sm:$0xf0]  ;;  %v4001_v42 = vpop.f32.mrf.mxu3 }
 0x2ca   :  { %v10486_v48 = vld [vmem:[#allocation6 + $0xeb4] sm:$0xf0]  ;;  %v7779_v50 = vld [vmem:[#allocation6 + $0x7b8] sm:$0xf0] }
 0x2cb   :  { %v7841_v49 = vld [vmem:[#allocation6 + $0x818] sm:$0xf]  ;;  %v8674_v62 = vor.u32 %v10486_v48, %v8673_v9  ;;  %4242 = vmatpush.bf16.msrb.mxu2 %v8418_v54  ;;  %v7523_v9 = vld [vmem:[#allocation6 + $0x5b8] sm:$0xf0]  ;;  %v6982_v48 = vor.u32 %v10058_v33, %v6979_v34 }
 0x2cc   :  { %v10278_v51 = vld [vmem:[#allocation6 + $0x834] sm:$0xf0]  ;;  %v7526_v54 = vor.u32 %v10194_v46, %v7523_v9  ;;  %v7139_v28 = vld [vmem:[#allocation6 + $0x2b8] sm:$0xf0] }
 0x2cd   :  { %v8097_v52 = vld [vmem:[#allocation6 + $0xa18] sm:$0xf]  ;;  %v7842_v8 = vor.u32 %v10278_v51, %v7841_v49  ;;  %4255 = vmatpush.bf16.msrb.mxu3 %v8674_v62  ;;  %v10258_v49 = vld [vmem:[#allocation6 + $0x79c] sm:$0xf]  ;;  %v7238_v51 = vor.u32 %v10122_v40, %v7235_v41 }
 0x2ce   :  { %v10342_v53 = vld [vmem:[#allocation6 + $0xa34] sm:$0xf0]  ;;  %v7782_v59 = vor.u32 %v10258_v49, %v7779_v50  ;;  %v7491_v62 = vld [vmem:[#allocation6 + $0x578] sm:$0xf0]  ;;  %v4027_v49 = vpop.f32.mrf.mxu1 }
 0x2cf   :  { %v8385_v38 = vld [vmem:[#allocation6 + $0xc58] sm:$0xf]  ;;  %v8098_v63 = vor.u32 %v10342_v53, %v8097_v52  ;;  %4218 = vmatpush.bf16.msrb.mxu0 %v7842_v8  ;;  %v10050_v52 = vld [vmem:[#allocation6 + $0x11c] sm:$0xf] }
 0x2d0   :  { %v10414_v4 = vld [vmem:[#allocation6 + $0xc74] sm:$0xf0]  ;;  %v6947_v53 = vld [vmem:[#allocation6 + $0x138] sm:$0xf0] }
 0x2d1   :  { %v8641_v12 = vld [vmem:[#allocation6 + $0xe58] sm:$0xf]  ;;  %v8386_v15 = vor.u32 %v10414_v4, %v8385_v38  ;;  %4231 = vmatpush.bf16.msrb.mxu1 %v8098_v63  ;;  %v6950_v2 = vor.u32 %v10050_v52, %v6947_v53  ;;  %v10250_v38 = vld [vmem:[#allocation6 + $0x75c] sm:$0xf] }
 0x2d2   :  { %v10478_v11 = vld [vmem:[#allocation6 + $0xe74] sm:$0xf0]  ;;  %4219 = vmatmul.bf16.vlgmr.msrb.gmra.mxu0 %v11166_v37  ;;  %v7747_v4 = vld [vmem:[#allocation6 + $0x778] sm:$0xf0] }
 0x2d3   :  { %v8642_v21 = vor.u32 %v10478_v11, %v8641_v12  ;;  %v8353_v20 = vld [vmem:[#allocation6 + $0xc18] sm:$0xf]  ;;  %4263 = vmatpush.bf16.msra.mxu0 %v7046_v14  ;;  %4243 = vmatpush.bf16.msrb.mxu2 %v8386_v15  ;;  %v6915_v8 = vld [vmem:[#allocation6 + $0xf8] sm:$0xf0]  ;;  %v7494_v12 = vor.u32 %v10186_v61, %v7491_v62  ;;  %v4012_v14 = vpop.f32.mrf.mxu0  ;;  %v7750_v44 = vor.u32 %v10250_v38, %v7747_v4  ;;  %v4038_v4 = vpop.f32.mrf.mxu2 }
 0x2d4   :  { %v10406_v3 = vld [vmem:[#allocation6 + $0xc34] sm:$0xf0]  ;;  %4232 = vmatmul.bf16.vlgmr.msrb.gmra.mxu1 %v11168_v45  ;;  %v10106_v11 = vld [vmem:[#allocation6 + $0x2dc] sm:$0xf]  ;;  %v4013_v17 = vadd.f32 %v4012_v14, %v11248_v60  ;;  %v6918_v19 = vor.u32 %v10042_v1, %v6915_v8 }
 0x2d5   :  { %v8609_v22 = vld [vmem:[#allocation6 + $0xe18] sm:$0xf]  ;;  %4276 = vmatpush.bf16.msra.mxu1 %v7302_v16  ;;  %v8354_v31 = vor.u32 %v10406_v3, %v8353_v20  ;;  %4256 = vmatpush.bf16.msrb.mxu3 %v8642_v21  ;;  %v7171_v63 = vld [vmem:[#allocation6 + $0x2f8] sm:$0xf0] }
 0x2d6   :  { %v10470_v23 = vld [vmem:[#allocation6 + $0xe34] sm:$0xf0]  ;;  %v10178_v16 = vld [vmem:[#allocation6 + $0x51c] sm:$0xf]  ;;  %v7174_v3 = vor.u32 %v10106_v11, %v7171_v63  ;;  %v4026_v24 = vadd.f32 %v4025_v18, %v4013_v17  ;;  %v4051_v63 = vpop.f32.mrf.mxu3 }
 0x2d7   :  { %v8610_v36 = vor.u32 %v10470_v23, %v8609_v22  ;;  %4264 = vmatpush.bf16.msra.mxu0 %v7014_v26  ;;  %4244 = vmatpush.bf16.msrb.mxu2 %v8354_v31  ;;  %v7459_v15 = vld [vmem:[#allocation6 + $0x538] sm:$0xf0] }
 0x2d8   :  { %v10242_v21 = vld [vmem:[#allocation6 + $0x71c] sm:$0xf]  ;;  %v7462_v25 = vor.u32 %v10178_v16, %v7459_v15  ;;  %v4039_v11 = vadd.f32 %v4038_v4, %v4026_v24 }
 0x2d9   :  { %4277 = vmatpush.bf16.msra.mxu1 %v7270_v30  ;;  %4257 = vmatpush.bf16.msrb.mxu3 %v8610_v36  ;;  %v7715_v20 = vld [vmem:[#allocation6 + $0x738] sm:$0xf0] }
 0x2da   :  { %4245 = vmatmul.bf16.vlgmr.msrb.gmra.mxu2 %v11172_v7  ;;  %v10034_v22 = vld [vmem:[#allocation6 + $0x9c] sm:$0xf]  ;;  %v7718_v29 = vor.u32 %v10242_v21, %v7715_v20 }
 0x2db   :  { %4289 = vmatpush.bf16.msra.mxu2 %v7558_v39  ;;  %4265 = vmatpush.bf16.msra.mxu0 %v6982_v48  ;;  %v6883_v23 = vld [vmem:[#allocation6 + $0xb8] sm:$0xf0] }
 0x2dc   :  { %4258 = vmatmul.bf16.vlgmr.msrb.gmra.mxu3 %v11174_v13  ;;  %v10098_v26 = vld [vmem:[#allocation6 + $0x29c] sm:$0xf]  ;;  %v6886_v60 = vor.u32 %v10034_v22, %v6883_v23 }
 0x2dd   :  { %4302 = vmatpush.bf16.msra.mxu3 %v7814_v43  ;;  %4278 = vmatpush.bf16.msra.mxu1 %v7238_v51  ;;  %v10170_v30 = vld [vmem:[#allocation6 + $0x4dc] sm:$0xf]  ;;  %v7142_v35 = vor.u32 %v10098_v26, %v7139_v28  ;;  %v4014_v43 = vpop.f32.mrf.mxu0 }
 0x2de   :  { %v7427_v31 = vld [vmem:[#allocation6 + $0x4f8] sm:$0xf0] }
 0x2df   :  { %4290 = vmatpush.bf16.msra.mxu2 %v7526_v54  ;;  %4266 = vmatpush.bf16.msra.mxu0 %v6950_v2  ;;  %v10234_v33 = vld [vmem:[#allocation6 + $0x6dc] sm:$0xf]  ;;  %v7430_v40 = vor.u32 %v10170_v30, %v7427_v31 }
 0x2e0   :  { %v7683_v34 = vld [vmem:[#allocation6 + $0x6f8] sm:$0xf0] }
 0x2e1   :  { %4303 = vmatpush.bf16.msra.mxu3 %v7782_v59  ;;  %4279 = vmatpush.bf16.msra.mxu1 %v7206_v6  ;;  %v10026_v36 = vld [vmem:[#allocation6 + $0x5c] sm:$0xf]  ;;  %v7686_v46 = vor.u32 %v10234_v33, %v7683_v34 }
 0x2e2   :  { %v6851_v39 = vld [vmem:[#allocation6 + $0x78] sm:$0xf0] }
 0x2e3   :  { %4291 = vmatpush.bf16.msra.mxu2 %v7494_v12  ;;  %4267 = vmatpush.bf16.msra.mxu0 %v6918_v19  ;;  %v10090_v41 = vld [vmem:[#allocation6 + $0x25c] sm:$0xf]  ;;  %v6854_v50 = vor.u32 %v10026_v36, %v6851_v39  ;;  %v11255_v19 = vadd.f32 %v4051_v63, %v4039_v11 }
 0x2e4   :  { %v7107_v42 = vld [vmem:[#allocation6 + $0x278] sm:$0xf0] }
 0x2e5   :  { %4304 = vmatpush.bf16.msra.mxu3 %v7750_v44  ;;  %4280 = vmatpush.bf16.msra.mxu1 %v7174_v3  ;;  %v10162_v9 = vld [vmem:[#allocation6 + $0x49c] sm:$0xf]  ;;  %v7110_v54 = vor.u32 %v10090_v41, %v7107_v42  ;;  %v4040_v41 = vpop.f32.mrf.mxu2 }
 0x2e6   :  { %v7395_v48 = vld [vmem:[#allocation6 + $0x4b8] sm:$0xf0] }
 0x2e7   :  { %4292 = vmatpush.bf16.msra.mxu2 %v7462_v25  ;;  %4268 = vmatpush.bf16.msra.mxu0 %v6886_v60  ;;  %v10226_v51 = vld [vmem:[#allocation6 + $0x69c] sm:$0xf]  ;;  %v7398_v61 = vor.u32 %v10162_v9, %v7395_v48  ;;  %v4053_v48 = vpop.f32.mrf.mxu3 }
 0x2e8   :  { %v7651_v52 = vld [vmem:[#allocation6 + $0x6b8] sm:$0xf0] }
 0x2e9   :  { %4305 = vmatpush.bf16.msra.mxu3 %v7718_v29  ;;  %v10018_v53 = vld [vmem:[#allocation6 + $0x1c] sm:$0xf]  ;;  %4281 = vmatpush.bf16.msra.mxu1 %v7142_v35  ;;  %v7654_v6 = vor.u32 %v10226_v51, %v7651_v52 }
 0x2ea   :  { %v7075_v59 = vld [vmem:[#allocation6 + $0x238] sm:$0xf0]  ;;  %v6822_v14 = vor.u32 %v10018_v53, %v6819_v55 }
 0x2eb   :  { %4293 = vmatpush.bf16.msra.mxu2 %v7430_v40  ;;  %v10330_v62 = vld [vmem:[#allocation6 + $0x9dc] sm:$0xf]  ;;  %4269 = vmatpush.bf16.msra.mxu0 %v6854_v50  ;;  %v7078_v15 = vor.u32 %v10082_v56, %v7075_v59 }
 0x2ec   :  { %v8067_v2 = vld [vmem:[#allocation6 + $0x9f8] sm:$0xf0] }
 0x2ed   :  { %v10394_v38 = vld [vmem:[#allocation6 + $0xbdc] sm:$0xf]  ;;  %4306 = vmatpush.bf16.msra.mxu3 %v7686_v46  ;;  %4282 = vmatpush.bf16.msra.mxu1 %v7110_v54  ;;  %v8070_v17 = vor.u32 %v10330_v62, %v8067_v2 }
 0x2ee   :  { %v8323_v1 = vld [vmem:[#allocation6 + $0xbf8] sm:$0xf0] }
 0x2ef   :  { %v10154_v8 = vld [vmem:[#allocation6 + $0x45c] sm:$0xf]  ;;  %4294 = vmatpush.bf16.msra.mxu2 %v7398_v61  ;;  %v8326_v21 = vor.u32 %v10394_v38, %v8323_v1  ;;  %4270 = vmatpush.bf16.msra.mxu0 %v6822_v14 }
 0x2f0   :  { %v7363_v12 = vld [vmem:[#allocation6 + $0x478] sm:$0xf0] }
 0x2f1   :  { %v10218_v44 = vld [vmem:[#allocation6 + $0x65c] sm:$0xf]  ;;  %v7366_v20 = vor.u32 %v10154_v8, %v7363_v12  ;;  %4307 = vmatpush.bf16.msra.mxu3 %v7654_v6  ;;  %4283 = vmatpush.bf16.msra.mxu1 %v7078_v15 }
 0x2f2   :  { %v7619_v16 = vld [vmem:[#allocation6 + $0x678] sm:$0xf0]  ;;  %4271 = vmatmul.bf16.vlgmr.msra.gmra.mxu0 %v11150_v27 }
 0x2f3   :  { %v10322_v18 = vld [vmem:[#allocation6 + $0x99c] sm:$0xf]  ;;  %v7622_v25 = vor.u32 %v10218_v44, %v7619_v16  ;;  %4315 = vmatpush.bf16.msrb.mxu0 %v8070_v17  ;;  %4295 = vmatpush.bf16.msra.mxu2 %v7366_v20  ;;  %v11261_v16 = vpop.f32.mrf.mxu0 }
 0x2f4   :  { %v8035_v3 = vld [vmem:[#allocation6 + $0x9b8] sm:$0xf0]  ;;  %4284 = vmatmul.bf16.vlgmr.msra.gmra.mxu1 %v11152_v32 }
 0x2f5   :  { %v10386_v22 = vld [vmem:[#allocation6 + $0xb9c] sm:$0xf]  ;;  %v8038_v60 = vor.u32 %v10322_v18, %v8035_v3  ;;  %4328 = vmatpush.bf16.msrb.mxu1 %v8326_v21  ;;  %4308 = vmatpush.bf16.msra.mxu3 %v7622_v25  ;;  %v11263_v18 = vpop.f32.mrf.mxu1 }
 0x2f6   :  { %v8291_v23 = vld [vmem:[#allocation6 + $0xbb8] sm:$0xf0] }
 0x2f7   :  { %v10146_v24 = vld [vmem:[#allocation6 + $0x41c] sm:$0xf]  ;;  %v8294_v35 = vor.u32 %v10386_v22, %v8291_v23  ;;  %4316 = vmatpush.bf16.msrb.mxu0 %v8038_v60 }
 0x2f8   :  { %v7331_v26 = vld [vmem:[#allocation6 + $0x438] sm:$0xf0] }
 0x2f9   :  { %v10210_v28 = vld [vmem:[#allocation6 + $0x61c] sm:$0xf]  ;;  %v7334_v36 = vor.u32 %v10146_v24, %v7331_v26  ;;  %4329 = vmatpush.bf16.msrb.mxu1 %v8294_v35 }
 0x2fa   :  { %v7587_v29 = vld [vmem:[#allocation6 + $0x638] sm:$0xf0] }
 0x2fb   :  { %v10458_v30 = vld [vmem:[#allocation6 + $0xddc] sm:$0xf]  ;;  %v7590_v42 = vor.u32 %v10210_v28, %v7587_v29  ;;  %4296 = vmatpush.bf16.msra.mxu2 %v7334_v36 }
 0x2fc   :  { %v8579_v31 = vld [vmem:[#allocation6 + $0xdf8] sm:$0xf0] }
 0x2fd   :  { %v10522_v33 = vld [vmem:[#allocation6 + $0xfdc] sm:$0xf]  ;;  %v8582_v43 = vor.u32 %v10458_v30, %v8579_v31  ;;  %4309 = vmatpush.bf16.msra.mxu3 %v7590_v42  ;;  %v4066_v42 = vpop.f32.mrf.mxu0  ;;  %v4079_v48 = vpop.f32.mrf.mxu1 }
 0x2fe   :  { %v8835_v34 = vld [vmem:[#allocation6 + $0xff8] sm:$0xf0]  ;;  %4297 = vmatmul.bf16.vlgmr.msra.gmra.mxu2 %v11158_v58 }
 0x2ff   :  { %v10314_v39 = vld [vmem:[#allocation6 + $0x95c] sm:$0xf]  ;;  %v8838_v49 = vor.u32 %v10522_v33, %v8835_v34  ;;  %4341 = vmatpush.bf16.msrb.mxu2 %v8582_v43 }
 0x300   :  { %v8003_v40 = vld [vmem:[#allocation6 + $0x978] sm:$0xf0]  ;;  %4310 = vmatmul.bf16.vlgmr.msra.gmra.mxu3 %v11160_v0 }
 0x301   :  { %v10378_v46 = vld [vmem:[#allocation6 + $0xb5c] sm:$0xf]  ;;  %v8006_v52 = vor.u32 %v10314_v39, %v8003_v40  ;;  %4354 = vmatpush.bf16.msrb.mxu3 %v8838_v49 }
 0x302   :  { %v8259_v9 = vld [vmem:[#allocation6 + $0xb78] sm:$0xf0] }
 0x303   :  { %v10450_v50 = vld [vmem:[#allocation6 + $0xd9c] sm:$0xf]  ;;  %v8262_v55 = vor.u32 %v10378_v46, %v8259_v9  ;;  %4317 = vmatpush.bf16.msrb.mxu0 %v8006_v52 }
 0x304   :  { %v8547_v51 = vld [vmem:[#allocation6 + $0xdb8] sm:$0xf0] }
 0x305   :  { %v10514_v53 = vld [vmem:[#allocation6 + $0xf9c] sm:$0xf]  ;;  %v8550_v27 = vor.u32 %v10450_v50, %v8547_v51  ;;  %4330 = vmatpush.bf16.msrb.mxu1 %v8262_v55 }
 0x306   :  { %v8803_v54 = vld [vmem:[#allocation6 + $0xfb8] sm:$0xf0] }
 0x307   :  { %v10306_v56 = vld [vmem:[#allocation6 + $0x91c] sm:$0xf]  ;;  %v8806_v2 = vor.u32 %v10514_v53, %v8803_v54  ;;  %4342 = vmatpush.bf16.msrb.mxu2 %v8550_v27  ;;  %v8953_v27 = vld [vmem:[#allocation9 + $0xe0] sm:$0xf] }
 0x308   :  { %v7971_v59 = vld [vmem:[#allocation6 + $0x938] sm:$0xf0] }
 0x309   :  { %v10370_v61 = vld [vmem:[#allocation6 + $0xb1c] sm:$0xf]  ;;  %v7974_v4 = vor.u32 %v10306_v56, %v7971_v59  ;;  %4355 = vmatpush.bf16.msrb.mxu3 %v8806_v2  ;;  %v11265_v2 = vpop.f32.mrf.mxu2 }
 0x30a   :  { %v8227_v62 = vld [vmem:[#allocation6 + $0xb38] sm:$0xf0] }
 0x30b   :  { %v10442_v32 = vld [vmem:[#allocation6 + $0xd5c] sm:$0xf]  ;;  %v8230_v8 = vor.u32 %v10370_v61, %v8227_v62  ;;  %4318 = vmatpush.bf16.msrb.mxu0 %v7974_v4  ;;  %v10557_v61 = vld [vmem:[#allocation9 + $0xec] sm:$0xf0]  ;;  %v9081_v62 = vld [vmem:[#allocation9 + $0x1e0] sm:$0xf] }
 0x30c   :  { %v8515_v38 = vld [vmem:[#allocation6 + $0xd78] sm:$0xf0] }
 0x30d   :  { %v10506_v6 = vld [vmem:[#allocation6 + $0xf5c] sm:$0xf]  ;;  %v8518_v63 = vor.u32 %v10442_v32, %v8515_v38  ;;  %4331 = vmatpush.bf16.msrb.mxu1 %v8230_v8  ;;  %v10589_v38 = vld [vmem:[#allocation9 + $0x1ec] sm:$0xf0] }
 0x30e   :  { %v8771_v1 = vld [vmem:[#allocation6 + $0xf78] sm:$0xf0] }
 0x30f   :  { %v10298_v12 = vld [vmem:[#allocation6 + $0x8dc] sm:$0xf]  ;;  %v8774_v15 = vor.u32 %v10506_v6, %v8771_v1  ;;  %4343 = vmatpush.bf16.msrb.mxu2 %v8518_v63  ;;  %v11267_v1 = vpop.f32.mrf.mxu3 }
 0x310   :  { %v7939_v11 = vld [vmem:[#allocation6 + $0x8f8] sm:$0xf0] }
 0x311   :  { %v10362_v14 = vld [vmem:[#allocation6 + $0xadc] sm:$0xf]  ;;  %v7942_v21 = vor.u32 %v10298_v12, %v7939_v11  ;;  %4356 = vmatpush.bf16.msrb.mxu3 %v8774_v15  ;;  %v9082_v15 = vor.u32 %v10589_v38, %v9081_v62  ;;  %v10645_v62 = vld [vmem:[#allocation9 + $0x3ac] sm:$0xf0]  ;;  %v8889_v38 = vld [vmem:[#allocation9 + $0x60] sm:$0xf] }
 0x312   :  { %v8195_v44 = vld [vmem:[#allocation6 + $0xaf8] sm:$0xf0] }
 0x313   :  { %v10434_v17 = vld [vmem:[#allocation6 + $0xd1c] sm:$0xf]  ;;  %v8198_v3 = vor.u32 %v10362_v14, %v8195_v44  ;;  %4319 = vmatpush.bf16.msrb.mxu0 %v7942_v21  ;;  %v8954_v14 = vor.u32 %v10557_v61, %v8953_v27  ;;  %v8937_v44 = vld [vmem:[#allocation9 + $0xc0] sm:$0xf] }
 0x314   :  { %v8483_v58 = vld [vmem:[#allocation6 + $0xd38] sm:$0xf0]  ;;  %v9065_v21 = vld [vmem:[#allocation9 + $0x1c0] sm:$0xf] }
 0x315   :  { %v10498_v20 = vld [vmem:[#allocation6 + $0xf1c] sm:$0xf]  ;;  %v8486_v25 = vor.u32 %v10434_v17, %v8483_v58  ;;  %4332 = vmatpush.bf16.msrb.mxu1 %v8198_v3  ;;  %v10553_v58 = vld [vmem:[#allocation9 + $0xcc] sm:$0xf0]  ;;  %v9305_v61 = vld [vmem:[#allocation9 + $0x3a0] sm:$0xf] }
 0x316   :  { %v8739_v0 = vld [vmem:[#allocation6 + $0xf38] sm:$0xf0] }
 0x317   :  { %v10290_v22 = vld [vmem:[#allocation6 + $0x89c] sm:$0xf]  ;;  %v8742_v28 = vor.u32 %v10498_v20, %v8739_v0  ;;  %4344 = vmatpush.bf16.msrb.mxu2 %v8486_v25  ;;  %v10585_v20 = vld [vmem:[#allocation9 + $0x1cc] sm:$0xf0]  ;;  %v4105_v42 = vpop.f32.mrf.mxu3 }
 0x318   :  { %v7907_v23 = vld [vmem:[#allocation6 + $0x8b8] sm:$0xf0] }
 0x319   :  { %v10354_v24 = vld [vmem:[#allocation6 + $0xa9c] sm:$0xf]  ;;  %v7910_v31 = vor.u32 %v10290_v22, %v7907_v23  ;;  %4357 = vmatpush.bf16.msrb.mxu3 %v8742_v28  ;;  %v8938_v28 = vor.u32 %v10553_v58, %v8937_v44  ;;  %v11275_v44 = vpop.f32.mrf.mxu1 }
 0x31a   :  { %v8163_v26 = vld [vmem:[#allocation6 + $0xab8] sm:$0xf0] }
 0x31b   :  { %v10426_v29 = vld [vmem:[#allocation6 + $0xcdc] sm:$0xf]  ;;  %v8166_v34 = vor.u32 %v10354_v24, %v8163_v26  ;;  %4320 = vmatpush.bf16.msrb.mxu0 %v7910_v31  ;;  %v9209_v24 = vld [vmem:[#allocation9 + $0x2e0] sm:$0xf]  ;;  %v10621_v26 = vld [vmem:[#allocation9 + $0x2ec] sm:$0xf0]  ;;  %v9066_v31 = vor.u32 %v10585_v20, %v9065_v21 }
 0x31c   :  { %v8451_v30 = vld [vmem:[#allocation6 + $0xcf8] sm:$0xf0]  ;;  %v8873_v21 = vld [vmem:[#allocation9 + $0x40] sm:$0xf]  ;;  %v10537_v20 = vld [vmem:[#allocation9 + $0x4c] sm:$0xf0] }
 0x31d   :  { %v10490_v60 = vld [vmem:[#allocation6 + $0xedc] sm:$0xf]  ;;  %v8454_v39 = vor.u32 %v10426_v29, %v8451_v30  ;;  %4333 = vmatpush.bf16.msrb.mxu1 %v8166_v34  ;;  %v9337_v29 = vld [vmem:[#allocation9 + $0x3e0] sm:$0xf]  ;;  %v10653_v30 = vld [vmem:[#allocation9 + $0x3ec] sm:$0xf0] }
 0x31e   :  { %v8707_v33 = vld [vmem:[#allocation6 + $0xef8] sm:$0xf0]  ;;  %v10549_v34 = vld [vmem:[#allocation9 + $0xac] sm:$0xf0] }
 0x31f   :  { %v10282_v35 = vld [vmem:[#allocation6 + $0x85c] sm:$0xf]  ;;  %v8710_v43 = vor.u32 %v10490_v60, %v8707_v33  ;;  %4345 = vmatpush.bf16.msrb.mxu2 %v8454_v39  ;;  %v8921_v33 = vld [vmem:[#allocation9 + $0xa0] sm:$0xf]  ;;  %v9210_v39 = vor.u32 %v10621_v26, %v9209_v24  ;;  %v10605_v24 = vld [vmem:[#allocation9 + $0x26c] sm:$0xf0]  ;;  %v8874_v26 = vor.u32 %v10537_v20, %v8873_v21 }
 0x320   :  { %v7875_v36 = vld [vmem:[#allocation6 + $0x878] sm:$0xf0]  ;;  %v8922_v48 = vor.u32 %v10549_v34, %v8921_v33  ;;  %v10533_v33 = vld [vmem:[#allocation9 + $0x2c] sm:$0xf0]  ;;  %v4368_v34 = vmul.f32 0.1, %v11211_v57 }
 0x321   :  { %v10346_v40 = vld [vmem:[#allocation6 + $0xa5c] sm:$0xf]  ;;  %v7878_v49 = vor.u32 %v10282_v35, %v7875_v36  ;;  %4358 = vmatpush.bf16.msrb.mxu3 %v8710_v43  ;;  %v4092_v35 = vpop.f32.mrf.mxu2  ;;  %v9338_v43 = vor.u32 %v10653_v30, %v9337_v29  ;;  %v10637_v29 = vld [vmem:[#allocation9 + $0x36c] sm:$0xf0]  ;;  %v4367_v30 = vmul.f32 0.1, %v11202_v47 }
 0x322   :  { %v8131_v41 = vld [vmem:[#allocation6 + $0xa78] sm:$0xf0]  ;;  %v9449_v20 = vld [vmem:[#allocation9 + $0x4c0] sm:$0xf] }
 0x323   :  { %v10418_v46 = vld [vmem:[#allocation6 + $0xc9c] sm:$0xf]  ;;  %v8134_v53 = vor.u32 %v10346_v40, %v8131_v41  ;;  %4321 = vmatpush.bf16.msrb.mxu0 %v7878_v49  ;;  %v9049_v40 = vld [vmem:[#allocation9 + $0x1a0] sm:$0xf]  ;;  %v10581_v41 = vld [vmem:[#allocation9 + $0x1ac] sm:$0xf0] }
 0x324   :  { %v8419_v9 = vld [vmem:[#allocation6 + $0xcb8] sm:$0xf0]  ;;  %v9321_v49 = vld [vmem:[#allocation9 + $0x3c0] sm:$0xf] }
 0x325   :  { %v10482_v50 = vld [vmem:[#allocation6 + $0xe9c] sm:$0xf]  ;;  %v8422_v59 = vor.u32 %v10418_v46, %v8419_v9  ;;  %4334 = vmatpush.bf16.msrb.mxu1 %v8134_v53  ;;  %v9193_v46 = vld [vmem:[#allocation9 + $0x2c0] sm:$0xf]  ;;  %v10617_v9 = vld [vmem:[#allocation9 + $0x2cc] sm:$0xf0] }
 0x326   :  { %v8675_v51 = vld [vmem:[#allocation6 + $0xeb8] sm:$0xf0]  ;;  %v10545_v53 = vld [vmem:[#allocation9 + $0x8c] sm:$0xf0] }
 0x327   :  { %v10274_v52 = vld [vmem:[#allocation6 + $0x81c] sm:$0xf]  ;;  %v8678_v32 = vor.u32 %v10482_v50, %v8675_v51  ;;  %4346 = vmatpush.bf16.msrb.mxu2 %v8422_v59  ;;  %v10649_v50 = vld [vmem:[#allocation9 + $0x3cc] sm:$0xf0]  ;;  %v9050_v51 = vor.u32 %v10581_v41, %v9049_v40  ;;  %v11279_v40 = vld [vmem:[#allocation7] sm:$0xff] }
 0x328   :  { %v7843_v54 = vld [vmem:[#allocation6 + $0x838] sm:$0xf0]  ;;  %v10613_v59 = vld [vmem:[#allocation9 + $0x2ac] sm:$0xf0]  ;;  %v964_v41 = vperm.slane %v11279_v40, 5 }
 0x329   :  { %v10338_v55 = vld [vmem:[#allocation6 + $0xa1c] sm:$0xf]  ;;  %v7846_v8 = vor.u32 %v10274_v52, %v7843_v54  ;;  %4359 = vmatpush.bf16.msrb.mxu3 %v8678_v32  ;;  %v8905_v52 = vld [vmem:[#allocation9 + $0x80] sm:$0xf] }
 0x32a   :  { %v8099_v56 = vld [vmem:[#allocation6 + $0xa38] sm:$0xf0]  ;;  %v9033_v54 = vld [vmem:[#allocation9 + $0x180] sm:$0xf]  ;;  %v8906_v27 = vor.u32 %v10545_v53, %v8905_v52 }
 0x32b   :  { %v10410_v4 = vld [vmem:[#allocation6 + $0xc5c] sm:$0xf]  ;;  %v8102_v63 = vor.u32 %v10338_v55, %v8099_v56  ;;  %4322 = vmatpush.bf16.msrb.mxu0 %v7846_v8  ;;  %v10577_v55 = vld [vmem:[#allocation9 + $0x18c] sm:$0xf0]  ;;  %v9322_v56 = vor.u32 %v10649_v50, %v9321_v49  ;;  %v9017_v8 = vld [vmem:[#allocation9 + $0x160] sm:$0xf] }
 0x32c   :  { %v8387_v6 = vld [vmem:[#allocation6 + $0xc78] sm:$0xf0]  ;;  %v9034_v32 = vor.u32 %v10577_v55, %v9033_v54  ;;  %v9257_v50 = vld [vmem:[#allocation9 + $0x340] sm:$0xf]  ;;  %v10561_v55 = vld [vmem:[#allocation9 + $0x10c] sm:$0xf0] }
 0x32d   :  { %v10474_v12 = vld [vmem:[#allocation6 + $0xe5c] sm:$0xf]  ;;  %v8390_v17 = vor.u32 %v10410_v4, %v8387_v6  ;;  %4335 = vmatpush.bf16.msrb.mxu1 %v8102_v63  ;;  %v10541_v4 = vld [vmem:[#allocation9 + $0x6c] sm:$0xf0]  ;;  %v9306_v63 = vor.u32 %v10645_v62, %v9305_v61  ;;  %v8841_v52 = vld [vmem:[#allocation9] sm:$0xf]  ;;  %v11282_v61 = vpop.f32.mrf.mxu2 }
 0x32e   :  { %v8643_v11 = vld [vmem:[#allocation6 + $0xe78] sm:$0xf0]  ;;  %4323 = vmatmul.bf16.vlgmr.msrb.gmra.mxu0 %v11166_v37  ;;  %v9194_v37 = vor.u32 %v10617_v9, %v9193_v46  ;;  %v9129_v46 = vld [vmem:[#allocation9 + $0x240] sm:$0xf]  ;;  %v10601_v9 = vld [vmem:[#allocation9 + $0x24c] sm:$0xf0] }
 0x32f   :  { %v8646_v0 = vor.u32 %v10474_v12, %v8643_v11  ;;  %v10402_v3 = vld [vmem:[#allocation6 + $0xc1c] sm:$0xf]  ;;  %5937 = vmatpush.bf16.msra.mxu0 %v8954_v14  ;;  %4347 = vmatpush.bf16.msrb.mxu2 %v8390_v17  ;;  %v10573_v12 = vld [vmem:[#allocation9 + $0x16c] sm:$0xf0]  ;;  %v11273_v11 = vpop.f32.mrf.mxu0  ;;  %v9161_v14 = vld [vmem:[#allocation9 + $0x280] sm:$0xf] }
 0x330   :  { %v8355_v22 = vld [vmem:[#allocation6 + $0xc38] sm:$0xf0]  ;;  %4336 = vmatmul.bf16.vlgmr.msrb.gmra.mxu1 %v11168_v45  ;;  %v9177_v45 = vld [vmem:[#allocation9 + $0x2a0] sm:$0xf]  ;;  %v9018_v58 = vor.u32 %v10573_v12, %v9017_v8  ;;  %v4376_v8 = vmax.f32 %v11211_v57, %v4368_v34  ;;  %v4369_v12 = vmul.f32 0.1, %v11225_v5 }
 0x331   :  { %v10466_v23 = vld [vmem:[#allocation6 + $0xe1c] sm:$0xf]  ;;  %5950 = vmatpush.bf16.msra.mxu1 %v9082_v15  ;;  %v8358_v60 = vor.u32 %v10402_v3, %v8355_v22  ;;  %4360 = vmatpush.bf16.msrb.mxu3 %v8646_v0  ;;  %v9178_v6 = vor.u32 %v10613_v59, %v9177_v45  ;;  %v8890_v15 = vor.u32 %v10541_v4, %v8889_v38  ;;  %v9289_v17 = vld [vmem:[#allocation9 + $0x380] sm:$0xf]  ;;  %v10569_v22 = vld [vmem:[#allocation9 + $0x14c] sm:$0xf0] }
 0x332   :  { %v8611_v25 = vld [vmem:[#allocation6 + $0xe38] sm:$0xf0]  ;;  %v9001_v3 = vld [vmem:[#allocation9 + $0x140] sm:$0xf]  ;;  %v10685_v59 = vld [vmem:[#allocation9 + $0x4ec] sm:$0xf0]  ;;  %v4377_v34 = vmax.f32 %v11225_v5, %v4369_v12 }
 0x333   :  { %v8614_v36 = vor.u32 %v10466_v23, %v8611_v25  ;;  %5938 = vmatpush.bf16.msra.mxu0 %v8938_v28  ;;  %4348 = vmatpush.bf16.msrb.mxu2 %v8358_v60  ;;  %v9145_v25 = vld [vmem:[#allocation9 + $0x260] sm:$0xf]  ;;  %v10597_v4 = vld [vmem:[#allocation9 + $0x22c] sm:$0xf0] }
 0x334   :  { %v9273_v28 = vld [vmem:[#allocation9 + $0x360] sm:$0xf]  ;;  %v9146_v35 = vor.u32 %v10605_v24, %v9145_v25  ;;  %v10681_v57 = vld [vmem:[#allocation9 + $0x4cc] sm:$0xf0] }
 0x335   :  { %5951 = vmatpush.bf16.msra.mxu1 %v9066_v31  ;;  %4361 = vmatpush.bf16.msrb.mxu3 %v8614_v36  ;;  %v9002_v31 = vor.u32 %v10569_v22, %v9001_v3  ;;  %v8857_v60 = vld [vmem:[#allocation9 + $0x20] sm:$0xf]  ;;  %v10713_v22 = vld [vmem:[#allocation9 + $0x5cc] sm:$0xf0] }
 0x336   :  { %4349 = vmatmul.bf16.vlgmr.msrb.gmra.mxu2 %v11172_v7  ;;  %v10609_v7 = vld [vmem:[#allocation9 + $0x28c] sm:$0xf0]  ;;  %v8985_v36 = vld [vmem:[#allocation9 + $0x120] sm:$0xf]  ;;  %v8858_v49 = vor.u32 %v10533_v33, %v8857_v60  ;;  %v9450_v33 = vor.u32 %v10681_v57, %v9449_v20 }
 0x337   :  { %5963 = vmatpush.bf16.msra.mxu2 %v9210_v39  ;;  %5939 = vmatpush.bf16.msra.mxu0 %v8922_v48  ;;  %v9162_v0 = vor.u32 %v10609_v7, %v9161_v14  ;;  %v10565_v39 = vld [vmem:[#allocation9 + $0x12c] sm:$0xf0]  ;;  %v4118_v42 = vpop.f32.mrf.mxu0  ;;  %v4131_v48 = vpop.f32.mrf.mxu1  ;;  %v8969_v54 = vld [vmem:[#allocation9 + $0x100] sm:$0xf] }
 0x338   :  { %4362 = vmatmul.bf16.vlgmr.msrb.gmra.mxu3 %v11174_v13  ;;  %v10641_v13 = vld [vmem:[#allocation9 + $0x38c] sm:$0xf0]  ;;  %v8986_v53 = vor.u32 %v10565_v39, %v8985_v36  ;;  %v9465_v45 = vld [vmem:[#allocation9 + $0x4e0] sm:$0xf] }
 0x339   :  { %5976 = vmatpush.bf16.msra.mxu3 %v9338_v43  ;;  %5952 = vmatpush.bf16.msra.mxu1 %v9050_v51  ;;  %v9290_v23 = vor.u32 %v10641_v13, %v9289_v17  ;;  %v9274_v43 = vor.u32 %v10637_v29, %v9273_v28  ;;  %v10633_v51 = vld [vmem:[#allocation9 + $0x34c] sm:$0xf0]  ;;  %v9113_v38 = vld [vmem:[#allocation9 + $0x220] sm:$0xf]  ;;  %v4370_v17 = vmul.f32 0.1, %v11241_v10  ;;  %v4065_v13 = vadd.f32 %v11261_v16, %v964_v41 }
 0x33a   :  { %v9258_v62 = vor.u32 %v10633_v51, %v9257_v50  ;;  %v9241_v7 = vld [vmem:[#allocation9 + $0x320] sm:$0xf]  ;;  %v9466_v21 = vor.u32 %v10685_v59, %v9465_v45  ;;  %v10593_v24 = vld [vmem:[#allocation9 + $0x20c] sm:$0xf0] }
 0x33b   :  { %5964 = vmatpush.bf16.msra.mxu2 %v9194_v37  ;;  %5940 = vmatpush.bf16.msra.mxu0 %v8906_v27  ;;  %v10529_v37 = vld [vmem:[#allocation9 + $0xc] sm:$0xf0]  ;;  %v9593_v27 = vld [vmem:[#allocation9 + $0x5e0] sm:$0xf]  ;;  %v4078_v60 = vadd.f32 %v11263_v18, %v4065_v13 }
 0x33c   :  { %v8842_v14 = vor.u32 %v10529_v37, %v8841_v52  ;;  %v9577_v3 = vld [vmem:[#allocation9 + $0x5c0] sm:$0xf]  ;;  %v10625_v29 = vld [vmem:[#allocation9 + $0x30c] sm:$0xf0] }
 0x33d   :  { %5977 = vmatpush.bf16.msra.mxu3 %v9322_v56  ;;  %5953 = vmatpush.bf16.msra.mxu1 %v9034_v32  ;;  %v9130_v56 = vor.u32 %v10601_v9, %v9129_v46  ;;  %v10717_v32 = vld [vmem:[#allocation9 + $0x5ec] sm:$0xf0]  ;;  %v9097_v25 = vld [vmem:[#allocation9 + $0x200] sm:$0xf]  ;;  %v4091_v42 = vadd.f32 %v11265_v2, %v4078_v60 }
 0x33e   :  { %v9721_v16 = vld [vmem:[#allocation9 + $0x6e0] sm:$0xf]  ;;  %v9098_v36 = vor.u32 %v10593_v24, %v9097_v25  ;;  %v10677_v41 = vld [vmem:[#allocation9 + $0x4ac] sm:$0xf0] }
 0x33f   :  { %5965 = vmatpush.bf16.msra.mxu2 %v9178_v6  ;;  %5941 = vmatpush.bf16.msra.mxu0 %v8890_v15  ;;  %v4375_v6 = vmax.f32 %v11202_v47, %v4367_v30  ;;  %v10629_v15 = vld [vmem:[#allocation9 + $0x32c] sm:$0xf0]  ;;  %v9594_v47 = vor.u32 %v10717_v32, %v9593_v27  ;;  %v9433_v39 = vld [vmem:[#allocation9 + $0x4a0] sm:$0xf]  ;;  %v11312_v13 = vpop.f32.mrf.mxu1 }
 0x340   :  { %v10749_v30 = vld [vmem:[#allocation9 + $0x6ec] sm:$0xf0]  ;;  %v9561_v18 = vld [vmem:[#allocation9 + $0x5a0] sm:$0xf]  ;;  %v9434_v52 = vor.u32 %v10677_v41, %v9433_v39 }
 0x341   :  { %5978 = vmatpush.bf16.msra.mxu3 %v9306_v63  ;;  %5954 = vmatpush.bf16.msra.mxu1 %v9018_v58  ;;  %v11287_v63 = vpop.f32.mrf.mxu3  ;;  %v8970_v58 = vor.u32 %v10561_v55, %v8969_v54  ;;  %v11291_v28 = vpack.c.bf16 %v4375_v6, %v4375_v6  ;;  %v9722_v9 = vor.u32 %v10749_v30, %v9721_v16  ;;  %v10709_v48 = vld [vmem:[#allocation9 + $0x5ac] sm:$0xf0]  ;;  %v9705_v5 = vld [vmem:[#allocation9 + $0x6c0] sm:$0xf] }
 0x342   :  { %v10745_v51 = vld [vmem:[#allocation9 + $0x6cc] sm:$0xf0]  ;;  %v9562_v2 = vor.u32 %v10709_v48, %v9561_v18  ;;  %v11301_v54 = vpack.c.bf16 %v4377_v34, %v4377_v34  ;;  %v4104_v55 = vadd.f32 %v11267_v1, %v4091_v42  ;;  %v9689_v27 = vld [vmem:[#allocation9 + $0x6a0] sm:$0xf]  ;;  %v10555_v48 = vld [vmem:[#allocation9 + $0xe4] sm:$0xf] }
 0x343   :  { %5966 = vmatpush.bf16.msra.mxu2 %v9162_v0  ;;  %5942 = vmatpush.bf16.msra.mxu0 %v8874_v26  ;;  %v9114_v0 = vor.u32 %v10597_v4, %v9113_v38  ;;  %v9225_v26 = vld [vmem:[#allocation9 + $0x300] sm:$0xf]  ;;  %v10673_v37 = vld [vmem:[#allocation9 + $0x48c] sm:$0xf0] }
 0x344   :  { %v9226_v46 = vor.u32 %v10625_v29, %v9225_v26  ;;  %v10705_v45 = vld [vmem:[#allocation9 + $0x58c] sm:$0xf0]  ;;  %v4117_v32 = vadd.f32 %v11273_v11, %v4104_v55  ;;  %v9401_v1 = vld [vmem:[#allocation9 + $0x460] sm:$0xf] }
 0x345   :  { %5979 = vmatpush.bf16.msra.mxu3 %v9290_v23  ;;  %5955 = vmatpush.bf16.msra.mxu1 %v9002_v31  ;;  %v9242_v23 = vor.u32 %v10629_v15, %v9241_v7  ;;  %v11293_v31 = vpack.c.bf16 %v4376_v8, %v4376_v8  ;;  %v10669_v6 = vld [vmem:[#allocation9 + $0x46c] sm:$0xf0]  ;;  %v9529_v12 = vld [vmem:[#allocation9 + $0x560] sm:$0xf]  ;;  %v11309_v7 = vpop.f32.mrf.mxu0 }
 0x346   :  { %v9673_v15 = vld [vmem:[#allocation9 + $0x680] sm:$0xf]  ;;  %v4130_v11 = vadd.f32 %v11275_v44, %v4117_v32  ;;  %v10733_v25 = vld [vmem:[#allocation9 + $0x66c] sm:$0xf0] }
 0x347   :  { %5967 = vmatpush.bf16.msra.mxu2 %v9146_v35  ;;  %5943 = vmatpush.bf16.msra.mxu0 %v8858_v49  ;;  %v9578_v35 = vor.u32 %v10713_v22, %v9577_v3  ;;  %v4378_v49 = vmax.f32 %v11241_v10, %v4370_v17  ;;  %v9545_v10 = vld [vmem:[#allocation9 + $0x580] sm:$0xf]  ;;  %v10737_v17 = vld [vmem:[#allocation9 + $0x68c] sm:$0xf0]  ;;  %v4183_v39 = vpop.f32.mrf.mxu1 }
 0x348   :  { %v9546_v4 = vor.u32 %v10705_v45, %v9545_v10  ;;  %v9385_v20 = vld [vmem:[#allocation9 + $0x440] sm:$0xf]  ;;  %v9674_v57 = vor.u32 %v10737_v17, %v9673_v15  ;;  %v10697_v22 = vld [vmem:[#allocation9 + $0x54c] sm:$0xf0]  ;;  %v9211_v15 = vld [vmem:[#allocation9 + $0x2f0] sm:$0xf0] }
 0x349   :  { %5980 = vmatpush.bf16.msra.mxu3 %v9274_v43  ;;  %5956 = vmatpush.bf16.msra.mxu1 %v8986_v53  ;;  %v4144_v43 = vpop.f32.mrf.mxu2  ;;  %v4157_v50 = vpop.f32.mrf.mxu3  ;;  %v9417_v53 = vld [vmem:[#allocation9 + $0x480] sm:$0xf]  ;;  %v11304_v59 = vpack.c.bf16 %v4378_v49, %v4378_v49  ;;  %v10661_v29 = vld [vmem:[#allocation9 + $0x42c] sm:$0xf0] }
 0x34a   :  { %v9418_v38 = vor.u32 %v10673_v37, %v9417_v53  ;;  %v9513_v3 = vld [vmem:[#allocation9 + $0x540] sm:$0xf]  ;;  %v10657_v43 = vld [vmem:[#allocation9 + $0x40c] sm:$0xf0]  ;;  %v8955_v50 = vld [vmem:[#allocation9 + $0xf0] sm:$0xf0] }
 0x34b   :  { %5968 = vmatpush.bf16.msra.mxu2 %v9130_v56  ;;  %5944 = vmatpush.bf16.msra.mxu0 %v8842_v14  ;;  %v9706_v56 = vor.u32 %v10745_v51, %v9705_v5  ;;  %v10701_v14 = vld [vmem:[#allocation9 + $0x56c] sm:$0xf0]  ;;  %v9514_v44 = vor.u32 %v10697_v22, %v9513_v3  ;;  %v9369_v26 = vld [vmem:[#allocation9 + $0x420] sm:$0xf]  ;;  %v10587_v5 = vld [vmem:[#allocation9 + $0x1e4] sm:$0xf]  ;;  %v8958_v45 = vor.u32 %v10555_v48, %v8955_v50 }
 0x34c   :  { %v9497_v60 = vld [vmem:[#allocation9 + $0x520] sm:$0xf]  ;;  %v9370_v41 = vor.u32 %v10661_v29, %v9369_v26  ;;  %v10689_v18 = vld [vmem:[#allocation9 + $0x50c] sm:$0xf0]  ;;  %v965_v22 = vperm.slane %v11279_v40, 6 }
 0x34d   :  { %5981 = vmatpush.bf16.msra.mxu3 %v9258_v62  ;;  %5957 = vmatpush.bf16.msra.mxu1 %v8970_v58  ;;  %v10741_v62 = vld [vmem:[#allocation9 + $0x6ac] sm:$0xf0]  ;;  %v9402_v58 = vor.u32 %v10669_v6, %v9401_v1  ;;  %v4170_v34 = vpop.f32.mrf.mxu0  ;;  %v9353_v42 = vld [vmem:[#allocation9 + $0x400] sm:$0xf]  ;;  %v10583_v1 = vld [vmem:[#allocation9 + $0x1c4] sm:$0xf] }
 0x34e   :  { %5945 = vmatmul.bf16.vlgmr.msra.gmra.mxu0 %v11291_v28  ;;  %v9690_v8 = vor.u32 %v10741_v62, %v9689_v27  ;;  %v10725_v53 = vld [vmem:[#allocation9 + $0x62c] sm:$0xf0]  ;;  %v9354_v55 = vor.u32 %v10657_v43, %v9353_v42  ;;  %v10551_v27 = vld [vmem:[#allocation9 + $0xc4] sm:$0xf]  ;;  %v9067_v6 = vld [vmem:[#allocation9 + $0x1d0] sm:$0xf0]  ;;  %v4169_v39 = vadd.f32 %v11309_v7, %v965_v22 }
 0x34f   :  { %5989 = vmatpush.bf16.msrb.mxu0 %v9466_v21  ;;  %5969 = vmatpush.bf16.msra.mxu2 %v9114_v0  ;;  %v9530_v21 = vor.u32 %v10701_v14, %v9529_v12  ;;  %v4143_v0 = vadd.f32 %v11282_v61, %v4130_v11  ;;  %v9641_v61 = vld [vmem:[#allocation9 + $0x640] sm:$0xf]  ;;  %v10721_v12 = vld [vmem:[#allocation9 + $0x60c] sm:$0xf0]  ;;  %v10619_v14 = vld [vmem:[#allocation9 + $0x2e4] sm:$0xf]  ;;  %v9070_v11 = vor.u32 %v10583_v1, %v9067_v6 }
 0x350   :  { %5958 = vmatmul.bf16.vlgmr.msra.gmra.mxu1 %v11293_v31  ;;  %v10615_v29 = vld [vmem:[#allocation9 + $0x2c4] sm:$0xf]  ;;  %v9035_v43 = vld [vmem:[#allocation9 + $0x190] sm:$0xf0]  ;;  %v9817_v48 = vld [vmem:[#allocation9 + $0x7a0] sm:$0xf] }
 0x351   :  { %6002 = vmatpush.bf16.msrb.mxu1 %v9594_v47  ;;  %5982 = vmatpush.bf16.msra.mxu3 %v9242_v23  ;;  %v10665_v47 = vld [vmem:[#allocation9 + $0x44c] sm:$0xf0]  ;;  %v9657_v23 = vld [vmem:[#allocation9 + $0x660] sm:$0xf]  ;;  %v4156_v16 = vadd.f32 %v11287_v63, %v4143_v0  ;;  %v11317_v51 = vpop.f32.mrf.mxu2  ;;  %v11319_v37 = vpop.f32.mrf.mxu3  ;;  %v10547_v0 = vld [vmem:[#allocation9 + $0xa4] sm:$0xf] }
 0x352   :  { %v9386_v24 = vor.u32 %v10665_v47, %v9385_v20  ;;  %v9658_v30 = vor.u32 %v10733_v25, %v9657_v23  ;;  %v9214_v25 = vor.u32 %v10619_v14, %v9211_v15  ;;  %v10575_v42 = vld [vmem:[#allocation9 + $0x184] sm:$0xf]  ;;  %v8891_v50 = vld [vmem:[#allocation9 + $0x70] sm:$0xf0] }
 0x353   :  { %5990 = vmatpush.bf16.msrb.mxu0 %v9450_v33  ;;  %5970 = vmatpush.bf16.msra.mxu2 %v9098_v36  ;;  %v10693_v33 = vld [vmem:[#allocation9 + $0x52c] sm:$0xf0]  ;;  %v4371_v36 = vmul.f32 0.1, %v11255_v19  ;;  %v4372_v63 = vmul.f32 0.1, %v4156_v16 }
 0x354   :  { %v10571_v7 = vld [vmem:[#allocation9 + $0x164] sm:$0xf]  ;;  %v9003_v15 = vld [vmem:[#allocation9 + $0x150] sm:$0xf0] }
 0x355   :  { %6003 = vmatpush.bf16.msrb.mxu1 %v9578_v35  ;;  %5983 = vmatpush.bf16.msra.mxu3 %v9226_v46  ;;  %v10729_v35 = vld [vmem:[#allocation9 + $0x64c] sm:$0xf0]  ;;  %v9498_v46 = vor.u32 %v10693_v33, %v9497_v60  ;;  %v4380_v62 = vmax.f32 %v4156_v16, %v4372_v63  ;;  %v9195_v16 = vld [vmem:[#allocation9 + $0x2d0] sm:$0xf0]  ;;  %v9833_v60 = vld [vmem:[#allocation9 + $0x7c0] sm:$0xf]  ;;  %v9038_v63 = vor.u32 %v10575_v42, %v9035_v43 }
 0x356   :  { %5971 = vmatmul.bf16.vlgmr.msra.gmra.mxu2 %v11301_v54  ;;  %v9642_v49 = vor.u32 %v10729_v35, %v9641_v61  ;;  %v10777_v33 = vld [vmem:[#allocation9 + $0x7cc] sm:$0xf0]  ;;  %v10543_v61 = vld [vmem:[#allocation9 + $0x84] sm:$0xf]  ;;  %v8907_v35 = vld [vmem:[#allocation9 + $0x90] sm:$0xf0] }
 0x357   :  { %6015 = vmatpush.bf16.msrb.mxu2 %v9722_v9  ;;  %5991 = vmatpush.bf16.msrb.mxu0 %v9434_v52  ;;  %v9481_v9 = vld [vmem:[#allocation9 + $0x500] sm:$0xf]  ;;  %v9083_v52 = vld [vmem:[#allocation9 + $0x1f0] sm:$0xf0]  ;;  %v11324_v20 = vpack.c.bf16 %v4380_v62, %v4380_v62  ;;  %v4233_v62 = vpop.f32.mrf.mxu1  ;;  %v10535_v6 = vld [vmem:[#allocation9 + $0x44] sm:$0xf] }
 0x358   :  { %5984 = vmatmul.bf16.vlgmr.msra.gmra.mxu3 %v11304_v59  ;;  %v9482_v10 = vor.u32 %v10689_v18, %v9481_v9  ;;  %v9086_v32 = vor.u32 %v10587_v5, %v9083_v52  ;;  %v9179_v9 = vld [vmem:[#allocation9 + $0x2b0] sm:$0xf0]  ;;  %v8910_v18 = vor.u32 %v10543_v61, %v8907_v35  ;;  %v10773_v5 = vld [vmem:[#allocation9 + $0x7ac] sm:$0xf0]  ;;  %v4182_v52 = vadd.f32 %v11312_v13, %v4169_v39  ;;  %v10567_v14 = vld [vmem:[#allocation9 + $0x144] sm:$0xf] }
 0x359   :  { %6004 = vmatpush.bf16.msrb.mxu1 %v9562_v2  ;;  %v9625_v2 = vld [vmem:[#allocation9 + $0x620] sm:$0xf]  ;;  %v4196_v23 = vpop.f32.mrf.mxu2  ;;  %v4209_v26 = vpop.f32.mrf.mxu3  ;;  %v8875_v13 = vld [vmem:[#allocation9 + $0x50] sm:$0xf0] }
 0x35a   :  { %v8843_v35 = vld [vmem:[#allocation9 + $0x10] sm:$0xf0] }
 0x35b   :  { %6016 = vmatpush.bf16.msrb.mxu2 %v9706_v56  ;;  %5992 = vmatpush.bf16.msrb.mxu0 %v9418_v38  ;;  %v4379_v56 = vmax.f32 %v11255_v19, %v4371_v36  ;;  %v9626_v38 = vor.u32 %v10725_v53, %v9625_v2  ;;  %v9834_v36 = vor.u32 %v10777_v33, %v9833_v60  ;;  %v9019_v53 = vld [vmem:[#allocation9 + $0x170] sm:$0xf0]  ;;  %v10527_v60 = vld [vmem:[#allocation9 + $0x4] sm:$0xf]  ;;  %v9769_v33 = vld [vmem:[#allocation9 + $0x740] sm:$0xf] }
 0x35c   :  { %v9022_v1 = vor.u32 %v10571_v7, %v9019_v53  ;;  %v8971_v39 = vld [vmem:[#allocation9 + $0x110] sm:$0xf0]  ;;  %v9753_v7 = vld [vmem:[#allocation9 + $0x720] sm:$0xf]  ;;  %v10757_v53 = vld [vmem:[#allocation9 + $0x72c] sm:$0xf0] }
 0x35d   :  { %6005 = vmatpush.bf16.msrb.mxu1 %v9546_v4  ;;  %v8939_v4 = vld [vmem:[#allocation9 + $0xd0] sm:$0xf0]  ;;  %v11322_v17 = vpack.c.bf16 %v4379_v56, %v4379_v56  ;;  %v4220_v56 = vpop.f32.mrf.mxu0 }
 0x35e   :  { %v8942_v19 = vor.u32 %v10551_v27, %v8939_v4  ;;  %v4195_v27 = vadd.f32 %v11317_v51, %v4182_v52  ;;  %v10769_v4 = vld [vmem:[#allocation9 + $0x78c] sm:$0xf0]  ;;  %v8878_v51 = vor.u32 %v10535_v6, %v8875_v13  ;;  %v10591_v6 = vld [vmem:[#allocation9 + $0x204] sm:$0xf]  ;;  %v9099_v13 = vld [vmem:[#allocation9 + $0x210] sm:$0xf0] }
 0x35f   :  { %6017 = vmatpush.bf16.msrb.mxu2 %v9690_v8  ;;  %5993 = vmatpush.bf16.msrb.mxu0 %v9402_v58  ;;  %v9609_v8 = vld [vmem:[#allocation9 + $0x600] sm:$0xf] }
 0x360   :  { %v9849_v58 = vld [vmem:[#allocation9 + $0x7e0] sm:$0xf]  ;;  %v9610_v47 = vor.u32 %v10721_v12, %v9609_v8 }
 0x361   :  { %6006 = vmatpush.bf16.msrb.mxu1 %v9530_v21  ;;  %v10781_v21 = vld [vmem:[#allocation9 + $0x7ec] sm:$0xf0]  ;;  %v4259_v52 = vpop.f32.mrf.mxu3 }
 0x362   :  { %v9850_v3 = vor.u32 %v10781_v21, %v9849_v58  ;;  %v4208_v58 = vadd.f32 %v11319_v37, %v4195_v27  ;;  %v9785_v21 = vld [vmem:[#allocation9 + $0x760] sm:$0xf] }
 0x363   :  { %6018 = vmatpush.bf16.msrb.mxu2 %v9674_v57  ;;  %5994 = vmatpush.bf16.msrb.mxu0 %v9386_v24  ;;  %v8923_v57 = vld [vmem:[#allocation9 + $0xb0] sm:$0xf0]  ;;  %v10579_v24 = vld [vmem:[#allocation9 + $0x1a4] sm:$0xf] }
 0x364   :  { %6028 = vmatpush.bf16.msrb.mxu3 %v9850_v3  ;;  %v8859_v3 = vld [vmem:[#allocation9 + $0x30] sm:$0xf0]  ;;  %v4221_v23 = vadd.f32 %v4220_v56, %v4208_v58  ;;  %v10675_v58 = vld [vmem:[#allocation9 + $0x4a4] sm:$0xf] }
 0x365   :  { %6007 = vmatpush.bf16.msrb.mxu1 %v9514_v44  ;;  %v9051_v44 = vld [vmem:[#allocation9 + $0x1b0] sm:$0xf0]  ;;  %v4222_v26 = vpop.f32.mrf.mxu0 }
 0x366   :  { %v9054_v34 = vor.u32 %v10579_v24, %v9051_v44  ;;  %v10563_v24 = vld [vmem:[#allocation9 + $0x124] sm:$0xf]  ;;  %v8987_v44 = vld [vmem:[#allocation9 + $0x130] sm:$0xf0]  ;;  %v4234_v42 = vadd.f32 %v4233_v62, %v4221_v23  ;;  %v9102_v23 = vor.u32 %v10591_v6, %v9099_v13 }
 0x367   :  { %6019 = vmatpush.bf16.msrb.mxu2 %v9658_v30  ;;  %5995 = vmatpush.bf16.msrb.mxu0 %v9370_v41  ;;  %v8926_v30 = vor.u32 %v10547_v0, %v8923_v57  ;;  %v9198_v41 = vor.u32 %v10615_v29, %v9195_v16  ;;  %v9006_v0 = vor.u32 %v10567_v14, %v9003_v15  ;;  %v10531_v57 = vld [vmem:[#allocation9 + $0x24] sm:$0xf]  ;;  %v9131_v16 = vld [vmem:[#allocation9 + $0x250] sm:$0xf0]  ;;  %v10753_v14 = vld [vmem:[#allocation9 + $0x70c] sm:$0xf0] }
 0x368   :  { %6029 = vmatpush.bf16.msrb.mxu3 %v9834_v36  ;;  %v10599_v29 = vld [vmem:[#allocation9 + $0x244] sm:$0xf]  ;;  %v8862_v37 = vor.u32 %v10531_v57, %v8859_v3  ;;  %v8990_v61 = vor.u32 %v10563_v24, %v8987_v44  ;;  %v9339_v3 = vld [vmem:[#allocation9 + $0x3f0] sm:$0xf0] }
 0x369   :  { %6008 = vmatpush.bf16.msrb.mxu1 %v9498_v46  ;;  %v10611_v46 = vld [vmem:[#allocation9 + $0x2a4] sm:$0xf]  ;;  %v9134_v43 = vor.u32 %v10599_v29, %v9131_v16  ;;  %v9563_v24 = vld [vmem:[#allocation9 + $0x5b0] sm:$0xf0]  ;;  %v4261_v29 = vpop.f32.mrf.mxu3 }
 0x36a   :  { %v9182_v2 = vor.u32 %v10611_v46, %v9179_v9  ;;  %v10559_v36 = vld [vmem:[#allocation9 + $0x104] sm:$0xf]  ;;  %v9467_v9 = vld [vmem:[#allocation9 + $0x4f0] sm:$0xf0] }
 0x36b   :  { %6020 = vmatpush.bf16.msrb.mxu2 %v9642_v49  ;;  %5996 = vmatpush.bf16.msrb.mxu0 %v9354_v55  ;;  %v10539_v49 = vld [vmem:[#allocation9 + $0x64] sm:$0xf]  ;;  %v9818_v55 = vor.u32 %v10773_v5, %v9817_v48  ;;  %v4246_v48 = vpop.f32.mrf.mxu2  ;;  %v9643_v29 = vld [vmem:[#allocation9 + $0x650] sm:$0xf0] }
 0x36c   :  { %v10683_v46 = vld [vmem:[#allocation9 + $0x4e4] sm:$0xf]  ;;  %v4247_v5 = vadd.f32 %v4246_v48, %v4234_v42 }
 0x36d   :  { %6009 = vmatpush.bf16.msrb.mxu1 %v9482_v10  ;;  %v10607_v10 = vld [vmem:[#allocation9 + $0x284] sm:$0xf]  ;;  %6030 = vmatpush.bf16.msrb.mxu3 %v9818_v55  ;;  %v8974_v55 = vor.u32 %v10559_v36, %v8971_v39  ;;  %v9470_v56 = vor.u32 %v10683_v46, %v9467_v9  ;;  %v9323_v36 = vld [vmem:[#allocation9 + $0x3d0] sm:$0xf0] }
 0x36e   :  { %5997 = vmatmul.bf16.vlgmr.msrb.gmra.mxu0 %v11322_v17  ;;  %v10651_v57 = vld [vmem:[#allocation9 + $0x3e4] sm:$0xf] }
 0x36f   :  { %6041 = vmatpush.bf16.msra.mxu0 %v8958_v45  ;;  %6021 = vmatpush.bf16.msrb.mxu2 %v9626_v38  ;;  %v9163_v45 = vld [vmem:[#allocation9 + $0x290] sm:$0xf0]  ;;  %v9801_v38 = vld [vmem:[#allocation9 + $0x780] sm:$0xf]  ;;  %v9342_v44 = vor.u32 %v10651_v57, %v9339_v3  ;;  %v10703_v39 = vld [vmem:[#allocation9 + $0x584] sm:$0xf] }
 0x370   :  { %6010 = vmatmul.bf16.vlgmr.msrb.gmra.mxu1 %v11324_v20  ;;  %v9802_v8 = vor.u32 %v10769_v4, %v9801_v38  ;;  %v9166_v12 = vor.u32 %v10607_v10, %v9163_v45  ;;  %v9754_v10 = vor.u32 %v10757_v53, %v9753_v7  ;;  %v4260_v45 = vadd.f32 %v4259_v52, %v4247_v5  ;;  %v9451_v38 = vld [vmem:[#allocation9 + $0x4d0] sm:$0xf0]  ;;  %v10711_v4 = vld [vmem:[#allocation9 + $0x5c4] sm:$0xf]  ;;  %v11338_v53 = vpop.f32.mrf.mxu0 }
 0x371   :  { %6054 = vmatpush.bf16.msra.mxu1 %v9086_v32  ;;  %v8894_v32 = vor.u32 %v10539_v49, %v8891_v50  ;;  %v10595_v49 = vld [vmem:[#allocation9 + $0x224] sm:$0xf]  ;;  %v9115_v50 = vld [vmem:[#allocation9 + $0x230] sm:$0xf0] }
 0x372   :  { %6031 = vmatpush.bf16.msrb.mxu3 %v9802_v8  ;;  %v9118_v62 = vor.u32 %v10595_v49, %v9115_v50  ;;  %v4373_v8 = vmul.f32 0.1, %v4260_v45  ;;  %v10739_v46 = vld [vmem:[#allocation9 + $0x6a4] sm:$0xf]  ;;  %v9403_v5 = vld [vmem:[#allocation9 + $0x470] sm:$0xf0] }
 0x373   :  { %6042 = vmatpush.bf16.msra.mxu0 %v8942_v19  ;;  %6022 = vmatpush.bf16.msrb.mxu2 %v9610_v47  ;;  %v10603_v19 = vld [vmem:[#allocation9 + $0x264] sm:$0xf]  ;;  %v10765_v47 = vld [vmem:[#allocation9 + $0x76c] sm:$0xf0]  ;;  %v9531_v7 = vld [vmem:[#allocation9 + $0x570] sm:$0xf0] }
 0x374   :  { %v9786_v22 = vor.u32 %v10765_v47, %v9785_v21  ;;  %v4381_v21 = vmax.f32 %v4260_v45, %v4373_v8  ;;  %v10643_v48 = vld [vmem:[#allocation9 + $0x3a4] sm:$0xf]  ;;  %v9515_v8 = vld [vmem:[#allocation9 + $0x550] sm:$0xf0] }
 0x375   :  { %6055 = vmatpush.bf16.msra.mxu1 %v9070_v11  ;;  %v9147_v11 = vld [vmem:[#allocation9 + $0x270] sm:$0xf0]  ;;  %v10667_v50 = vld [vmem:[#allocation9 + $0x464] sm:$0xf] }
 0x376   :  { %6032 = vmatpush.bf16.msrb.mxu3 %v9786_v22  ;;  %v4248_v22 = vpop.f32.mrf.mxu2  ;;  %v11334_v26 = vpack.c.bf16 %v4381_v21, %v4381_v21  ;;  %v9406_v45 = vor.u32 %v10667_v50, %v9403_v5  ;;  %v10695_v13 = vld [vmem:[#allocation9 + $0x544] sm:$0xf]  ;;  %v9499_v3 = vld [vmem:[#allocation9 + $0x530] sm:$0xf0] }
 0x377   :  { %6067 = vmatpush.bf16.msra.mxu2 %v9214_v25  ;;  %6043 = vmatpush.bf16.msra.mxu0 %v8926_v30  ;;  %v9150_v25 = vor.u32 %v10603_v19, %v9147_v11  ;;  %v4235_v30 = vpop.f32.mrf.mxu1  ;;  %v10747_v19 = vld [vmem:[#allocation9 + $0x6e4] sm:$0xf]  ;;  %v9723_v11 = vld [vmem:[#allocation9 + $0x6f0] sm:$0xf0] }
 0x378   :  { %v9726_v16 = vor.u32 %v10747_v19, %v9723_v11  ;;  %6023 = vmatmul.bf16.vlgmr.msrb.gmra.mxu2 %v11334_v26  ;;  %v9659_v19 = vld [vmem:[#allocation9 + $0x670] sm:$0xf0]  ;;  %v10635_v11 = vld [vmem:[#allocation9 + $0x364] sm:$0xf]  ;;  %v4274_v22 = vpop.f32.mrf.mxu0 }
 0x379   :  { %6056 = vmatpush.bf16.msra.mxu1 %v9054_v34  ;;  %v10761_v34 = vld [vmem:[#allocation9 + $0x74c] sm:$0xf0]  ;;  %v10659_v21 = vld [vmem:[#allocation9 + $0x424] sm:$0xf]  ;;  %v9243_v50 = vld [vmem:[#allocation9 + $0x330] sm:$0xf0] }
 0x37a   :  { %v10691_v57 = vld [vmem:[#allocation9 + $0x524] sm:$0xf]  ;;  %v9201_v22 = vld [vmem:[#allocation9 + $0x2c8] sm:$0xf] }
 0x37b   :  { %6068 = vmatpush.bf16.msra.mxu2 %v9198_v41  ;;  %6044 = vmatpush.bf16.msra.mxu0 %v8910_v18  ;;  %v9770_v41 = vor.u32 %v10761_v34, %v9769_v33  ;;  %v10715_v18 = vld [vmem:[#allocation9 + $0x5e4] sm:$0xf] }
 0x37c   :  { %v10647_v33 = vld [vmem:[#allocation9 + $0x3c4] sm:$0xf] }
 0x37d   :  { %6057 = vmatpush.bf16.msra.mxu1 %v9038_v63  ;;  %v9595_v63 = vld [vmem:[#allocation9 + $0x5f0] sm:$0xf0]  ;;  %6033 = vmatpush.bf16.msrb.mxu3 %v9770_v41  ;;  %v9326_v42 = vor.u32 %v10647_v33, %v9323_v36  ;;  %v8961_v36 = vld [vmem:[#allocation9 + $0xe8] sm:$0xf] }
 0x37e   :  { %v9598_v27 = vor.u32 %v10715_v18, %v9595_v63  ;;  %v9547_v41 = vld [vmem:[#allocation9 + $0x590] sm:$0xf0] }
 0x37f   :  { %6069 = vmatpush.bf16.msra.mxu2 %v9182_v2  ;;  %6045 = vmatpush.bf16.msra.mxu0 %v8894_v32  ;;  %v8846_v2 = vor.u32 %v10527_v60, %v8843_v35  ;;  %v10679_v32 = vld [vmem:[#allocation9 + $0x4c4] sm:$0xf]  ;;  %v9707_v60 = vld [vmem:[#allocation9 + $0x6d0] sm:$0xf0]  ;;  %v9550_v49 = vor.u32 %v10703_v39, %v9547_v41  ;;  %v10558_v39 = vld [vmem:[#allocation9 + $0xf4] sm:$0xf0] }
 0x380   :  { %v9454_v15 = vor.u32 %v10679_v32, %v9451_v38  ;;  %v9419_v35 = vld [vmem:[#allocation9 + $0x490] sm:$0xf0] }
 0x381   :  { %6058 = vmatpush.bf16.msra.mxu1 %v9022_v1  ;;  %v9579_v1 = vld [vmem:[#allocation9 + $0x5d0] sm:$0xf0]  ;;  %6034 = vmatpush.bf16.msrb.mxu3 %v9754_v10  ;;  %v11340_v10 = vpop.f32.mrf.mxu1  ;;  %v11343_v41 = vpop.f32.mrf.mxu2 }
 0x382   :  { %v9582_v47 = vor.u32 %v10711_v4, %v9579_v1  ;;  %v9691_v18 = vld [vmem:[#allocation9 + $0x6b0] sm:$0xf0]  ;;  %v10663_v4 = vld [vmem:[#allocation9 + $0x444] sm:$0xf] }
 0x383   :  { %6070 = vmatpush.bf16.msra.mxu2 %v9166_v12  ;;  %6046 = vmatpush.bf16.msra.mxu0 %v8878_v51  ;;  %v9737_v12 = vld [vmem:[#allocation9 + $0x700] sm:$0xf]  ;;  %v9307_v63 = vld [vmem:[#allocation9 + $0x3b0] sm:$0xf0] }
 0x384   :  { %v9738_v51 = vor.u32 %v10753_v14, %v9737_v12  ;;  %v9310_v52 = vor.u32 %v10643_v48, %v9307_v63  ;;  %v9291_v32 = vld [vmem:[#allocation9 + $0x390] sm:$0xf0]  ;;  %v10731_v14 = vld [vmem:[#allocation9 + $0x664] sm:$0xf] }
 0x385   :  { %6059 = vmatpush.bf16.msra.mxu1 %v9006_v0  ;;  %v9435_v0 = vld [vmem:[#allocation9 + $0x4b0] sm:$0xf0] }
 0x386   :  { %6035 = vmatpush.bf16.msrb.mxu3 %v9738_v51  ;;  %v9438_v30 = vor.u32 %v10675_v58, %v9435_v0  ;;  %v9387_v1 = vld [vmem:[#allocation9 + $0x450] sm:$0xf0]  ;;  %v9518_v51 = vor.u32 %v10695_v13, %v9515_v8  ;;  %v9217_v13 = vld [vmem:[#allocation9 + $0x2e8] sm:$0xf]  ;;  %v10622_v8 = vld [vmem:[#allocation9 + $0x2f4] sm:$0xf0] }
 0x387   :  { %6071 = vmatpush.bf16.msra.mxu2 %v9150_v25  ;;  %6047 = vmatpush.bf16.msra.mxu0 %v8862_v37  ;;  %v10707_v25 = vld [vmem:[#allocation9 + $0x5a4] sm:$0xf]  ;;  %v9275_v58 = vld [vmem:[#allocation9 + $0x370] sm:$0xf0] }
 0x388   :  { %v10743_v37 = vld [vmem:[#allocation9 + $0x6c4] sm:$0xf]  ;;  %v9566_v34 = vor.u32 %v10707_v25, %v9563_v24  ;;  %v9278_v0 = vor.u32 %v10635_v11, %v9275_v58  ;;  %v9355_v33 = vld [vmem:[#allocation9 + $0x410] sm:$0xf0]  ;;  %v966_v11 = vperm.slane %v11279_v40, 7 }
 0x389   :  { %6060 = vmatpush.bf16.msra.mxu1 %v8990_v61  ;;  %v10671_v61 = vld [vmem:[#allocation9 + $0x484] sm:$0xf]  ;;  %v4287_v24 = vpop.f32.mrf.mxu1  ;;  %v9627_v63 = vld [vmem:[#allocation9 + $0x630] sm:$0xf0]  ;;  %v4300_v58 = vpop.f32.mrf.mxu2  ;;  %v10546_v40 = vld [vmem:[#allocation9 + $0x94] sm:$0xf0] }
 0x38a   :  { %6080 = vmatpush.bf16.msra.mxu3 %v9342_v44  ;;  %v9422_v9 = vor.u32 %v10671_v61, %v9419_v35  ;;  %v10727_v25 = vld [vmem:[#allocation9 + $0x644] sm:$0xf]  ;;  %v9483_v35 = vld [vmem:[#allocation9 + $0x510] sm:$0xf0]  ;;  %v8913_v24 = vld [vmem:[#allocation9 + $0x88] sm:$0xf] }
 0x38b   :  { %6072 = vmatpush.bf16.msra.mxu2 %v9134_v43  ;;  %6048 = vmatpush.bf16.msra.mxu0 %v8846_v2  ;;  %v9710_v43 = vor.u32 %v10743_v37, %v9707_v60  ;;  %v10699_v2 = vld [vmem:[#allocation9 + $0x564] sm:$0xf]  ;;  %v9502_v37 = vor.u32 %v10691_v57, %v9499_v3  ;;  %v9218_v57 = vor.u32 %v10622_v8, %v9217_v13  ;;  %v8977_v58 = vld [vmem:[#allocation9 + $0x108] sm:$0xf] }
 0x38c   :  { %v9534_v38 = vor.u32 %v10699_v2, %v9531_v7  ;;  %v10655_v60 = vld [vmem:[#allocation9 + $0x404] sm:$0xf] }
 0x38d   :  { %6061 = vmatpush.bf16.msra.mxu1 %v8974_v55  ;;  %v9694_v55 = vor.u32 %v10739_v46, %v9691_v18  ;;  %v10590_v46 = vld [vmem:[#allocation9 + $0x1f4] sm:$0xf0]  ;;  %v11345_v18 = vpop.f32.mrf.mxu3  ;;  %v9358_v48 = vor.u32 %v10655_v60, %v9355_v33  ;;  %v9185_v60 = vld [vmem:[#allocation9 + $0x2a8] sm:$0xf] }
 0x38e   :  { %6049 = vmatmul.bf16.vlgmr.msra.gmra.mxu0 %v11291_v28  ;;  %6081 = vmatpush.bf16.msra.mxu3 %v9326_v42  ;;  %v9646_v42 = vor.u32 %v10727_v25, %v9643_v29  ;;  %v9041_v29 = vld [vmem:[#allocation9 + $0x188] sm:$0xf]  ;;  %v10614_v33 = vld [vmem:[#allocation9 + $0x2b4] sm:$0xf0] }
 0x38f   :  { %6093 = vmatpush.bf16.msrb.mxu0 %v9470_v56  ;;  %6073 = vmatpush.bf16.msra.mxu2 %v9118_v62  ;;  %v10735_v56 = vld [vmem:[#allocation9 + $0x684] sm:$0xf] }
 0x390   :  { %6062 = vmatmul.bf16.vlgmr.msra.gmra.mxu1 %v11293_v31  ;;  %v10639_v62 = vld [vmem:[#allocation9 + $0x384] sm:$0xf] }
 0x391   :  { %6106 = vmatpush.bf16.msrb.mxu1 %v9598_v27  ;;  %v9675_v27 = vld [vmem:[#allocation9 + $0x690] sm:$0xf0]  ;;  %v9294_v6 = vor.u32 %v10639_v62, %v9291_v32  ;;  %v10586_v62 = vld [vmem:[#allocation9 + $0x1d4] sm:$0xf0]  ;;  %v10719_v32 = vld [vmem:[#allocation9 + $0x604] sm:$0xf] }
 0x392   :  { %6082 = vmatpush.bf16.msra.mxu3 %v9310_v52  ;;  %v9678_v12 = vor.u32 %v10735_v56, %v9675_v27  ;;  %v8962_v52 = vor.u32 %v10558_v39, %v8961_v36  ;;  %v10554_v56 = vld [vmem:[#allocation9 + $0xd4] sm:$0xf0]  ;;  %v9073_v27 = vld [vmem:[#allocation9 + $0x1c8] sm:$0xf] }
 0x393   :  { %6094 = vmatpush.bf16.msrb.mxu0 %v9454_v15  ;;  %6074 = vmatpush.bf16.msra.mxu2 %v9102_v23  ;;  %v9390_v15 = vor.u32 %v10663_v4, %v9387_v1  ;;  %v9662_v23 = vor.u32 %v10731_v14, %v9659_v19  ;;  %v10623_v4 = vld [vmem:[#allocation9 + $0x304] sm:$0xf]  ;;  %v9227_v1 = vld [vmem:[#allocation9 + $0x310] sm:$0xf0]  ;;  %v9074_v14 = vor.u32 %v10586_v62, %v9073_v27  ;;  %v10550_v19 = vld [vmem:[#allocation9 + $0xb4] sm:$0xf0] }
 0x394   :  { %v9025_v39 = vld [vmem:[#allocation9 + $0x168] sm:$0xf]  ;;  %v10606_v27 = vld [vmem:[#allocation9 + $0x274] sm:$0xf0] }
 0x395   :  { %6107 = vmatpush.bf16.msrb.mxu1 %v9582_v47  ;;  %v9371_v47 = vld [vmem:[#allocation9 + $0x430] sm:$0xf0]  ;;  %v8865_v62 = vld [vmem:[#allocation9 + $0x28] sm:$0xf] }
 0x396   :  { %6083 = vmatpush.bf16.msra.mxu3 %v9294_v6  ;;  %v9374_v44 = vor.u32 %v10659_v21, %v9371_v47  ;;  %6075 = vmatmul.bf16.vlgmr.msra.gmra.mxu2 %v11301_v54  ;;  %v9057_v21 = vld [vmem:[#allocation9 + $0x1a8] sm:$0xf]  ;;  %v10582_v47 = vld [vmem:[#allocation9 + $0x1b4] sm:$0xf0] }
 0x397   :  { %6119 = vmatpush.bf16.msrb.mxu2 %v9726_v16  ;;  %6095 = vmatpush.bf16.msrb.mxu0 %v9438_v30  ;;  %v10631_v16 = vld [vmem:[#allocation9 + $0x344] sm:$0xf]  ;;  %v9259_v30 = vld [vmem:[#allocation9 + $0x350] sm:$0xf0]  ;;  %v9058_v25 = vor.u32 %v10582_v47, %v9057_v21  ;;  %v10562_v21 = vld [vmem:[#allocation9 + $0x114] sm:$0xf0] }
 0x398   :  { %v9262_v61 = vor.u32 %v10631_v16, %v9259_v30  ;;  %v10578_v16 = vld [vmem:[#allocation9 + $0x194] sm:$0xf0]  ;;  %v9473_v47 = vld [vmem:[#allocation9 + $0x4e8] sm:$0xf] }
 0x399   :  { %6108 = vmatpush.bf16.msrb.mxu1 %v9566_v34  ;;  %v10687_v34 = vld [vmem:[#allocation9 + $0x504] sm:$0xf] }
 0x39a   :  { %6084 = vmatpush.bf16.msra.mxu3 %v9278_v0  ;;  %v9486_v5 = vor.u32 %v10687_v34, %v9483_v35  ;;  %v4313_v0 = vpop.f32.mrf.mxu3  ;;  %v9042_v34 = vor.u32 %v10578_v16, %v9041_v29  ;;  %v10542_v35 = vld [vmem:[#allocation9 + $0x74] sm:$0xf0]  ;;  %v8978_v16 = vor.u32 %v10562_v21, %v8977_v58  ;;  %v9819_v58 = vld [vmem:[#allocation9 + $0x7b0] sm:$0xf0] }
 0x39b   :  { %6120 = vmatpush.bf16.msrb.mxu2 %v9710_v43  ;;  %6096 = vmatpush.bf16.msrb.mxu0 %v9422_v9  ;;  %v9089_v43 = vld [vmem:[#allocation9 + $0x1e8] sm:$0xf]  ;;  %v10723_v9 = vld [vmem:[#allocation9 + $0x624] sm:$0xf]  ;;  %v10686_v0 = vld [vmem:[#allocation9 + $0x4f4] sm:$0xf0] }
 0x39c   :  { %v9090_v7 = vor.u32 %v10590_v46, %v9089_v43  ;;  %v9186_v43 = vor.u32 %v10614_v33, %v9185_v60  ;;  %v10598_v29 = vld [vmem:[#allocation9 + $0x234] sm:$0xf0]  ;;  %v9457_v33 = vld [vmem:[#allocation9 + $0x4c8] sm:$0xf] }
 0x39d   :  { %6109 = vmatpush.bf16.msrb.mxu1 %v9550_v49  ;;  %v10627_v49 = vld [vmem:[#allocation9 + $0x324] sm:$0xf] }
 0x39e   :  { %6085 = vmatpush.bf16.msra.mxu3 %v9262_v61  ;;  %v9246_v2 = vor.u32 %v10627_v49, %v9243_v50  ;;  %v8897_v61 = vld [vmem:[#allocation9 + $0x68] sm:$0xf]  ;;  %v10610_v49 = vld [vmem:[#allocation9 + $0x294] sm:$0xf0] }
 0x39f   :  { %6121 = vmatpush.bf16.msrb.mxu2 %v9694_v55  ;;  %6097 = vmatpush.bf16.msrb.mxu0 %v9406_v45  ;;  %v8945_v55 = vld [vmem:[#allocation9 + $0xc8] sm:$0xf]  ;;  %v9630_v45 = vor.u32 %v10723_v9, %v9627_v63 }
 0x3a0   :  { %v8946_v6 = vor.u32 %v10554_v56, %v8945_v55  ;;  %v9169_v63 = vld [vmem:[#allocation9 + $0x288] sm:$0xf] }
 0x3a1   :  { %6110 = vmatpush.bf16.msrb.mxu1 %v9534_v38  ;;  %v9611_v38 = vld [vmem:[#allocation9 + $0x610] sm:$0xf0] }
 0x3a2   :  { %6086 = vmatpush.bf16.msra.mxu3 %v9246_v2  ;;  %v9009_v2 = vld [vmem:[#allocation9 + $0x148] sm:$0xf] }
 0x3a3   :  { %6122 = vmatpush.bf16.msrb.mxu2 %v9678_v12  ;;  %6098 = vmatpush.bf16.msrb.mxu0 %v9390_v15  ;;  %v9230_v12 = vor.u32 %v10623_v4, %v9227_v1  ;;  %v8929_v15 = vld [vmem:[#allocation9 + $0xa8] sm:$0xf]  ;;  %v10566_v1 = vld [vmem:[#allocation9 + $0x134] sm:$0xf0] }
 0x3a4   :  { %v8930_v3 = vor.u32 %v10550_v19, %v8929_v15  ;;  %v8993_v4 = vld [vmem:[#allocation9 + $0x128] sm:$0xf]  ;;  %v10602_v15 = vld [vmem:[#allocation9 + $0x254] sm:$0xf0] }
 0x3a5   :  { %6111 = vmatpush.bf16.msrb.mxu1 %v9518_v51  ;;  %v9614_v51 = vor.u32 %v10719_v32, %v9611_v38  ;;  %v10534_v32 = vld [vmem:[#allocation9 + $0x34] sm:$0xf0]  ;;  %v8849_v19 = vld [vmem:[#allocation9 + $0x8] sm:$0xf] }
 0x3a6   :  { %6087 = vmatpush.bf16.msra.mxu3 %v9230_v12  ;;  %v8866_v12 = vor.u32 %v10534_v32, %v8865_v62  ;;  %v10775_v62 = vld [vmem:[#allocation9 + $0x7c4] sm:$0xf]  ;;  %v9835_v32 = vld [vmem:[#allocation9 + $0x7d0] sm:$0xf0] }
 0x3a7   :  { %6123 = vmatpush.bf16.msrb.mxu2 %v9662_v23  ;;  %6099 = vmatpush.bf16.msrb.mxu0 %v9374_v44  ;;  %v10618_v23 = vld [vmem:[#allocation9 + $0x2d4] sm:$0xf0]  ;;  %v4273_v44 = vadd.f32 %v11338_v53, %v966_v11 }
 0x3a8   :  { %v9202_v30 = vor.u32 %v10618_v23, %v9201_v22  ;;  %v10530_v11 = vld [vmem:[#allocation9 + $0x14] sm:$0xf0]  ;;  %v9601_v22 = vld [vmem:[#allocation9 + $0x5e8] sm:$0xf] }
 0x3a9   :  { %6112 = vmatpush.bf16.msrb.mxu1 %v9502_v37  ;;  %v8914_v37 = vor.u32 %v10546_v40, %v8913_v24  ;;  %v4286_v36 = vadd.f32 %v11340_v10, %v4273_v44  ;;  %v9170_v10 = vor.u32 %v10610_v49, %v9169_v63  ;;  %v10718_v23 = vld [vmem:[#allocation9 + $0x5f4] sm:$0xf0]  ;;  %v8850_v40 = vor.u32 %v10530_v11, %v8849_v19  ;;  %v9121_v44 = vld [vmem:[#allocation9 + $0x228] sm:$0xf]  ;;  %v10771_v11 = vld [vmem:[#allocation9 + $0x7a4] sm:$0xf] }
 0x3aa   :  { %v9602_v60 = vor.u32 %v10718_v23, %v9601_v22  ;;  %v10750_v63 = vld [vmem:[#allocation9 + $0x6f4] sm:$0xf0]  ;;  %v9822_v23 = vor.u32 %v10771_v11, %v9819_v58  ;;  %v10556_v11 = vld [vmem:[#allocation9 + $0xec] sm:$0xf]  ;;  %v8963_v58 = vld [vmem:[#allocation9 + $0xf8] sm:$0xf0] }
 0x3ab   :  { %6124 = vmatpush.bf16.msrb.mxu2 %v9646_v42  ;;  %6100 = vmatpush.bf16.msrb.mxu0 %v9358_v48  ;;  %v10574_v42 = vld [vmem:[#allocation9 + $0x174] sm:$0xf0]  ;;  %v4324_v53 = vpop.f32.mrf.mxu0  ;;  %v4299_v46 = vadd.f32 %v11343_v41, %v4286_v36  ;;  %v8898_v48 = vor.u32 %v10542_v35, %v8897_v61  ;;  %v9585_v61 = vld [vmem:[#allocation9 + $0x5c8] sm:$0xf]  ;;  %v9122_v35 = vor.u32 %v10598_v29, %v9121_v44  ;;  %v10767_v29 = vld [vmem:[#allocation9 + $0x784] sm:$0xf] }
 0x3ac   :  { %v9026_v50 = vor.u32 %v10574_v42, %v9025_v39  ;;  %v10714_v36 = vld [vmem:[#allocation9 + $0x5d4] sm:$0xf0]  ;;  %v10779_v39 = vld [vmem:[#allocation9 + $0x7e4] sm:$0xf]  ;;  %v9851_v42 = vld [vmem:[#allocation9 + $0x7f0] sm:$0xf0] }
 0x3ad   :  { %6113 = vmatpush.bf16.msrb.mxu1 %v9486_v5  ;;  %v4337_v9 = vpop.f32.mrf.mxu1  ;;  %v8881_v5 = vld [vmem:[#allocation9 + $0x48] sm:$0xf]  ;;  %v4312_v55 = vadd.f32 %v11345_v18, %v4299_v46  ;;  %v8994_v18 = vor.u32 %v10566_v1, %v8993_v4  ;;  %v10594_v46 = vld [vmem:[#allocation9 + $0x214] sm:$0xf0] }
 0x3ae   :  { %6101 = vmatmul.bf16.vlgmr.msrb.gmra.mxu0 %v11322_v17  ;;  %v9713_v4 = vld [vmem:[#allocation9 + $0x6c8] sm:$0xf]  ;;  %v10746_v1 = vld [vmem:[#allocation9 + $0x6d4] sm:$0xf0] }
 0x3af   :  { %6145 = vmatpush.bf16.msra.mxu0 %v8962_v52  ;;  %6125 = vmatpush.bf16.msrb.mxu2 %v9630_v45  ;;  %v10538_v52 = vld [vmem:[#allocation9 + $0x54] sm:$0xf0]  ;;  %v9153_v45 = vld [vmem:[#allocation9 + $0x268] sm:$0xf]  ;;  %v4325_v38 = vadd.f32 %v4324_v53, %v4312_v55  ;;  %v9714_v19 = vor.u32 %v10746_v1, %v9713_v4 }
 0x3b0   :  { %6114 = vmatmul.bf16.vlgmr.msrb.gmra.mxu1 %v11324_v20  ;;  %v8882_v56 = vor.u32 %v10538_v52, %v8881_v5  ;;  %v9154_v13 = vor.u32 %v10606_v27, %v9153_v45  ;;  %v9441_v5 = vld [vmem:[#allocation9 + $0x4a8] sm:$0xf]  ;;  %v10678_v52 = vld [vmem:[#allocation9 + $0x4b4] sm:$0xf0] }
 0x3b1   :  { %6158 = vmatpush.bf16.msra.mxu1 %v9090_v7  ;;  %v10570_v7 = vld [vmem:[#allocation9 + $0x154] sm:$0xf0]  ;;  %v9569_v55 = vld [vmem:[#allocation9 + $0x5a8] sm:$0xf] }
 0x3b2   :  { %v9010_v41 = vor.u32 %v10570_v7, %v9009_v2  ;;  %v9854_v7 = vor.u32 %v10779_v39, %v9851_v42  ;;  %v10670_v22 = vld [vmem:[#allocation9 + $0x474] sm:$0xf0]  ;;  %v9649_v4 = vld [vmem:[#allocation9 + $0x648] sm:$0xf] }
 0x3b3   :  { %6146 = vmatpush.bf16.msra.mxu0 %v8946_v6  ;;  %6126 = vmatpush.bf16.msrb.mxu2 %v9614_v51  ;;  %v4326_v6 = vpop.f32.mrf.mxu0  ;;  %v4338_v51 = vadd.f32 %v4337_v9, %v4325_v38  ;;  %v9442_v38 = vor.u32 %v10678_v52, %v9441_v5  ;;  %v9377_v52 = vld [vmem:[#allocation9 + $0x428] sm:$0xf]  ;;  %v10730_v1 = vld [vmem:[#allocation9 + $0x654] sm:$0xf0] }
 0x3b5   :  { %6159 = vmatpush.bf16.msra.mxu1 %v9074_v14  ;;  %v4339_v8 = vpop.f32.mrf.mxu1  ;;  %v9137_v14 = vld [vmem:[#allocation9 + $0x248] sm:$0xf] }
 0x3b6   :  { %6127 = vmatmul.bf16.vlgmr.msrb.gmra.mxu2 %v11334_v26  ;;  %v9425_v8 = vld [vmem:[#allocation9 + $0x488] sm:$0xf] }
 0x3b7   :  { %6171 = vmatpush.bf16.msra.mxu2 %v9218_v57  ;;  %6147 = vmatpush.bf16.msra.mxu0 %v8930_v3  ;;  %v9138_v3 = vor.u32 %v10602_v15, %v9137_v14  ;;  %v9838_v14 = vor.u32 %v10775_v62, %v9835_v32  ;;  %v9553_v15 = vld [vmem:[#allocation9 + $0x588] sm:$0xf]  ;;  %v9771_v62 = vld [vmem:[#allocation9 + $0x750] sm:$0xf0] }
 0x3b9   :  { %6160 = vmatpush.bf16.msra.mxu1 %v9058_v25  ;;  %v4350_v57 = vpop.f32.mrf.mxu2 }
 0x3ba   :  { %v4351_v25 = vadd.f32 %v4350_v57, %v4338_v51 }
 0x3bb   :  { %6172 = vmatpush.bf16.msra.mxu2 %v9202_v30  ;;  %6148 = vmatpush.bf16.msra.mxu0 %v8914_v37  ;;  %v4363_v24 = vpop.f32.mrf.mxu3  ;;  %v9474_v30 = vor.u32 %v10686_v0, %v9473_v47  ;;  %v9697_v47 = vld [vmem:[#allocation9 + $0x6a8] sm:$0xf]  ;;  %v10742_v0 = vld [vmem:[#allocation9 + $0x6b4] sm:$0xf0] }
 0x3bc   :  { %v4364_v37 = vadd.f32 %v4363_v24, %v4351_v25  ;;  %v9537_v25 = vld [vmem:[#allocation9 + $0x568] sm:$0xf]  ;;  %v10702_v24 = vld [vmem:[#allocation9 + $0x574] sm:$0xf0]  ;;  %v9698_v44 = vor.u32 %v10742_v0, %v9697_v47  ;;  %v9755_v47 = vld [vmem:[#allocation9 + $0x730] sm:$0xf0] }
 0x3bd   :  { %6161 = vmatpush.bf16.msra.mxu1 %v9042_v34  ;;  %v10682_v34 = vld [vmem:[#allocation9 + $0x4d4] sm:$0xf0]  ;;  %v10588_v0 = vld [vmem:[#allocation9 + $0x1ec] sm:$0xf] }
 0x3be   :  { %v4374_v53 = vmul.f32 0.1, %v4364_v37  ;;  %v9458_v9 = vor.u32 %v10682_v34, %v9457_v33  ;;  %v9681_v33 = vld [vmem:[#allocation9 + $0x688] sm:$0xf]  ;;  %v10738_v34 = vld [vmem:[#allocation9 + $0x694] sm:$0xf0] }
 0x3bf   :  { %6173 = vmatpush.bf16.msra.mxu2 %v9186_v43  ;;  %6149 = vmatpush.bf16.msra.mxu0 %v8898_v48  ;;  %v9105_v43 = vld [vmem:[#allocation9 + $0x208] sm:$0xf] }
 0x3c0   :  { %v9729_v48 = vld [vmem:[#allocation9 + $0x6e8] sm:$0xf]  ;;  %v4382_v49 = vmax.f32 %v4364_v37, %v4374_v53 }
 0x3c1   :  { %6162 = vmatpush.bf16.msra.mxu1 %v9026_v50  ;;  %v9586_v50 = vor.u32 %v10714_v36, %v9585_v61  ;;  %v4352_v2 = vpop.f32.mrf.mxu2  ;;  %v9538_v61 = vor.u32 %v10702_v24, %v9537_v25  ;;  %v10666_v36 = vld [vmem:[#allocation9 + $0x454] sm:$0xf0]  ;;  %v9521_v53 = vld [vmem:[#allocation9 + $0x548] sm:$0xf] }
 0x3c2   :  { %v11356_v45 = vpack.c.bf16 %v4382_v49, %v4382_v49  ;;  %v9665_v49 = vld [vmem:[#allocation9 + $0x668] sm:$0xf]  ;;  %v10662_v2 = vld [vmem:[#allocation9 + $0x434] sm:$0xf0] }
 0x3c3   :  { %6174 = vmatpush.bf16.msra.mxu2 %v9170_v10  ;;  %6150 = vmatpush.bf16.msra.mxu0 %v8882_v56  ;;  %v9106_v10 = vor.u32 %v10594_v46, %v9105_v43  ;;  %v10710_v56 = vld [vmem:[#allocation9 + $0x5b4] sm:$0xf0]  ;;  %v4365_v27 = vpop.f32.mrf.mxu3  ;;  %v9682_v46 = vor.u32 %v10738_v34, %v9681_v33  ;;  %v9633_v25 = vld [vmem:[#allocation9 + $0x628] sm:$0xf]  ;;  %v10552_v33 = vld [vmem:[#allocation9 + $0xcc] sm:$0xf] }
 0x3c4   :  { %6036 = vmatmul.bf16.vlgmr.msrb.gmra.mxu3 %v11356_v45  ;;  %v9570_v6 = vor.u32 %v10710_v56, %v9569_v55  ;;  %v10698_v43 = vld [vmem:[#allocation9 + $0x554] sm:$0xf0]  ;;  %v8947_v34 = vld [vmem:[#allocation9 + $0xd8] sm:$0xf0] }
 0x3c5   :  { %6163 = vmatpush.bf16.msra.mxu1 %v9010_v41  ;;  %v9730_v41 = vor.u32 %v10750_v63, %v9729_v48  ;;  %6132 = vmatpush.bf16.msrb.mxu3 %v9854_v7  ;;  %v9787_v48 = vld [vmem:[#allocation9 + $0x770] sm:$0xf0]  ;;  %v9522_v5 = vor.u32 %v10698_v43, %v9521_v53  ;;  %v10694_v55 = vld [vmem:[#allocation9 + $0x534] sm:$0xf0]  ;;  %v9617_v53 = vld [vmem:[#allocation9 + $0x608] sm:$0xf] }
 0x3c6   :  { %v10726_v24 = vld [vmem:[#allocation9 + $0x634] sm:$0xf0] }
 0x3c7   :  { %6175 = vmatpush.bf16.msra.mxu2 %v9154_v13  ;;  %6151 = vmatpush.bf16.msra.mxu0 %v8866_v12  ;;  %v11360_v13 = vld [vmem:[#allocation10] sm:$0xf]  ;;  %v10674_v12 = vld [vmem:[#allocation9 + $0x494] sm:$0xf0] }
 0x3c8   :  { %v4649_v51 = vperm.slane %v11360_v13, 0  ;;  %v9426_v21 = vor.u32 %v10674_v12, %v9425_v8  ;;  %v10658_v12 = vld [vmem:[#allocation9 + $0x414] sm:$0xf0] }
 0x3c9   :  { %6164 = vmatpush.bf16.msra.mxu1 %v8994_v18  ;;  %v10706_v18 = vld [vmem:[#allocation9 + $0x594] sm:$0xf0]  ;;  %6133 = vmatpush.bf16.msrb.mxu3 %v9838_v14  ;;  %v9489_v14 = vld [vmem:[#allocation9 + $0x508] sm:$0xf] }
 0x3ca   :  { %v9554_v57 = vor.u32 %v10706_v18, %v9553_v15  ;;  %v10690_v15 = vld [vmem:[#allocation9 + $0x514] sm:$0xf0] }
 0x3cb   :  { %6176 = vmatpush.bf16.msra.mxu2 %v9138_v3  ;;  %6152 = vmatpush.bf16.msra.mxu0 %v8850_v40  ;;  %v9409_v3 = vld [vmem:[#allocation9 + $0x468] sm:$0xf]  ;;  %v5946_v40 = vpop.f32.mrf.mxu0  ;;  %v10722_v43 = vld [vmem:[#allocation9 + $0x614] sm:$0xf0] }
 0x3cd   :  { %6165 = vmatpush.bf16.msra.mxu1 %v8978_v16  ;;  %v9803_v16 = vld [vmem:[#allocation9 + $0x790] sm:$0xf0]  ;;  %v5959_v37 = vpop.f32.mrf.mxu1  ;;  %6134 = vmatpush.bf16.msrb.mxu3 %v9822_v23 }
 0x3ce   :  { %6153 = vmatmul.bf16.vlgmr.msra.gmra.mxu0 %v11291_v28  ;;  %v9806_v42 = vor.u32 %v10767_v29, %v9803_v16  ;;  %v10751_v29 = vld [vmem:[#allocation9 + $0x704] sm:$0xf] }
 0x3cf   :  { %6197 = vmatpush.bf16.msrb.mxu0 %v9474_v30  ;;  %6177 = vmatpush.bf16.msra.mxu2 %v9122_v35  ;;  %v5947_v30 = vadd.f32 %v5946_v40, %v4649_v51  ;;  %v9393_v35 = vld [vmem:[#allocation9 + $0x448] sm:$0xf]  ;;  %v9490_v40 = vor.u32 %v10690_v15, %v9489_v14  ;;  %v10576_v14 = vld [vmem:[#allocation9 + $0x18c] sm:$0xf]  ;;  %v9043_v15 = vld [vmem:[#allocation9 + $0x198] sm:$0xf0] }
 0x3d0   :  { %6166 = vmatmul.bf16.vlgmr.msra.gmra.mxu1 %v11293_v31  ;;  %v9394_v63 = vor.u32 %v10666_v36, %v9393_v35  ;;  %v10584_v35 = vld [vmem:[#allocation9 + $0x1cc] sm:$0xf]  ;;  %v9075_v36 = vld [vmem:[#allocation9 + $0x1d8] sm:$0xf0] }
 0x3d1   :  { %6210 = vmatpush.bf16.msrb.mxu1 %v9602_v60  ;;  %v9410_v60 = vor.u32 %v10670_v22, %v9409_v3  ;;  %v5960_v39 = vadd.f32 %v5959_v37, %v5947_v30  ;;  %6135 = vmatpush.bf16.msrb.mxu3 %v9806_v42  ;;  %v10654_v42 = vld [vmem:[#allocation9 + $0x3f4] sm:$0xf0] }
 0x3d3   :  { %6198 = vmatpush.bf16.msrb.mxu0 %v9458_v9  ;;  %6178 = vmatpush.bf16.msra.mxu2 %v9106_v10  ;;  %v10763_v9 = vld [vmem:[#allocation9 + $0x764] sm:$0xf]  ;;  %v9505_v10 = vld [vmem:[#allocation9 + $0x528] sm:$0xf]  ;;  %v5948_v56 = vpop.f32.mrf.mxu0 }
 0x3d4   :  { %v9790_v7 = vor.u32 %v10763_v9, %v9787_v48  ;;  %6088 = vmatmul.bf16.vlgmr.msra.gmra.mxu3 %v11304_v59  ;;  %v9506_v8 = vor.u32 %v10694_v55, %v9505_v10  ;;  %v10620_v9 = vld [vmem:[#allocation9 + $0x2ec] sm:$0xf]  ;;  %v9219_v48 = vld [vmem:[#allocation9 + $0x2f8] sm:$0xf0] }
 0x3d5   :  { %6211 = vmatpush.bf16.msrb.mxu1 %v9586_v50  ;;  %v10734_v50 = vld [vmem:[#allocation9 + $0x674] sm:$0xf0]  ;;  %v5961_v32 = vpop.f32.mrf.mxu1  ;;  %v10580_v10 = vld [vmem:[#allocation9 + $0x1ac] sm:$0xf]  ;;  %v9059_v55 = vld [vmem:[#allocation9 + $0x1b8] sm:$0xf0] }
 0x3d6   :  { %6179 = vmatmul.bf16.vlgmr.msra.gmra.mxu2 %v11301_v54  ;;  %v9666_v27 = vor.u32 %v10734_v50, %v9665_v49  ;;  %6136 = vmatpush.bf16.msrb.mxu3 %v9790_v7  ;;  %v9078_v49 = vor.u32 %v10584_v35, %v9075_v36  ;;  %v10548_v50 = vld [vmem:[#allocation9 + $0xac] sm:$0xf]  ;;  %v9618_v7 = vor.u32 %v10722_v43, %v9617_v53  ;;  %v8883_v35 = vld [vmem:[#allocation9 + $0x58] sm:$0xf0] }
 0x3d7   :  { %6223 = vmatpush.bf16.msrb.mxu2 %v9730_v41  ;;  %6199 = vmatpush.bf16.msrb.mxu0 %v9442_v38  ;;  %v10759_v41 = vld [vmem:[#allocation9 + $0x744] sm:$0xf]  ;;  %v9378_v38 = vor.u32 %v10662_v2, %v9377_v52  ;;  %v9011_v53 = vld [vmem:[#allocation9 + $0x158] sm:$0xf0] }
 0x3d8   :  { %v9774_v18 = vor.u32 %v10759_v41, %v9771_v62  ;;  %v9329_v41 = vld [vmem:[#allocation9 + $0x3c8] sm:$0xf]  ;;  %v10650_v62 = vld [vmem:[#allocation9 + $0x3d4] sm:$0xf0] }
 0x3d9   :  { %6212 = vmatpush.bf16.msrb.mxu1 %v9570_v6  ;;  %v9361_v6 = vld [vmem:[#allocation9 + $0x408] sm:$0xf]  ;;  %v5972_v51 = vpop.f32.mrf.mxu2 }
 0x3da   :  { %v5973_v3 = vadd.f32 %v5972_v51, %v5960_v39  ;;  %v9362_v23 = vor.u32 %v10658_v12, %v9361_v6  ;;  %6137 = vmatpush.bf16.msrb.mxu3 %v9774_v18  ;;  %v9345_v39 = vld [vmem:[#allocation9 + $0x3e8] sm:$0xf]  ;;  %v10544_v6 = vld [vmem:[#allocation9 + $0x8c] sm:$0xf]  ;;  %v9330_v12 = vor.u32 %v10650_v62, %v9329_v41 }
 0x3db   :  { %6224 = vmatpush.bf16.msrb.mxu2 %v9714_v19  ;;  %6200 = vmatpush.bf16.msrb.mxu0 %v9426_v21  ;;  %v10755_v19 = vld [vmem:[#allocation9 + $0x724] sm:$0xf]  ;;  %v9650_v21 = vor.u32 %v10730_v1, %v9649_v4  ;;  %v5985_v22 = vpop.f32.mrf.mxu3  ;;  %v9346_v2 = vor.u32 %v10654_v42, %v9345_v39  ;;  %v9203_v4 = vld [vmem:[#allocation9 + $0x2d8] sm:$0xf0]  ;;  %v9062_v1 = vor.u32 %v10580_v10, %v9059_v55  ;;  %v10612_v51 = vld [vmem:[#allocation9 + $0x2ac] sm:$0xf] }
 0x3dc   :  { %v11365_v16 = vadd.f32 %v5985_v22, %v5973_v3  ;;  %v9758_v30 = vor.u32 %v10755_v19, %v9755_v47  ;;  %v9313_v19 = vld [vmem:[#allocation9 + $0x3a8] sm:$0xf]  ;;  %v9046_v47 = vor.u32 %v10576_v14, %v9043_v15  ;;  %v10572_v22 = vld [vmem:[#allocation9 + $0x16c] sm:$0xf] }
 0x3dd   :  { %6213 = vmatpush.bf16.msrb.mxu1 %v9554_v57  ;;  %v9091_v57 = vld [vmem:[#allocation9 + $0x1f8] sm:$0xf0]  ;;  %v10568_v42 = vld [vmem:[#allocation9 + $0x14c] sm:$0xf]  ;;  %v9249_v15 = vld [vmem:[#allocation9 + $0x328] sm:$0xf] }
 0x3de   :  { %v9094_v37 = vor.u32 %v10588_v0, %v9091_v57  ;;  %6138 = vmatpush.bf16.msrb.mxu3 %v9758_v30  ;;  %v10540_v0 = vld [vmem:[#allocation9 + $0x6c] sm:$0xf]  ;;  %v8899_v57 = vld [vmem:[#allocation9 + $0x78] sm:$0xf0] }
 0x3df   :  { %6225 = vmatpush.bf16.msrb.mxu2 %v9698_v44  ;;  %6201 = vmatpush.bf16.msrb.mxu0 %v9410_v60  ;;  %v8966_v44 = vor.u32 %v10556_v11, %v8963_v58  ;;  %v9739_v60 = vld [vmem:[#allocation9 + $0x710] sm:$0xf0]  ;;  %v10646_v11 = vld [vmem:[#allocation9 + $0x3b4] sm:$0xf0] }
 0x3e0   :  { %v9314_v3 = vor.u32 %v10646_v11, %v9313_v19  ;;  %v9475_v19 = vld [vmem:[#allocation9 + $0x4f8] sm:$0xf0] }
 0x3e1   :  { %6214 = vmatpush.bf16.msrb.mxu1 %v9538_v61  ;;  %v9634_v61 = vor.u32 %v10726_v24, %v9633_v25  ;;  %v5974_v52 = vpop.f32.mrf.mxu2 }
 0x3e3   :  { %6226 = vmatpush.bf16.msrb.mxu2 %v9682_v46  ;;  %6202 = vmatpush.bf16.msrb.mxu0 %v9394_v63  ;;  %v8950_v46 = vor.u32 %v10552_v33, %v8947_v34  ;;  %v9742_v63 = vor.u32 %v10751_v29, %v9739_v60  ;;  %v5987_v56 = vpop.f32.mrf.mxu3  ;;  %v10608_v60 = vld [vmem:[#allocation9 + $0x28c] sm:$0xf]  ;;  %v9171_v33 = vld [vmem:[#allocation9 + $0x298] sm:$0xf0] }
 0x3e4   :  { %v9174_v43 = vor.u32 %v10608_v60, %v9171_v33  ;;  %v9265_v56 = vld [vmem:[#allocation9 + $0x348] sm:$0xf]  ;;  %v9587_v60 = vld [vmem:[#allocation9 + $0x5d8] sm:$0xf0] }
 0x3e5   :  { %6215 = vmatpush.bf16.msrb.mxu1 %v9522_v5  ;;  %v8931_v5 = vld [vmem:[#allocation9 + $0xb8] sm:$0xf0]  ;;  %6139 = vmatpush.bf16.msrb.mxu3 %v9742_v63  ;;  %v9857_v33 = vld [vmem:[#allocation9 + $0x7e8] sm:$0xf] }
 0x3e6   :  { %v8934_v32 = vor.u32 %v10548_v50, %v8931_v5  ;;  %v9155_v63 = vld [vmem:[#allocation9 + $0x278] sm:$0xf0]  ;;  %v10532_v50 = vld [vmem:[#allocation9 + $0x2c] sm:$0xf] }
 0x3e7   :  { %6227 = vmatpush.bf16.msrb.mxu2 %v9666_v27  ;;  %6203 = vmatpush.bf16.msrb.mxu0 %v9378_v38  ;;  %v9222_v27 = vor.u32 %v10620_v9, %v9219_v48  ;;  %v10616_v38 = vld [vmem:[#allocation9 + $0x2cc] sm:$0xf]  ;;  %v10638_v9 = vld [vmem:[#allocation9 + $0x374] sm:$0xf0]  ;;  %v8867_v5 = vld [vmem:[#allocation9 + $0x38] sm:$0xf0] }
 0x3e8   :  { %v9206_v18 = vor.u32 %v10616_v38, %v9203_v4  ;;  %6140 = vmatmul.bf16.vlgmr.msrb.gmra.mxu3 %v11356_v45  ;;  %v10604_v48 = vld [vmem:[#allocation9 + $0x26c] sm:$0xf]  ;;  %v8870_v62 = vor.u32 %v10532_v50, %v8867_v5  ;;  %v9139_v38 = vld [vmem:[#allocation9 + $0x258] sm:$0xf0] }
 0x3e9   :  { %6216 = vmatpush.bf16.msrb.mxu1 %v9506_v8  ;;  %v8915_v8 = vld [vmem:[#allocation9 + $0x98] sm:$0xf0]  ;;  %6184 = vmatpush.bf16.msra.mxu3 %v9346_v2  ;;  %v10564_v2 = vld [vmem:[#allocation9 + $0x12c] sm:$0xf]  ;;  %v9158_v55 = vor.u32 %v10604_v48, %v9155_v63 }
 0x3ea   :  { %v8918_v58 = vor.u32 %v10544_v6, %v8915_v8  ;;  %v10528_v4 = vld [vmem:[#allocation9 + $0xc] sm:$0xf]  ;;  %v8851_v6 = vld [vmem:[#allocation9 + $0x18] sm:$0xf0] }
 0x3eb   :  { %6228 = vmatpush.bf16.msrb.mxu2 %v9650_v21  ;;  %6204 = vmatpush.bf16.msrb.mxu0 %v9362_v23  ;;  %v9187_v21 = vld [vmem:[#allocation9 + $0x2b8] sm:$0xf0]  ;;  %v5998_v25 = vpop.f32.mrf.mxu0  ;;  %v10560_v8 = vld [vmem:[#allocation9 + $0x10c] sm:$0xf] }
 0x3ec   :  { %v9027_v23 = vld [vmem:[#allocation9 + $0x178] sm:$0xf0]  ;;  %v9190_v24 = vor.u32 %v10612_v51, %v9187_v21  ;;  %v5999_v29 = vadd.f32 %v5998_v25, %v11365_v16  ;;  %v10716_v51 = vld [vmem:[#allocation9 + $0x5ec] sm:$0xf] }
 0x3ed   :  { %6217 = vmatpush.bf16.msrb.mxu1 %v9490_v40  ;;  %6185 = vmatpush.bf16.msra.mxu3 %v9330_v12  ;;  %v9297_v40 = vld [vmem:[#allocation9 + $0x388] sm:$0xf]  ;;  %v6011_v30 = vpop.f32.mrf.mxu1  ;;  %v9030_v34 = vor.u32 %v10572_v22, %v9027_v23  ;;  %v8979_v12 = vld [vmem:[#allocation9 + $0x118] sm:$0xf0] }
 0x3ee   :  { %6205 = vmatmul.bf16.vlgmr.msrb.gmra.mxu0 %v11322_v17  ;;  %v11372_v36 = vadd.f32 %v6011_v30, %v5999_v29  ;;  %v9603_v21 = vld [vmem:[#allocation9 + $0x5f8] sm:$0xf0]  ;;  %v9233_v23 = vld [vmem:[#allocation9 + $0x308] sm:$0xf] }
 0x3ef   :  { %6249 = vmatpush.bf16.msra.mxu0 %v8966_v44  ;;  %6229 = vmatpush.bf16.msrb.mxu2 %v9634_v61  ;;  %v10642_v44 = vld [vmem:[#allocation9 + $0x394] sm:$0xf0]  ;;  %v10536_v61 = vld [vmem:[#allocation9 + $0x4c] sm:$0xf]  ;;  %v9459_v29 = vld [vmem:[#allocation9 + $0x4d8] sm:$0xf0] }
 0x3f0   :  { %6218 = vmatmul.bf16.vlgmr.msrb.gmra.mxu1 %v11324_v20  ;;  %v9298_v39 = vor.u32 %v10642_v44, %v9297_v40  ;;  %v8886_v16 = vor.u32 %v10536_v61, %v8883_v35  ;;  %v10626_v40 = vld [vmem:[#allocation9 + $0x314] sm:$0xf0]  ;;  %v10680_v44 = vld [vmem:[#allocation9 + $0x4cc] sm:$0xf]  ;;  %v9107_v35 = vld [vmem:[#allocation9 + $0x218] sm:$0xf0] }
 0x3f1   :  { %6262 = vmatpush.bf16.msra.mxu1 %v9094_v37  ;;  %v8902_v37 = vor.u32 %v10540_v0, %v8899_v57  ;;  %6186 = vmatpush.bf16.msra.mxu3 %v9314_v3  ;;  %v10596_v0 = vld [vmem:[#allocation9 + $0x22c] sm:$0xf]  ;;  %v9123_v57 = vld [vmem:[#allocation9 + $0x238] sm:$0xf0]  ;;  %v8982_v3 = vor.u32 %v10560_v8, %v8979_v12 }
 0x3f2   :  { %v9126_v30 = vor.u32 %v10596_v0, %v9123_v57  ;;  %v10592_v61 = vld [vmem:[#allocation9 + $0x20c] sm:$0xf]  ;;  %v9571_v50 = vld [vmem:[#allocation9 + $0x5b8] sm:$0xf0]  ;;  %v10770_v0 = vld [vmem:[#allocation9 + $0x794] sm:$0xf0] }
 0x3f3   :  { %6250 = vmatpush.bf16.msra.mxu0 %v8950_v46  ;;  %6230 = vmatpush.bf16.msrb.mxu2 %v9618_v7  ;;  %v9281_v46 = vld [vmem:[#allocation9 + $0x368] sm:$0xf]  ;;  %v8995_v7 = vld [vmem:[#allocation9 + $0x138] sm:$0xf0]  ;;  %v6000_v10 = vpop.f32.mrf.mxu0  ;;  %v9110_v63 = vor.u32 %v10592_v61, %v9107_v35  ;;  %v10740_v8 = vld [vmem:[#allocation9 + $0x6ac] sm:$0xf] }
 0x3f4   :  { %v9282_v52 = vor.u32 %v10638_v9, %v9281_v46  ;;  %v10676_v9 = vld [vmem:[#allocation9 + $0x4ac] sm:$0xf]  ;;  %v9699_v12 = vld [vmem:[#allocation9 + $0x6b8] sm:$0xf0] }
 0x3f5   :  { %6263 = vmatpush.bf16.msra.mxu1 %v9078_v49  ;;  %v9014_v49 = vor.u32 %v10568_v42, %v9011_v53  ;;  %6187 = vmatpush.bf16.msra.mxu3 %v9298_v39  ;;  %v6013_v41 = vpop.f32.mrf.mxu1  ;;  %v9462_v39 = vor.u32 %v10680_v44, %v9459_v29  ;;  %v10748_v42 = vld [vmem:[#allocation9 + $0x6ec] sm:$0xf]  ;;  %v9731_v53 = vld [vmem:[#allocation9 + $0x6f8] sm:$0xf0] }
 0x3f6   :  { %6231 = vmatmul.bf16.vlgmr.msrb.gmra.mxu2 %v11334_v26  ;;  %v9734_v5 = vor.u32 %v10748_v42, %v9731_v53  ;;  %v10744_v10 = vld [vmem:[#allocation9 + $0x6cc] sm:$0xf]  ;;  %v9427_v41 = vld [vmem:[#allocation9 + $0x498] sm:$0xf0] }
 0x3f7   :  { %6275 = vmatpush.bf16.msra.mxu2 %v9222_v27  ;;  %6251 = vmatpush.bf16.msra.mxu0 %v8934_v32  ;;  %v10634_v27 = vld [vmem:[#allocation9 + $0x354] sm:$0xf0]  ;;  %v10600_v32 = vld [vmem:[#allocation9 + $0x24c] sm:$0xf] }
 0x3f8   :  { %v9266_v14 = vor.u32 %v10634_v27, %v9265_v56  ;;  %v9142_v11 = vor.u32 %v10600_v32, %v9139_v38  ;;  %v10672_v27 = vld [vmem:[#allocation9 + $0x48c] sm:$0xf]  ;;  %v9555_v32 = vld [vmem:[#allocation9 + $0x598] sm:$0xf0] }
 0x3f9   :  { %6264 = vmatpush.bf16.msra.mxu1 %v9062_v1  ;;  %v8998_v1 = vor.u32 %v10564_v2, %v8995_v7  ;;  %6188 = vmatpush.bf16.msra.mxu3 %v9282_v52  ;;  %v9841_v52 = vld [vmem:[#allocation9 + $0x7c8] sm:$0xf]  ;;  %v10778_v2 = vld [vmem:[#allocation9 + $0x7d4] sm:$0xf0]  ;;  %v10732_v35 = vld [vmem:[#allocation9 + $0x66c] sm:$0xf] }
 0x3fa   :  { %v10660_v53 = vld [vmem:[#allocation9 + $0x42c] sm:$0xf] }
 0x3fb   :  { %6276 = vmatpush.bf16.msra.mxu2 %v9206_v18  ;;  %6252 = vmatpush.bf16.msra.mxu0 %v8918_v58  ;;  %v10684_v18 = vld [vmem:[#allocation9 + $0x4ec] sm:$0xf]  ;;  %v10630_v58 = vld [vmem:[#allocation9 + $0x334] sm:$0xf0] }
 0x3fc   :  { %v9478_v22 = vor.u32 %v10684_v18, %v9475_v19  ;;  %v9250_v25 = vor.u32 %v10630_v58, %v9249_v15  ;;  %v10668_v15 = vld [vmem:[#allocation9 + $0x46c] sm:$0xf]  ;;  %v9411_v18 = vld [vmem:[#allocation9 + $0x478] sm:$0xf0] }
 0x3fd   :  { %6265 = vmatpush.bf16.msra.mxu1 %v9046_v47  ;;  %v8854_v47 = vor.u32 %v10528_v4, %v8851_v6  ;;  %6189 = vmatpush.bf16.msra.mxu3 %v9266_v14  ;;  %v10774_v4 = vld [vmem:[#allocation9 + $0x7b4] sm:$0xf0]  ;;  %v9430_v6 = vor.u32 %v10672_v27, %v9427_v41  ;;  %v9539_v58 = vld [vmem:[#allocation9 + $0x578] sm:$0xf0] }
 0x3fe   :  { %v9363_v27 = vld [vmem:[#allocation9 + $0x418] sm:$0xf0] }
 0x3ff   :  { %6277 = vmatpush.bf16.msra.mxu2 %v9190_v24  ;;  %6253 = vmatpush.bf16.msra.mxu0 %v8902_v37  ;;  %v9606_v24 = vor.u32 %v10716_v51, %v9603_v21  ;;  %v10712_v37 = vld [vmem:[#allocation9 + $0x5cc] sm:$0xf]  ;;  %v9702_v21 = vor.u32 %v10740_v8, %v9699_v12  ;;  %v10790_v12 = vld [vmem:[#allocation12 + $0x38] sm:$0xff] }
 0x400   :  { %v9590_v46 = vor.u32 %v10712_v37, %v9587_v60  ;;  %v9523_v37 = vld [vmem:[#allocation9 + $0x558] sm:$0xf0] }
 0x401   :  { %6266 = vmatpush.bf16.msra.mxu1 %v9030_v34  ;;  %v10782_v34 = vld [vmem:[#allocation9 + $0x7f4] sm:$0xf0]  ;;  %6190 = vmatpush.bf16.msra.mxu3 %v9250_v25  ;;  %v9683_v25 = vld [vmem:[#allocation9 + $0x698] sm:$0xf0] }
 0x402   :  { %v9858_v48 = vor.u32 %v10782_v34, %v9857_v33  ;;  %v9793_v33 = vld [vmem:[#allocation9 + $0x768] sm:$0xf]  ;;  %v10766_v34 = vld [vmem:[#allocation9 + $0x774] sm:$0xf0] }
 0x403   :  { %6278 = vmatpush.bf16.msra.mxu2 %v9174_v43  ;;  %6254 = vmatpush.bf16.msra.mxu0 %v8886_v16  ;;  %v9234_v43 = vor.u32 %v10626_v40, %v9233_v23  ;;  %v9443_v16 = vld [vmem:[#allocation9 + $0x4b8] sm:$0xf0]  ;;  %v10736_v23 = vld [vmem:[#allocation9 + $0x68c] sm:$0xf] }
 0x404   :  { %v9446_v7 = vor.u32 %v10676_v9, %v9443_v16  ;;  %v9395_v40 = vld [vmem:[#allocation9 + $0x458] sm:$0xf0]  ;;  %v9686_v60 = vor.u32 %v10736_v23, %v9683_v25  ;;  %v10692_v9 = vld [vmem:[#allocation9 + $0x52c] sm:$0xf] }
 0x405   :  { %6267 = vmatpush.bf16.msra.mxu1 %v9014_v49  ;;  %v10708_v49 = vld [vmem:[#allocation9 + $0x5ac] sm:$0xf]  ;;  %6191 = vmatpush.bf16.msra.mxu3 %v9234_v43  ;;  %v9379_v43 = vld [vmem:[#allocation9 + $0x438] sm:$0xf0] }
 0x406   :  { %v9574_v56 = vor.u32 %v10708_v49, %v9571_v50  ;;  %v9507_v16 = vld [vmem:[#allocation9 + $0x538] sm:$0xf0]  ;;  %v9777_v49 = vld [vmem:[#allocation9 + $0x748] sm:$0xf]  ;;  %v10762_v50 = vld [vmem:[#allocation9 + $0x754] sm:$0xf0] }
 0x407   :  { %6279 = vmatpush.bf16.msra.mxu2 %v9158_v55  ;;  %6255 = vmatpush.bf16.msra.mxu0 %v8870_v62  ;;  %v9715_v55 = vld [vmem:[#allocation9 + $0x6d8] sm:$0xf0]  ;;  %v10704_v62 = vld [vmem:[#allocation9 + $0x58c] sm:$0xf]  ;;  %v9778_v41 = vor.u32 %v10762_v50, %v9777_v49 }
 0x408   :  { %v9718_v38 = vor.u32 %v10744_v10, %v9715_v55  ;;  %6192 = vmatmul.bf16.vlgmr.msra.gmra.mxu3 %v11304_v59  ;;  %v9558_v14 = vor.u32 %v10704_v62, %v9555_v32  ;;  %v9651_v10 = vld [vmem:[#allocation9 + $0x658] sm:$0xf0]  ;;  %v9510_v55 = vor.u32 %v10692_v9, %v9507_v16  ;;  %v10648_v23 = vld [vmem:[#allocation9 + $0x3cc] sm:$0xf] }
 0x409   :  { %6268 = vmatpush.bf16.msra.mxu1 %v8998_v1  ;;  %6236 = vmatpush.bf16.msrb.mxu3 %v9858_v48  ;;  %v4650_v1 = vperm.slane %v11360_v13, 1  ;;  %v9491_v62 = vld [vmem:[#allocation9 + $0x518] sm:$0xf0]  ;;  %v10632_v9 = vld [vmem:[#allocation9 + $0x34c] sm:$0xf] }
 0x40a   :  { %v9331_v25 = vld [vmem:[#allocation9 + $0x3d8] sm:$0xf0]  ;;  %v10628_v50 = vld [vmem:[#allocation9 + $0x32c] sm:$0xf] }
 0x40b   :  { %6280 = vmatpush.bf16.msra.mxu2 %v9142_v11  ;;  %6256 = vmatpush.bf16.msra.mxu0 %v8854_v47  ;;  %v10700_v11 = vld [vmem:[#allocation9 + $0x56c] sm:$0xf]  ;;  %v6050_v51 = vpop.f32.mrf.mxu0  ;;  %v9809_v47 = vld [vmem:[#allocation9 + $0x788] sm:$0xf]  ;;  %v9267_v16 = vld [vmem:[#allocation9 + $0x358] sm:$0xf0] }
 0x40c   :  { %v6051_v57 = vadd.f32 %v6050_v51, %v4650_v1  ;;  %v9810_v29 = vor.u32 %v10770_v0, %v9809_v47  ;;  %v10724_v1 = vld [vmem:[#allocation9 + $0x62c] sm:$0xf]  ;;  %v9347_v51 = vld [vmem:[#allocation9 + $0x3f8] sm:$0xf0]  ;;  %v10789_v0 = vld [vmem:[#allocation12 + $0x30] sm:$0xff]  ;;  %v9270_v49 = vor.u32 %v10632_v9, %v9267_v16 }
 0x40d   :  { %6269 = vmatpush.bf16.msra.mxu1 %v8982_v3  ;;  %v6063_v3 = vpop.f32.mrf.mxu1  ;;  %v9619_v47 = vld [vmem:[#allocation9 + $0x618] sm:$0xf0] }
 0x40e   :  { %6257 = vmatmul.bf16.vlgmr.msra.gmra.mxu0 %v11291_v28  ;;  %v9842_v28 = vor.u32 %v10778_v2, %v9841_v52  ;;  %v11379_v44 = vadd.f32 %v6063_v3, %v6051_v57  ;;  %v11381_v52 = vpop.f32.mrf.mxu2  ;;  %v9382_v2 = vor.u32 %v10660_v53, %v9379_v43  ;;  %v9283_v53 = vld [vmem:[#allocation9 + $0x378] sm:$0xf0]  ;;  %v10785_v43 = vld [vmem:[#allocation12 + $0x10] sm:$0xff] }
 0x40f   :  { %6301 = vmatpush.bf16.msrb.mxu0 %v9478_v22  ;;  %6281 = vmatpush.bf16.msra.mxu2 %v9126_v30  ;;  %v9414_v22 = vor.u32 %v10668_v15, %v9411_v18  ;;  %v10696_v30 = vld [vmem:[#allocation9 + $0x54c] sm:$0xf]  ;;  %v9745_v18 = vld [vmem:[#allocation9 + $0x708] sm:$0xf] }
 0x410   :  { %6270 = vmatmul.bf16.vlgmr.msra.gmra.mxu1 %v11293_v31  ;;  %v9825_v31 = vld [vmem:[#allocation9 + $0x7a8] sm:$0xf]  ;;  %6237 = vmatpush.bf16.msrb.mxu3 %v9842_v28  ;;  %v9526_v42 = vor.u32 %v10696_v30, %v9523_v37  ;;  %v10688_v28 = vld [vmem:[#allocation9 + $0x50c] sm:$0xf]  ;;  %v9315_v30 = vld [vmem:[#allocation9 + $0x3b8] sm:$0xf0] }
 0x411   :  { %6314 = vmatpush.bf16.msrb.mxu1 %v9606_v24  ;;  %v9826_v19 = vor.u32 %v10774_v4, %v9825_v31  ;;  %v10664_v24 = vld [vmem:[#allocation9 + $0x44c] sm:$0xf]  ;;  %v10758_v31 = vld [vmem:[#allocation9 + $0x734] sm:$0xf0]  ;;  %v9494_v8 = vor.u32 %v10688_v28, %v9491_v62  ;;  %v9859_v28 = vld [vmem:[#allocation9 + $0x7f8] sm:$0xf0] }
 0x412   :  { %v9398_v61 = vor.u32 %v10664_v24, %v9395_v40  ;;  %v9334_v24 = vor.u32 %v10648_v23, %v9331_v25  ;;  %v9795_v23 = vld [vmem:[#allocation9 + $0x778] sm:$0xf0]  ;;  %v10793_v25 = vld [vmem:[#allocation12 + $0x50] sm:$0xff] }
 0x413   :  { %6302 = vmatpush.bf16.msrb.mxu0 %v9462_v39  ;;  %6282 = vmatpush.bf16.msra.mxu2 %v9110_v63  ;;  %v9667_v39 = vld [vmem:[#allocation9 + $0x678] sm:$0xf0]  ;;  %v6052_v48 = vpop.f32.mrf.mxu0 }
 0x414   :  { %6238 = vmatpush.bf16.msrb.mxu3 %v9826_v19  ;;  %v9670_v63 = vor.u32 %v10732_v35, %v9667_v39  ;;  %v10754_v19 = vld [vmem:[#allocation9 + $0x714] sm:$0xf0]  ;;  %v10786_v35 = vld [vmem:[#allocation12 + $0x18] sm:$0xff] }
 0x415   :  { %6315 = vmatpush.bf16.msrb.mxu1 %v9590_v46  ;;  %v9794_v46 = vor.u32 %v10766_v34, %v9793_v33  ;;  %v9746_v57 = vor.u32 %v10754_v19, %v9745_v18  ;;  %v10640_v33 = vld [vmem:[#allocation9 + $0x38c] sm:$0xf]  ;;  %v9299_v34 = vld [vmem:[#allocation9 + $0x398] sm:$0xf0]  ;;  %v10795_v18 = vld [vmem:[#allocation12 + $0x60] sm:$0xff] }
 0x416   :  { %6283 = vmatmul.bf16.vlgmr.msra.gmra.mxu2 %v11301_v54  ;;  %v9542_v54 = vor.u32 %v10700_v11, %v9539_v58  ;;  %v10652_v11 = vld [vmem:[#allocation9 + $0x3ec] sm:$0xf]  ;;  %v6026_v58 = vpop.f32.mrf.mxu2  ;;  %v9302_v39 = vor.u32 %v10640_v33, %v9299_v34 }
 0x417   :  { %6327 = vmatpush.bf16.msrb.mxu2 %v9734_v5  ;;  %6303 = vmatpush.bf16.msrb.mxu0 %v9446_v7  ;;  %v6065_v5 = vpop.f32.mrf.mxu1  ;;  %v10728_v7 = vld [vmem:[#allocation9 + $0x64c] sm:$0xf]  ;;  %v9350_v3 = vor.u32 %v10652_v11, %v9347_v51  ;;  %v9811_v51 = vld [vmem:[#allocation9 + $0x798] sm:$0xf0] }
 0x418   :  { %6239 = vmatpush.bf16.msrb.mxu3 %v9810_v29  ;;  %v9654_v32 = vor.u32 %v10728_v7, %v9651_v10  ;;  %v10644_v29 = vld [vmem:[#allocation9 + $0x3ac] sm:$0xf]  ;;  %v9251_v5 = vld [vmem:[#allocation9 + $0x338] sm:$0xf0]  ;;  %v10783_v7 = vld [vmem:[#allocation12] sm:$0xff] }
 0x419   :  { %6316 = vmatpush.bf16.msrb.mxu1 %v9574_v56  ;;  %v10656_v56 = vld [vmem:[#allocation9 + $0x40c] sm:$0xf]  ;;  %v9254_v10 = vor.u32 %v10628_v50, %v9251_v5 }
 0x41a   :  { %v9366_v4 = vor.u32 %v10656_v56, %v9363_v27  ;;  %v10624_v56 = vld [vmem:[#allocation9 + $0x30c] sm:$0xf]  ;;  %v9235_v27 = vld [vmem:[#allocation9 + $0x318] sm:$0xf0] }
 0x41b   :  { %6328 = vmatpush.bf16.msrb.mxu2 %v9718_v38  ;;  %6304 = vmatpush.bf16.msrb.mxu0 %v9430_v6  ;;  %v9761_v38 = vld [vmem:[#allocation9 + $0x728] sm:$0xf]  ;;  %v9635_v6 = vld [vmem:[#allocation9 + $0x638] sm:$0xf0]  ;;  %v9238_v62 = vor.u32 %v10624_v56, %v9235_v27  ;;  %v10768_v58 = vld [vmem:[#allocation9 + $0x78c] sm:$0xf] }
 0x41c   :  { %6240 = vmatpush.bf16.msrb.mxu3 %v9794_v46  ;;  %v9638_v15 = vor.u32 %v10724_v1, %v9635_v6  ;;  %v9843_v1 = vld [vmem:[#allocation9 + $0x7d8] sm:$0xf0]  ;;  %v10796_v6 = vld [vmem:[#allocation12 + $0x68] sm:$0xff] }
 0x41d   :  { %6317 = vmatpush.bf16.msrb.mxu1 %v9558_v14  ;;  %v9762_v14 = vor.u32 %v10758_v31, %v9761_v38 }
 0x41e   :  { %v6076_v40 = vpop.f32.mrf.mxu2 }
 0x41f   :  { %6329 = vmatpush.bf16.msrb.mxu2 %v9702_v21  ;;  %6305 = vmatpush.bf16.msrb.mxu0 %v9414_v22  ;;  %v10720_v21 = vld [vmem:[#allocation9 + $0x60c] sm:$0xf]  ;;  %v11386_v37 = vadd.f32 %v6076_v40, %v11379_v44  ;;  %v9779_v40 = vld [vmem:[#allocation9 + $0x758] sm:$0xf0] }
 0x420   :  { %6241 = vmatpush.bf16.msrb.mxu3 %v9778_v41  ;;  %v9622_v22 = vor.u32 %v10720_v21, %v9619_v47  ;;  %v10780_v41 = vld [vmem:[#allocation9 + $0x7ec] sm:$0xf] }
 0x421   :  { %6318 = vmatpush.bf16.msrb.mxu1 %v9542_v54  ;;  %v10788_v54 = vld [vmem:[#allocation12 + $0x28] sm:$0xff]  ;;  %v9862_v38 = vor.u32 %v10780_v41, %v9859_v28 }
 0x423   :  { %6330 = vmatpush.bf16.msrb.mxu2 %v9686_v60  ;;  %6306 = vmatpush.bf16.msrb.mxu0 %v9398_v61 }
 0x424   :  { %6242 = vmatpush.bf16.msrb.mxu3 %v9762_v14  ;;  %v9827_v14 = vld [vmem:[#allocation9 + $0x7b8] sm:$0xf0] }
 0x425   :  { %6319 = vmatpush.bf16.msrb.mxu1 %v9526_v42  ;;  %v10636_v42 = vld [vmem:[#allocation9 + $0x36c] sm:$0xf] }
 0x426   :  { %v6078_v44 = vpop.f32.mrf.mxu2  ;;  %v9286_v46 = vor.u32 %v10636_v42, %v9283_v53 }
 0x427   :  { %6331 = vmatpush.bf16.msrb.mxu2 %v9670_v63  ;;  %6307 = vmatpush.bf16.msrb.mxu0 %v9382_v2  ;;  %v10784_v63 = vld [vmem:[#allocation12 + $0x8] sm:$0xff] }
 0x428   :  { %6243 = vmatpush.bf16.msrb.mxu3 %v9746_v57 }
 0x429   :  { %6320 = vmatpush.bf16.msrb.mxu1 %v9510_v55  ;;  %v10798_v55 = vld [vmem:[#allocation12 + $0x78] sm:$0xff] }
 0x42b   :  { %6332 = vmatpush.bf16.msrb.mxu2 %v9654_v32  ;;  %6308 = vmatpush.bf16.msrb.mxu0 %v9366_v4  ;;  %v11390_v60 = vpop.f32.mrf.mxu0  ;;  %v10797_v32 = vld [vmem:[#allocation12 + $0x70] sm:$0xff]  ;;  %v10776_v4 = vld [vmem:[#allocation9 + $0x7cc] sm:$0xf] }
 0x42c   :  { %6288 = vmatpush.bf16.msra.mxu3 %v9350_v3  ;;  %v9814_v3 = vor.u32 %v10768_v58, %v9811_v51 }
 0x42d   :  { %6321 = vmatpush.bf16.msrb.mxu1 %v9494_v8  ;;  %6244 = vmatmul.bf16.vlgmr.msrb.gmra.mxu3 %v11356_v45  ;;  %v11392_v61 = vpop.f32.mrf.mxu1  ;;  %v9846_v8 = vor.u32 %v10776_v4, %v9843_v1  ;;  %v10805_v4 = vld [vmem:[#allocation12 + $0xb0] sm:$0xff] }
 0x42e   :  { %6309 = vmatmul.bf16.vlgmr.msrb.gmra.mxu0 %v11322_v17  ;;  %v10787_v17 = vld [vmem:[#allocation12 + $0x20] sm:$0xff] }
 0x42f   :  { %6625 = vmatpush.bf16.msra.mxu0 %v10790_v12  ;;  %6333 = vmatpush.bf16.msrb.mxu2 %v9638_v15  ;;  %v10772_v12 = vld [vmem:[#allocation9 + $0x7ac] sm:$0xf]  ;;  %v4651_v15 = vperm.slane %v11360_v13, 2  ;;  %v6025_v13 = vadd.f32 %v11381_v52, %v11372_v36 }
 0x430   :  { %6322 = vmatmul.bf16.vlgmr.msrb.gmra.mxu1 %v11324_v20  ;;  %6289 = vmatpush.bf16.msra.mxu3 %v9334_v24  ;;  %v9318_v20 = vor.u32 %v10644_v29, %v9315_v30  ;;  %v9830_v19 = vor.u32 %v10772_v12, %v9827_v14  ;;  %v10760_v24 = vld [vmem:[#allocation9 + $0x74c] sm:$0xf]  ;;  %v10803_v12 = vld [vmem:[#allocation12 + $0xa0] sm:$0xff] }
 0x431   :  { %6638 = vmatpush.bf16.msra.mxu1 %v10798_v55  ;;  %v9782_v33 = vor.u32 %v10760_v24, %v9779_v40 }
 0x433   :  { %6626 = vmatpush.bf16.msra.mxu0 %v10789_v0  ;;  %6334 = vmatpush.bf16.msrb.mxu2 %v9622_v22  ;;  %v10794_v0 = vld [vmem:[#allocation12 + $0x58] sm:$0xff]  ;;  %v10764_v22 = vld [vmem:[#allocation9 + $0x76c] sm:$0xf] }
 0x434   :  { %6290 = vmatpush.bf16.msra.mxu3 %v9318_v20  ;;  %v10792_v20 = vld [vmem:[#allocation12 + $0x48] sm:$0xff] }
 0x435   :  { %v6117_v48 = vpop.f32.mrf.mxu1  ;;  %6639 = vmatpush.bf16.msra.mxu1 %v10797_v32 }
 0x436   :  { %6335 = vmatmul.bf16.vlgmr.msrb.gmra.mxu2 %v11334_v26  ;;  %v6104_v26 = vpop.f32.mrf.mxu0 }
 0x437   :  { %6627 = vmatpush.bf16.msra.mxu0 %v10788_v54  ;;  %v9747_v26 = vld [vmem:[#allocation9 + $0x718] sm:$0xf0] }
 0x438   :  { %6291 = vmatpush.bf16.msra.mxu3 %v9302_v39  ;;  %v9763_v39 = vld [vmem:[#allocation9 + $0x738] sm:$0xf0] }
 0x439   :  { %v11394_v2 = vpop.f32.mrf.mxu2  ;;  %6640 = vmatpush.bf16.msra.mxu1 %v10796_v6 }
 0x43b   :  { %6628 = vmatpush.bf16.msra.mxu0 %v10787_v17 }
 0x43c   :  { %6292 = vmatpush.bf16.msra.mxu3 %v9286_v46  ;;  %v10752_v46 = vld [vmem:[#allocation9 + $0x70c] sm:$0xf] }
 0x43d   :  { %6641 = vmatpush.bf16.msra.mxu1 %v10795_v18  ;;  %v9750_v16 = vor.u32 %v10752_v46, %v9747_v26  ;;  %v10810_v46 = vld [vmem:[#allocation12 + $0xd8] sm:$0xff]  ;;  %v10809_v26 = vld [vmem:[#allocation12 + $0xd0] sm:$0xff] }
 0x43f   :  { %6629 = vmatpush.bf16.msra.mxu0 %v10786_v35  ;;  %v10756_v35 = vld [vmem:[#allocation9 + $0x72c] sm:$0xf] }
 0x440   :  { %6293 = vmatpush.bf16.msra.mxu3 %v9270_v49  ;;  %v9766_v36 = vor.u32 %v10756_v35, %v9763_v39 }
 0x441   :  { %v6130_v31 = vpop.f32.mrf.mxu2  ;;  %6642 = vmatpush.bf16.msra.mxu1 %v10794_v0 }
 0x443   :  { %6630 = vmatpush.bf16.msra.mxu0 %v10785_v43  ;;  %v10791_v43 = vld [vmem:[#allocation12 + $0x40] sm:$0xff] }
 0x444   :  { %6294 = vmatpush.bf16.msra.mxu3 %v9254_v10 }
 0x445   :  { %6643 = vmatpush.bf16.msra.mxu1 %v10793_v25 }
 0x447   :  { %6631 = vmatpush.bf16.msra.mxu0 %v10784_v63  ;;  %v6037_v30 = vpop.f32.mrf.mxu3 }
 0x448   :  { %6295 = vmatpush.bf16.msra.mxu3 %v9238_v62  ;;  %v6038_v17 = vadd.f32 %v6037_v30, %v6025_v13  ;;  %v10806_v62 = vld [vmem:[#allocation12 + $0xb8] sm:$0xff] }
 0x449   :  { %6644 = vmatpush.bf16.msra.mxu1 %v10792_v20  ;;  %6651 = vmatpush.bf16.msra.mxu2 %v10806_v62  ;;  %v10814_v20 = vld [vmem:[#allocation12 + $0xf8] sm:$0xff] }
 0x44a   :  { %v6353_v34 = vmul.f32 0.1, %v6038_v17 }
 0x44b   :  { %6632 = vmatpush.bf16.msra.mxu0 %v10783_v7  ;;  %6296 = vmatmul.bf16.vlgmr.msra.gmra.mxu3 %v11304_v59  ;;  %v6154_v11 = vpop.f32.mrf.mxu0  ;;  %v9798_v59 = vor.u32 %v10764_v22, %v9795_v23 }
 0x44c   :  { %6340 = vmatpush.bf16.msrb.mxu3 %v9862_v38  ;;  %v6155_v21 = vadd.f32 %v6154_v11, %v4651_v15  ;;  %v6357_v42 = vmax.f32 %v6038_v17, %v6353_v34  ;;  %v10801_v11 = vld [vmem:[#allocation12 + $0x90] sm:$0xff] }
 0x44d   :  { %v6167_v47 = vpop.f32.mrf.mxu1  ;;  %6645 = vmatpush.bf16.msra.mxu1 %v10791_v43  ;;  %6652 = vmatpush.bf16.msra.mxu2 %v10805_v4 }
 0x44e   :  { %v6168_v57 = vadd.f32 %v6167_v47, %v6155_v21  ;;  %v6361_v52 = vpack.c.bf16 %v6357_v42, %v6357_v42  ;;  %v10800_v21 = vld [vmem:[#allocation12 + $0x88] sm:$0xff] }
 0x44f   :  { %v6039_v9 = vpop.f32.mrf.mxu3 }
 0x450   :  { %6341 = vmatpush.bf16.msrb.mxu3 %v9846_v8  ;;  %6633 = vmatmul.bf16.vlgmr.msra.gmra.mxu0 %v6361_v52  ;;  %v10811_v52 = vld [vmem:[#allocation12 + $0xe0] sm:$0xff]  ;;  %v10808_v9 = vld [vmem:[#allocation12 + $0xc8] sm:$0xff] }
 0x453   :  { %v6156_v54 = vpop.f32.mrf.mxu0 }
 0x454   :  { %6342 = vmatpush.bf16.msrb.mxu3 %v9830_v19 }
 0x455   :  { %v6169_v29 = vpop.f32.mrf.mxu1 }
 0x457   :  { %v6089_v63 = vpop.f32.mrf.mxu3 }
 0x458   :  { %6343 = vmatpush.bf16.msrb.mxu3 %v9814_v3  ;;  %v6090_v49 = vadd.f32 %v6089_v63, %v11386_v37  ;;  %v10799_v3 = vld [vmem:[#allocation12 + $0x80] sm:$0xff] }
 0x459   :  { %v6180_v44 = vpop.f32.mrf.mxu2  ;;  %v10807_v63 = vld [vmem:[#allocation12 + $0xc0] sm:$0xff] }
 0x45a   :  { %v6181_v53 = vadd.f32 %v6180_v44, %v6168_v57  ;;  %v6103_v50 = vadd.f32 %v11390_v60, %v6090_v49  ;;  %v10804_v60 = vld [vmem:[#allocation12 + $0xa8] sm:$0xff]  ;;  %v10813_v44 = vld [vmem:[#allocation12 + $0xf0] sm:$0xff] }
 0x45b   :  { %6653 = vmatpush.bf16.msra.mxu2 %v10804_v60 }
 0x45c   :  { %6344 = vmatpush.bf16.msrb.mxu3 %v9798_v59  ;;  %v6116_v10 = vadd.f32 %v11392_v61, %v6103_v50  ;;  %v10832_v61 = vld [vmem:[#allocation10] sm:$0xf] }
 0x45d   :  { %v4652_v8 = vperm.slane %v10832_v61, 3 }
 0x45e   :  { %v6129_v41 = vadd.f32 %v11394_v2, %v6116_v10  ;;  %v10802_v2 = vld [vmem:[#allocation12 + $0x98] sm:$0xff] }
 0x45f   :  { %v6091_v55 = vpop.f32.mrf.mxu3  ;;  %6654 = vmatpush.bf16.msra.mxu2 %v10803_v12 }
 0x460   :  { %6345 = vmatpush.bf16.msrb.mxu3 %v9782_v33 }
 0x461   :  { %v6182_v48 = vpop.f32.mrf.mxu2 }
 0x463   :  { %6655 = vmatpush.bf16.msra.mxu2 %v10802_v2 }
 0x464   :  { %6346 = vmatpush.bf16.msrb.mxu3 %v9766_v36 }
 0x467   :  { %6656 = vmatpush.bf16.msra.mxu2 %v10801_v11 }
 0x468   :  { %6347 = vmatpush.bf16.msrb.mxu3 %v9750_v16 }
 0x46b   :  { %6348 = vmatmul.bf16.vlgmr.msrb.gmra.mxu3 %v11356_v45  ;;  %v6206_v5 = vpop.f32.mrf.mxu0  ;;  %v6141_v28 = vpop.f32.mrf.mxu3  ;;  %6657 = vmatpush.bf16.msra.mxu2 %v10800_v21 }
 0x46c   :  { %v6142_v32 = vadd.f32 %v6141_v28, %v6129_v41  ;;  %6664 = vmatpush.bf16.msra.mxu3 %v10814_v20 }
 0x46d   :  { %v6219_v7 = vpop.f32.mrf.mxu1 }
 0x46e   :  { %v6354_v31 = vmul.f32 0.1, %v6142_v32 }
 0x46f   :  { %6658 = vmatpush.bf16.msra.mxu2 %v10799_v3 }
 0x470   :  { %v6358_v37 = vmax.f32 %v6142_v32, %v6354_v31  ;;  %6665 = vmatpush.bf16.msra.mxu3 %v10813_v44 }
 0x472   :  { %v6362_v45 = vpack.c.bf16 %v6358_v37, %v6358_v37 }
 0x473   :  { %v6208_v56 = vpop.f32.mrf.mxu0  ;;  %v6143_v1 = vpop.f32.mrf.mxu3 }
 0x474   :  { %6646 = vmatmul.bf16.vlgmr.msra.gmra.mxu1 %v6362_v45 }
 0x475   :  { %v6221_v27 = vpop.f32.mrf.mxu1 }
 0x479   :  { %v6232_v38 = vpop.f32.mrf.mxu2 }
 0x481   :  { %v6234_v6 = vpop.f32.mrf.mxu2 }
 0x48b   :  { %v6258_v14 = vpop.f32.mrf.mxu0  ;;  %v6193_v47 = vpop.f32.mrf.mxu3 }
 0x48c   :  { %v6259_v15 = vadd.f32 %v6258_v14, %v4652_v8  ;;  %v6194_v0 = vadd.f32 %v6193_v47, %v6181_v53  ;;  %v10812_v53 = vld [vmem:[#allocation12 + $0xe8] sm:$0xff] }
 0x48d   :  { %v6271_v18 = vpop.f32.mrf.mxu1  ;;  %6666 = vmatpush.bf16.msra.mxu3 %v10812_v53 }
 0x48e   :  { %v6272_v19 = vadd.f32 %v6271_v18, %v6259_v15  ;;  %v6207_v23 = vadd.f32 %v6206_v5, %v6194_v0 }
 0x490   :  { %v6220_v25 = vadd.f32 %v6219_v7, %v6207_v23 }
 0x491   :  { %6667 = vmatpush.bf16.msra.mxu3 %v10811_v52 }
 0x492   :  { %v6233_v30 = vadd.f32 %v6232_v38, %v6220_v25  ;;  %v10829_v38 = vld [vmem:[#allocation13] ss:$0 sm:$0xff] }
 0x493   :  { %v6260_v58 = vpop.f32.mrf.mxu0  ;;  %v6195_v59 = vpop.f32.mrf.mxu3 }
 0x495   :  { %v6273_v51 = vpop.f32.mrf.mxu1  ;;  %6668 = vmatpush.bf16.msra.mxu3 %v10810_v46 }
 0x499   :  { %v6284_v57 = vpop.f32.mrf.mxu2  ;;  %6669 = vmatpush.bf16.msra.mxu3 %v10809_v26 }
 0x49a   :  { %v6285_v22 = vadd.f32 %v6284_v57, %v6272_v19 }
 0x49d   :  { %6670 = vmatpush.bf16.msra.mxu3 %v10808_v9 }
 0x4a1   :  { %v6286_v13 = vpop.f32.mrf.mxu2  ;;  %6671 = vmatpush.bf16.msra.mxu3 %v10807_v63 }
 0x4ab   :  { %v6310_v54 = vpop.f32.mrf.mxu0 }
 0x4ad   :  { %v6323_v24 = vpop.f32.mrf.mxu1 }
 0x4b0   :  { %v6245_v17 = vpop.f32.mrf.mxu3 }
 0x4b1   :  { %v6246_v33 = vadd.f32 %v6245_v17, %v6233_v30 }
 0x4b3   :  { %v6312_v40 = vpop.f32.mrf.mxu0  ;;  %v6355_v35 = vmul.f32 0.1, %v6246_v33 }
 0x4b5   :  { %v6325_v29 = vpop.f32.mrf.mxu1  ;;  %v6359_v39 = vmax.f32 %v6246_v33, %v6355_v35 }
 0x4b7   :  { %v6363_v42 = vpack.c.bf16 %v6359_v39, %v6359_v39 }
 0x4b8   :  { %v6247_v43 = vpop.f32.mrf.mxu3 }
 0x4b9   :  { %v6336_v34 = vpop.f32.mrf.mxu2  ;;  %6659 = vmatmul.bf16.vlgmr.msra.gmra.mxu2 %v6363_v42 }
 0x4c1   :  { %v6338_v36 = vpop.f32.mrf.mxu2 }
 0x4cd   :  { %v6634_v7 = vpop.f32.mrf.mxu0 }
 0x4ce   :  { %v6297_v16 = vpop.f32.mrf.mxu3  ;;  %v6635_v31 = vadd.f32 %v10829_v38, %v6634_v7 }
 0x4cf   :  { %v6298_v48 = vadd.f32 %v6297_v16, %v6285_v22 }
 0x4d1   :  { %v6311_v49 = vadd.f32 %v6310_v54, %v6298_v48 }
 0x4d3   :  { %v6324_v50 = vadd.f32 %v6323_v24, %v6311_v49 }
 0x4d5   :  { %v6636_v10 = vpop.f32.mrf.mxu0  ;;  %v6337_v55 = vadd.f32 %v6336_v34, %v6324_v50 }
 0x4d6   :  { %v6299_v5 = vpop.f32.mrf.mxu3 }
 0x4ee   :  { %v6349_v56 = vpop.f32.mrf.mxu3 }
 0x4ef   :  { %v6350_v27 = vadd.f32 %v6349_v56, %v6337_v55 }
 0x4f1   :  { %v6356_v41 = vmul.f32 0.1, %v6350_v27  ;;  %v6647_v37 = vpop.f32.mrf.mxu1 }
 0x4f2   :  { %v6648_v4 = vadd.f32 %v6647_v37, %v6635_v31 }
 0x4f3   :  { %v6360_v28 = vmax.f32 %v6350_v27, %v6356_v41 }
 0x4f5   :  { %v6364_v62 = vpack.c.bf16 %v6360_v28, %v6360_v28 }
 0x4f6   :  { %v6351_v32 = vpop.f32.mrf.mxu3 }
 0x4f7   :  { %6672 = vmatmul.bf16.vlgmr.msra.gmra.mxu3 %v6364_v62 }
 0x4f9   :  { %v6649_v45 = vpop.f32.mrf.mxu1 }
 0x53c   :  { %v6660_v1 = vpop.f32.mrf.mxu2 }
 0x53d   :  { %v6661_v6 = vadd.f32 %v6660_v1, %v6648_v4 }
 0x544   :  { %v6662_v60 = vpop.f32.mrf.mxu2 }
 0x57a   :  { %v6673_v61 = vpop.f32.mrf.mxu3 }
 0x57b   :  { %v6674_v8 = vadd.f32 %v6673_v61, %v6661_v6 }
 0x57d   :  { %6677 = vst [vmem:[%s11417_s9] sm:$0x3] %v6674_v8 }
 0x582   :  { %v6675_v12 = vpop.f32.mrf.mxu3 }
 0x583   :  { %6682 = vsyncpa [#allocation3], 1 }
 0x584   :  { %6683 = vsyncpa [#allocation5], 1 }
 0x585   :  { %6684 = vsyncpa [#allocation8], 1 }
 0x586   :  { %6685 = vsyncpa [#allocation11], 1 }
 0x587   :  { %6686 = vsyncpa [#allocation14], 1 }

</bundles_post_ra>
